<compile_context>
chip_gen: v7x
topology: tpu7x:2x2x1
jax: 0.10.0
libtpu: 0.0.40
codegen_flags: <defaults>
</compile_context>

<pallas_src>
import jax
import jax.numpy as jnp
from jax.experimental import pallas as pl
from jax.experimental.pallas import tpu as pltpu


# ----------------------------------------------------------------------------
# Synthetic stand-in configuration
# ----------------------------------------------------------------------------
IMG_C, IMG_HW = 3, 16          # images (B, 3, 16, 16)
IMG_FEAT = 64                  # image-encoder feature dim (timm stand-in)
TXT_HIDDEN = 32                # BERT stand-in hidden size
SEQ = 8                        # text-encoder sequence length
LATENT = 16                    # latent_dim
GPT_EMBD = 32                  # GPT2 stand-in n_embd
VOCAB = 128                    # vocab_size (128 -> lane-dense LM head)
BOS_ID = 0

DEC1_C = 128                   # deconv1 output channels
DEC_K = 5                      # deconv kernel size
DEC1_HW = 5                    # deconv1 output spatial (1x1 input, k=5)
DEC2_HW = 9                    # deconv2 output spatial
N_POS = DEC1_HW * DEC1_HW      # 25 deconv1 spatial positions

LOG_HALF = -0.6931471805599453
SQRT_HALF = 0.7071067811865476

# Order in which weight arrays are passed to the fused kernel.
_WKEYS = (
    "enc_img_w", "enc_img_b",
    "img_lat_w", "img_lat_b",
    "bert_wq", "bert_wk", "bert_wv", "bert_wo", "bert_bo",
    "txt_lat_w", "txt_lat_b",
    "fc_w", "fc_b",
    "deconv1_mat", "deconv1_bias",
    "deconv2_cmat",
    "lat2gpt_w", "lat2gpt_b", "bos_emb",
    "gpt_ln1_g", "gpt_ln1_b", "gpt_wv", "gpt_bv", "gpt_wo", "gpt_bo",
    "gpt_ln2_g", "gpt_ln2_b", "gpt_wfc", "gpt_bfc", "gpt_wproj", "gpt_bproj",
    "gpt_lnf_g", "gpt_lnf_b", "gpt_lm_head",
)


# ----------------------------------------------------------------------------
# In-kernel helpers (operate on values, f32 epilogues, bf16 into the MXU)
# ----------------------------------------------------------------------------
def _layernorm(x, g, b):
    m = jnp.mean(x, axis=-1, keepdims=True)
    v = jnp.mean((x - m) ** 2, axis=-1, keepdims=True)
    return (x - m) * jax.lax.rsqrt(v + 1e-5) * g + b


def _dot(a_f32, w_ref):
    """Cast activation to bf16, matmul against a bf16 weight ref, f32 out."""
    return jnp.dot(a_f32.astype(jnp.bfloat16), w_ref[...],
                   preferred_element_type=jnp.float32)


# ----------------------------------------------------------------------------
# Fused forward kernel
# ----------------------------------------------------------------------------
def _fused_vae_kernel(x_ref, emb_ref, mask_ref, eps_ref, *rest):
    w = dict(zip(_WKEYS, rest[: len(_WKEYS)]))
    lat_ref, logits_ref, q_ref = rest[len(_WKEYS):]

    B = x_ref.shape[0]

    # ---- image encoder stand-in + image_latent ------------------------------
    img_feat = jnp.maximum(_dot(x_ref[...], w["enc_img_w"]) + w["enc_img_b"][...],
                           0.0)
    image_mu = _dot(img_feat, w["img_lat_w"]) + w["img_lat_b"][...]

    # ---- BERT-style masked CLS attention + text_latent -----------------------
    emb = emb_ref[...]                      # (B, T, H) f32
    mask = mask_ref[...]                    # (B, T)    f32
    _, T, H = emb.shape
    emb2 = emb.reshape(B * T, H)
    q0 = _dot(emb[:, 0, :], w["bert_wq"])                       # (B, H)
    k = _dot(emb2, w["bert_wk"]).reshape(B, T, H)
    v = _dot(emb2, w["bert_wv"]).reshape(B, T, H)
    scores = jnp.sum(q0[:, None, :] * k, axis=-1) / jnp.sqrt(jnp.float32(H))
    scores = jnp.where(mask > 0.0, scores, -1e9)
    scores = scores - jnp.max(scores, axis=-1, keepdims=True)
    p = jnp.exp(scores)
    p = p * pl.reciprocal(jnp.sum(p, axis=-1, keepdims=True), approx=True)
    ctx = jnp.sum(p[:, :, None] * v, axis=1)                    # (B, H)
    text_feat = _dot(ctx, w["bert_wo"]) + w["bert_bo"][...]
    text_mu = _dot(text_feat, w["txt_lat_w"]) + w["txt_lat_b"][...]

    # ---- product of experts + reparameterization (constant-folded) ----------
    # image_logvar == text_logvar == 0 in the reference module, so both
    # precisions are 1: PoE reduces to a plain average, combined_logvar is the
    # constant log(1/2) and std == sqrt(1/2).
    combined_mu = 0.5 * (image_mu + text_mu)
    z = combined_mu + eps_ref[...] * SQRT_HALF

    lat_ref[...] = jnp.zeros(lat_ref.shape, lat_ref.dtype)
    lat_ref[:, 0:LATENT] = combined_mu
    lat_ref[:, LATENT:2 * LATENT] = jnp.full((B, LATENT), LOG_HALF, jnp.float32)

    # ---- image decoder: fc -> deconv1 -> deconv2 channel contraction --------
    h = jnp.maximum(_dot(z, w["fc_w"]) + w["fc_b"][...], 0.0)               # (B,256)
    d1 = jnp.maximum(_dot(h, w["deconv1_mat"]) + w["deconv1_bias"][...], 0.0)
    d1 = d1.astype(jnp.bfloat16)                                            # (B,25*128)
    # deconv2: compact weight (128, C*25 zero-padded to 128); one lane-aligned
    # 128-channel contraction per deconv1 spatial position.  The spatial
    # scatter-add of these 25 taps into the 9x9 output happens in the wrapper.
    w2 = w["deconv2_cmat"][...]
    for pos in range(N_POS):
        qp = jnp.dot(d1[:, pos * DEC1_C:(pos + 1) * DEC1_C], w2,
                     preferred_element_type=jnp.float32)                    # (B,128)
        q_ref[pos * B:(pos + 1) * B, :] = qp

    # ---- text decoder: latent->gpt2 proj + single-token block + LM head -----
    z_proj = _dot(z, w["lat2gpt_w"]) + w["lat2gpt_b"][...]
    hg = z_proj + w["bos_emb"][...]                                          # wte(bos)+z
    a_in = _layernorm(hg, w["gpt_ln1_g"][...], w["gpt_ln1_b"][...])
    # seq-len 1 => attention reduces to the V / out-proj path
    attn = _dot(_dot(a_in, w["gpt_wv"]) + w["gpt_bv"][...], w["gpt_wo"]) \
        + w["gpt_bo"][...]
    hg = hg + attn
    m_in = _layernorm(hg, w["gpt_ln2_g"][...], w["gpt_ln2_b"][...])
    f = _dot(m_in, w["gpt_wfc"]) + w["gpt_bfc"][...]
    # GPT2 "gelu_new" (tanh approximation)
    f = 0.5 * f * (1.0 + jnp.tanh(0.7978845608028654 * (f + 0.044715 * f ** 3)))
    hg = hg + _dot(f, w["gpt_wproj"]) + w["gpt_bproj"][...]
    hg = _layernorm(hg, w["gpt_lnf_g"][...], w["gpt_lnf_b"][...])
    logits_ref[...] = _dot(hg, w["gpt_lm_head"])                             # (B, V)


def _full_specs(args):
    """Full-array VMEM BlockSpecs (grid=(1,)) for a tuple of arrays."""
    specs = []
    for a in args:
        nd = a.ndim
        specs.append(pl.BlockSpec(a.shape, lambda i, nd=nd: (0,) * nd))
    return specs


def fused_vae_call(params, x_flat, emb, mask_f, eps):
    B = x_flat.shape[0]
    weights = tuple(params[k] for k in _WKEYS)
    args = (x_flat, emb, mask_f, eps) + weights
    out_shape = [
        jax.ShapeDtypeStruct((B, 128), jnp.float32),              # mu | logvar slab
        jax.ShapeDtypeStruct((B, VOCAB), jnp.float32),            # LM logits
        jax.ShapeDtypeStruct((N_POS * B, DEC1_C), jnp.float32),   # deconv2 taps
    ]
    out_specs = [
        pl.BlockSpec((B, 128), lambda i: (0, 0)),
        pl.BlockSpec((B, VOCAB), lambda i: (0, 0)),
        pl.BlockSpec((N_POS * B, DEC1_C), lambda i: (0, 0)),
    ]
    return pl.pallas_call(
        _fused_vae_kernel,
        grid=(1,),
        in_specs=_full_specs(args),
        out_specs=out_specs,
        out_shape=out_shape,
        compiler_params=pltpu.CompilerParams(
            dimension_semantics=("arbitrary",)),
    )(*args)


# ----------------------------------------------------------------------------
# Parameter construction (deterministic, synthetic stand-ins)
# ----------------------------------------------------------------------------
def make_params(key):
    def nrm(k, shape, scale=0.02):
        return scale * jax.random.normal(k, shape, dtype=jnp.float32)

    ks = iter(jax.random.split(key, 48))
    bf16 = jnp.bfloat16
    p = {}

    # image encoder stand-in + image_latent
    p["enc_img_w"] = nrm(next(ks), (IMG_C * IMG_HW * IMG_HW, IMG_FEAT)).astype(bf16)
    p["enc_img_b"] = nrm(next(ks), (1, IMG_FEAT))
    p["img_lat_w"] = nrm(next(ks), (IMG_FEAT, LATENT)).astype(bf16)
    p["img_lat_b"] = nrm(next(ks), (1, LATENT))

    # text encoder stand-in (BERT-ish) + text_latent
    p["bert_wte"] = nrm(next(ks), (VOCAB, TXT_HIDDEN))
    p["bert_wpe"] = nrm(next(ks), (SEQ, TXT_HIDDEN))
    p["bert_wq"] = nrm(next(ks), (TXT_HIDDEN, TXT_HIDDEN)).astype(bf16)
    p["bert_wk"] = nrm(next(ks), (TXT_HIDDEN, TXT_HIDDEN)).astype(bf16)
    p["bert_wv"] = nrm(next(ks), (TXT_HIDDEN, TXT_HIDDEN)).astype(bf16)
    p["bert_wo"] = nrm(next(ks), (TXT_HIDDEN, TXT_HIDDEN)).astype(bf16)
    p["bert_bo"] = nrm(next(ks), (1, TXT_HIDDEN))
    p["txt_lat_w"] = nrm(next(ks), (TXT_HIDDEN, LATENT)).astype(bf16)
    p["txt_lat_b"] = nrm(next(ks), (1, LATENT))

    # ImageDecoder: fc + two ConvTranspose2d
    p["fc_w"] = nrm(next(ks), (LATENT, 256)).astype(bf16)
    p["fc_b"] = nrm(next(ks), (1, 256))
    deconv1_w = nrm(next(ks), (256, DEC1_C, DEC_K, DEC_K))   # (Cin, Cout, kH, kW)
    deconv1_b = nrm(next(ks), (DEC1_C,))
    deconv2_w = nrm(next(ks), (DEC1_C, IMG_C, DEC_K, DEC_K))
    p["deconv2_b"] = nrm(next(ks), (IMG_C,))

    # deconv1 on a 1x1 input == matmul.  Column layout (pos, cout) so deconv2
    # can slice 128-channel groups lane-aligned inside the kernel.
    p["deconv1_mat"] = (deconv1_w.transpose(0, 2, 3, 1)
                        .reshape(256, N_POS * DEC1_C).astype(bf16))
    p["deconv1_bias"] = jnp.tile(deconv1_b, N_POS).reshape(1, N_POS * DEC1_C)
    # compact deconv2 weight: (Cin=128, Cout*kH*kW=75), zero-padded to 128 lanes
    w2 = deconv2_w.reshape(DEC1_C, IMG_C * DEC_K * DEC_K)
    p["deconv2_cmat"] = jnp.pad(w2, ((0, 0), (0, DEC1_C - w2.shape[1]))).astype(bf16)

    # Text decoder (GPT2 stand-in)
    p["lat2gpt_w"] = nrm(next(ks), (LATENT, GPT_EMBD)).astype(bf16)
    p["lat2gpt_b"] = nrm(next(ks), (1, GPT_EMBD))
    gpt_wte = nrm(next(ks), (VOCAB, GPT_EMBD))
    p["bos_emb"] = gpt_wte[BOS_ID:BOS_ID + 1]                   # (1, E), precomputed
    p["gpt_lm_head"] = gpt_wte.T.astype(bf16)                   # tied head, (E, V)
    p["gpt_ln1_g"] = jnp.ones((1, GPT_EMBD), jnp.float32)
    p["gpt_ln1_b"] = jnp.zeros((1, GPT_EMBD), jnp.float32)
    p["gpt_wv"] = nrm(next(ks), (GPT_EMBD, GPT_EMBD)).astype(bf16)
    p["gpt_bv"] = nrm(next(ks), (1, GPT_EMBD))
    p["gpt_wo"] = nrm(next(ks), (GPT_EMBD, GPT_EMBD)).astype(bf16)
    p["gpt_bo"] = nrm(next(ks), (1, GPT_EMBD))
    p["gpt_ln2_g"] = jnp.ones((1, GPT_EMBD), jnp.float32)
    p["gpt_ln2_b"] = jnp.zeros((1, GPT_EMBD), jnp.float32)
    p["gpt_wfc"] = nrm(next(ks), (GPT_EMBD, 4 * GPT_EMBD)).astype(bf16)
    p["gpt_bfc"] = nrm(next(ks), (1, 4 * GPT_EMBD))
    p["gpt_wproj"] = nrm(next(ks), (4 * GPT_EMBD, GPT_EMBD)).astype(bf16)
    p["gpt_bproj"] = nrm(next(ks), (1, GPT_EMBD))
    p["gpt_lnf_g"] = jnp.ones((1, GPT_EMBD), jnp.float32)
    p["gpt_lnf_b"] = jnp.zeros((1, GPT_EMBD), jnp.float32)
    return p


# ----------------------------------------------------------------------------
# Forward pass (MultimodalVAE.forward)
# ----------------------------------------------------------------------------
def multimodal_vae_forward(params, images, input_ids, attention_mask, eps):
    B = images.shape[0]

    # glue: flatten image, embedding gathers, mask cast
    x_flat = images.reshape(B, -1).astype(jnp.float32)
    pos = jnp.arange(SEQ)
    emb = params["bert_wte"][input_ids] + params["bert_wpe"][pos][None, :, :]
    mask_f = attention_mask.astype(jnp.float32)

    lat, logits, q = fused_vae_call(params, x_flat, emb, mask_f, eps)

    combined_mu = lat[:, :LATENT]
    combined_logvar = lat[:, LATENT:2 * LATENT]
    text_logits = logits[:, None, :]                             # (B, 1, V)
    # TODO(synk): GPT2 past_key_values KV-cache (use_cache=True) is not
    # reproduced; only the logits are computed.

    # deconv2 spatial scatter-add + bias + sigmoid: tiny (~4K element) glue.
    # All channel-contraction FLOPs / weights live inside the Pallas kernel.
    taps = q[:, :IMG_C * N_POS].reshape(DEC1_HW, DEC1_HW, B, IMG_C, DEC_K, DEC_K)
    recon = jnp.zeros((B, IMG_C, DEC2_HW, DEC2_HW), jnp.float32)
    for ih in range(DEC1_HW):
        for iw in range(DEC1_HW):
            recon = recon.at[:, :, ih:ih + DEC_K, iw:iw + DEC_K].add(taps[ih, iw])
    img_recon = jax.nn.sigmoid(recon + params["deconv2_b"][None, :, None, None])

    return img_recon, text_logits, combined_mu, combined_logvar


# ----------------------------------------------------------------------------
if __name__ == "__main__":
    key = jax.random.PRNGKey(0)
    k_param, k_img, k_ids, k_eps = jax.random.split(key, 4)

    B = 2
    params = make_params(k_param)
    images = jax.random.normal(k_img, (B, IMG_C, IMG_HW, IMG_HW), jnp.float32)
    input_ids = jax.random.randint(k_ids, (B, SEQ), 0, VOCAB, dtype=jnp.int32)
    attention_mask = jnp.ones((B, SEQ), jnp.int32).at[1, SEQ - 2:].set(0)
    eps = jax.random.normal(k_eps, (B, LATENT), jnp.float32)

    fwd = jax.jit(multimodal_vae_forward)
    img_recon, text_logits, mu, logvar = fwd(params, images, input_ids,
                                             attention_mask, eps)

    jax.block_until_ready((img_recon, text_logits, mu, logvar))
    assert img_recon.shape == (B, IMG_C, DEC2_HW, DEC2_HW)
    assert text_logits.shape == (B, 1, VOCAB)
    assert mu.shape == (B, LATENT) and logvar.shape == (B, LATENT)
    print("KERNEL_OK")
</pallas_src>

<mosaic_0001>
module attributes {stable_mosaic.version = 11 : i64} {
  func.func @_fused_vae_kernel(%arg0: i32, %arg1: memref<2x768xf32, #tpu.memory_space<vmem>>, %arg2: memref<2x8x32xf32, #tpu.memory_space<vmem>>, %arg3: memref<2x8xf32, #tpu.memory_space<vmem>>, %arg4: memref<2x16xf32, #tpu.memory_space<vmem>>, %arg5: memref<768x64xbf16, #tpu.memory_space<vmem>>, %arg6: memref<1x64xf32, #tpu.memory_space<vmem>>, %arg7: memref<64x16xbf16, #tpu.memory_space<vmem>>, %arg8: memref<1x16xf32, #tpu.memory_space<vmem>>, %arg9: memref<32x32xbf16, #tpu.memory_space<vmem>>, %arg10: memref<32x32xbf16, #tpu.memory_space<vmem>>, %arg11: memref<32x32xbf16, #tpu.memory_space<vmem>>, %arg12: memref<32x32xbf16, #tpu.memory_space<vmem>>, %arg13: memref<1x32xf32, #tpu.memory_space<vmem>>, %arg14: memref<32x16xbf16, #tpu.memory_space<vmem>>, %arg15: memref<1x16xf32, #tpu.memory_space<vmem>>, %arg16: memref<16x256xbf16, #tpu.memory_space<vmem>>, %arg17: memref<1x256xf32, #tpu.memory_space<vmem>>, %arg18: memref<256x3200xbf16, #tpu.memory_space<vmem>>, %arg19: memref<1x3200xf32, #tpu.memory_space<vmem>>, %arg20: memref<128x128xbf16, #tpu.memory_space<vmem>>, %arg21: memref<16x32xbf16, #tpu.memory_space<vmem>>, %arg22: memref<1x32xf32, #tpu.memory_space<vmem>>, %arg23: memref<1x32xf32, #tpu.memory_space<vmem>>, %arg24: memref<1x32xf32, #tpu.memory_space<vmem>>, %arg25: memref<1x32xf32, #tpu.memory_space<vmem>>, %arg26: memref<32x32xbf16, #tpu.memory_space<vmem>>, %arg27: memref<1x32xf32, #tpu.memory_space<vmem>>, %arg28: memref<32x32xbf16, #tpu.memory_space<vmem>>, %arg29: memref<1x32xf32, #tpu.memory_space<vmem>>, %arg30: memref<1x32xf32, #tpu.memory_space<vmem>>, %arg31: memref<1x32xf32, #tpu.memory_space<vmem>>, %arg32: memref<32x128xbf16, #tpu.memory_space<vmem>>, %arg33: memref<1x128xf32, #tpu.memory_space<vmem>>, %arg34: memref<128x32xbf16, #tpu.memory_space<vmem>>, %arg35: memref<1x32xf32, #tpu.memory_space<vmem>>, %arg36: memref<1x32xf32, #tpu.memory_space<vmem>>, %arg37: memref<1x32xf32, #tpu.memory_space<vmem>>, %arg38: memref<32x128xbf16, #tpu.memory_space<vmem>>, %arg39: memref<2x128xf32, #tpu.memory_space<vmem>>, %arg40: memref<2x128xf32, #tpu.memory_space<vmem>>, %arg41: memref<50x128xf32, #tpu.memory_space<vmem>>) attributes {dimension_semantics = [#tpu.dimension_semantics<arbitrary>], iteration_bounds = array<i64: 1>, scalar_prefetch = 0 : i64, scratch_operands = 0 : i64, tpu.core_type = #tpu.core_type<tc>, window_params = [{pipeline_mode = #tpu.pipeline_mode<synchronous>, transform_indices = @transform_0, window_bounds = array<i64: 2, 768>}, {pipeline_mode = #tpu.pipeline_mode<synchronous>, transform_indices = @transform_1, window_bounds = array<i64: 2, 8, 32>}, {pipeline_mode = #tpu.pipeline_mode<synchronous>, transform_indices = @transform_2, window_bounds = array<i64: 2, 8>}, {pipeline_mode = #tpu.pipeline_mode<synchronous>, transform_indices = @transform_3, window_bounds = array<i64: 2, 16>}, {pipeline_mode = #tpu.pipeline_mode<synchronous>, transform_indices = @transform_4, window_bounds = array<i64: 768, 64>}, {pipeline_mode = #tpu.pipeline_mode<synchronous>, transform_indices = @transform_5, window_bounds = array<i64: 1, 64>}, {pipeline_mode = #tpu.pipeline_mode<synchronous>, transform_indices = @transform_6, window_bounds = array<i64: 64, 16>}, {pipeline_mode = #tpu.pipeline_mode<synchronous>, transform_indices = @transform_7, window_bounds = array<i64: 1, 16>}, {pipeline_mode = #tpu.pipeline_mode<synchronous>, transform_indices = @transform_8, window_bounds = array<i64: 32, 32>}, {pipeline_mode = #tpu.pipeline_mode<synchronous>, transform_indices = @transform_9, window_bounds = array<i64: 32, 32>}, {pipeline_mode = #tpu.pipeline_mode<synchronous>, transform_indices = @transform_10, window_bounds = array<i64: 32, 32>}, {pipeline_mode = #tpu.pipeline_mode<synchronous>, transform_indices = @transform_11, window_bounds = array<i64: 32, 32>}, {pipeline_mode = #tpu.pipeline_mode<synchronous>, transform_indices = @transform_12, window_bounds = array<i64: 1, 32>}, {pipeline_mode = #tpu.pipeline_mode<synchronous>, transform_indices = @transform_13, window_bounds = array<i64: 32, 16>}, {pipeline_mode = #tpu.pipeline_mode<synchronous>, transform_indices = @transform_14, window_bounds = array<i64: 1, 16>}, {pipeline_mode = #tpu.pipeline_mode<synchronous>, transform_indices = @transform_15, window_bounds = array<i64: 16, 256>}, {pipeline_mode = #tpu.pipeline_mode<synchronous>, transform_indices = @transform_16, window_bounds = array<i64: 1, 256>}, {pipeline_mode = #tpu.pipeline_mode<synchronous>, transform_indices = @transform_17, window_bounds = array<i64: 256, 3200>}, {pipeline_mode = #tpu.pipeline_mode<synchronous>, transform_indices = @transform_18, window_bounds = array<i64: 1, 3200>}, {pipeline_mode = #tpu.pipeline_mode<synchronous>, transform_indices = @transform_19, window_bounds = array<i64: 128, 128>}, {pipeline_mode = #tpu.pipeline_mode<synchronous>, transform_indices = @transform_20, window_bounds = array<i64: 16, 32>}, {pipeline_mode = #tpu.pipeline_mode<synchronous>, transform_indices = @transform_21, window_bounds = array<i64: 1, 32>}, {pipeline_mode = #tpu.pipeline_mode<synchronous>, transform_indices = @transform_22, window_bounds = array<i64: 1, 32>}, {pipeline_mode = #tpu.pipeline_mode<synchronous>, transform_indices = @transform_23, window_bounds = array<i64: 1, 32>}, {pipeline_mode = #tpu.pipeline_mode<synchronous>, transform_indices = @transform_24, window_bounds = array<i64: 1, 32>}, {pipeline_mode = #tpu.pipeline_mode<synchronous>, transform_indices = @transform_25, window_bounds = array<i64: 32, 32>}, {pipeline_mode = #tpu.pipeline_mode<synchronous>, transform_indices = @transform_26, window_bounds = array<i64: 1, 32>}, {pipeline_mode = #tpu.pipeline_mode<synchronous>, transform_indices = @transform_27, window_bounds = array<i64: 32, 32>}, {pipeline_mode = #tpu.pipeline_mode<synchronous>, transform_indices = @transform_28, window_bounds = array<i64: 1, 32>}, {pipeline_mode = #tpu.pipeline_mode<synchronous>, transform_indices = @transform_29, window_bounds = array<i64: 1, 32>}, {pipeline_mode = #tpu.pipeline_mode<synchronous>, transform_indices = @transform_30, window_bounds = array<i64: 1, 32>}, {pipeline_mode = #tpu.pipeline_mode<synchronous>, transform_indices = @transform_31, window_bounds = array<i64: 32, 128>}, {pipeline_mode = #tpu.pipeline_mode<synchronous>, transform_indices = @transform_32, window_bounds = array<i64: 1, 128>}, {pipeline_mode = #tpu.pipeline_mode<synchronous>, transform_indices = @transform_33, window_bounds = array<i64: 128, 32>}, {pipeline_mode = #tpu.pipeline_mode<synchronous>, transform_indices = @transform_34, window_bounds = array<i64: 1, 32>}, {pipeline_mode = #tpu.pipeline_mode<synchronous>, transform_indices = @transform_35, window_bounds = array<i64: 1, 32>}, {pipeline_mode = #tpu.pipeline_mode<synchronous>, transform_indices = @transform_36, window_bounds = array<i64: 1, 32>}, {pipeline_mode = #tpu.pipeline_mode<synchronous>, transform_indices = @transform_37, window_bounds = array<i64: 32, 128>}, {pipeline_mode = #tpu.pipeline_mode<synchronous>, transform_indices = @transform_38, window_bounds = array<i64: 2, 128>}, {pipeline_mode = #tpu.pipeline_mode<synchronous>, transform_indices = @transform_39, window_bounds = array<i64: 2, 128>}, {pipeline_mode = #tpu.pipeline_mode<synchronous>, transform_indices = @transform_40, window_bounds = array<i64: 50, 128>}]} {
    %c0 = arith.constant 0 : index
    %c0_0 = arith.constant 0 : index
    %0 = vector.load %arg1[%c0, %c0_0] : memref<2x768xf32, #tpu.memory_space<vmem>>, vector<2x768xf32>
    %1 = arith.truncf %0 : vector<2x768xf32> to vector<2x768xbf16>
    %c0_1 = arith.constant 0 : index
    %c0_2 = arith.constant 0 : index
    %2 = vector.load %arg5[%c0_1, %c0_2] : memref<768x64xbf16, #tpu.memory_space<vmem>>, vector<768x64xbf16>
    %cst = arith.constant dense<0.000000e+00> : vector<2x64xf32>
    %3 = tpu.matmul %1, %2, %cst {dimension_numbers = #tpu.dot_dimension_numbers<[1], [0], [0], [1], [0, 0, 1, 1], [], []>} : vector<2x768xbf16>, vector<768x64xbf16>, vector<2x64xf32> -> vector<2x64xf32>
    %c0_3 = arith.constant 0 : index
    %c0_4 = arith.constant 0 : index
    %4 = vector.load %arg6[%c0_3, %c0_4] : memref<1x64xf32, #tpu.memory_space<vmem>>, vector<1x64xf32>
    %5 = vector.broadcast %4 : vector<1x64xf32> to vector<2x64xf32>
    %6 = arith.addf %3, %5 : vector<2x64xf32>
    %cst_5 = arith.constant 0.000000e+00 : f32
    %7 = vector.broadcast %cst_5 : f32 to vector<2x64xf32>
    %8 = arith.maximumf %6, %7 : vector<2x64xf32>
    %9 = arith.truncf %8 : vector<2x64xf32> to vector<2x64xbf16>
    %c0_6 = arith.constant 0 : index
    %c0_7 = arith.constant 0 : index
    %10 = vector.load %arg7[%c0_6, %c0_7] : memref<64x16xbf16, #tpu.memory_space<vmem>>, vector<64x16xbf16>
    %cst_8 = arith.constant dense<0.000000e+00> : vector<2x16xf32>
    %11 = tpu.matmul %9, %10, %cst_8 {dimension_numbers = #tpu.dot_dimension_numbers<[1], [0], [0], [1], [0, 0, 1, 1], [], []>} : vector<2x64xbf16>, vector<64x16xbf16>, vector<2x16xf32> -> vector<2x16xf32>
    %c0_9 = arith.constant 0 : index
    %c0_10 = arith.constant 0 : index
    %12 = vector.load %arg8[%c0_9, %c0_10] : memref<1x16xf32, #tpu.memory_space<vmem>>, vector<1x16xf32>
    %13 = vector.broadcast %12 : vector<1x16xf32> to vector<2x16xf32>
    %14 = arith.addf %11, %13 : vector<2x16xf32>
    %c0_11 = arith.constant 0 : index
    %c0_12 = arith.constant 0 : index
    %c0_13 = arith.constant 0 : index
    %15 = vector.load %arg2[%c0_11, %c0_12, %c0_13] : memref<2x8x32xf32, #tpu.memory_space<vmem>>, vector<2x8x32xf32>
    %c0_14 = arith.constant 0 : index
    %c0_15 = arith.constant 0 : index
    %16 = vector.load %arg3[%c0_14, %c0_15] : memref<2x8xf32, #tpu.memory_space<vmem>>, vector<2x8xf32>
    %17 = vector.shape_cast %15 : vector<2x8x32xf32> to vector<16x32xf32>
    %18 = vector.extract_strided_slice %15 {offsets = [0, 0, 0], sizes = [2, 1, 32], strides = [1, 1, 1]} : vector<2x8x32xf32> to vector<2x1x32xf32>
    %19 = vector.shape_cast %18 : vector<2x1x32xf32> to vector<2x32xf32>
    %20 = arith.truncf %19 : vector<2x32xf32> to vector<2x32xbf16>
    %c0_16 = arith.constant 0 : index
    %c0_17 = arith.constant 0 : index
    %21 = vector.load %arg9[%c0_16, %c0_17] : memref<32x32xbf16, #tpu.memory_space<vmem>>, vector<32x32xbf16>
    %cst_18 = arith.constant dense<0.000000e+00> : vector<2x32xf32>
    %22 = tpu.matmul %20, %21, %cst_18 {dimension_numbers = #tpu.dot_dimension_numbers<[1], [0], [0], [1], [0, 0, 1, 1], [], []>} : vector<2x32xbf16>, vector<32x32xbf16>, vector<2x32xf32> -> vector<2x32xf32>
    %23 = arith.truncf %17 : vector<16x32xf32> to vector<16x32xbf16>
    %c0_19 = arith.constant 0 : index
    %c0_20 = arith.constant 0 : index
    %24 = vector.load %arg10[%c0_19, %c0_20] : memref<32x32xbf16, #tpu.memory_space<vmem>>, vector<32x32xbf16>
    %cst_21 = arith.constant dense<0.000000e+00> : vector<16x32xf32>
    %25 = tpu.matmul %23, %24, %cst_21 {dimension_numbers = #tpu.dot_dimension_numbers<[1], [0], [0], [1], [0, 0, 1, 1], [], []>} : vector<16x32xbf16>, vector<32x32xbf16>, vector<16x32xf32> -> vector<16x32xf32>
    %26 = vector.shape_cast %25 : vector<16x32xf32> to vector<2x8x32xf32>
    %27 = arith.truncf %17 : vector<16x32xf32> to vector<16x32xbf16>
    %c0_22 = arith.constant 0 : index
    %c0_23 = arith.constant 0 : index
    %28 = vector.load %arg11[%c0_22, %c0_23] : memref<32x32xbf16, #tpu.memory_space<vmem>>, vector<32x32xbf16>
    %cst_24 = arith.constant dense<0.000000e+00> : vector<16x32xf32>
    %29 = tpu.matmul %27, %28, %cst_24 {dimension_numbers = #tpu.dot_dimension_numbers<[1], [0], [0], [1], [0, 0, 1, 1], [], []>} : vector<16x32xbf16>, vector<32x32xbf16>, vector<16x32xf32> -> vector<16x32xf32>
    %30 = vector.shape_cast %29 : vector<16x32xf32> to vector<2x8x32xf32>
    %31 = vector.shape_cast %22 : vector<2x32xf32> to vector<2x1x32xf32>
    %32 = vector.broadcast %31 : vector<2x1x32xf32> to vector<2x8x32xf32>
    %33 = arith.mulf %32, %26 : vector<2x8x32xf32>
    %cst_25 = arith.constant dense<0.000000e+00> : vector<2x8xf32>
    %34 = vector.multi_reduction <add>, %33, %cst_25 [2] : vector<2x8x32xf32> to vector<2x8xf32>
    %cst_26 = arith.constant 3.200000e+01 : f32
    %35 = math.sqrt %cst_26 : f32
    %36 = vector.broadcast %35 : f32 to vector<2x8xf32>
    %37 = arith.divf %34, %36 : vector<2x8xf32>
    %cst_27 = arith.constant 0.000000e+00 : f32
    %38 = vector.broadcast %cst_27 : f32 to vector<2x8xf32>
    %39 = arith.cmpf ogt, %16, %38 : vector<2x8xf32>
    %cst_28 = arith.constant -1.000000e+09 : f32
    %40 = vector.broadcast %cst_28 : f32 to vector<2x8xf32>
    %41 = arith.select %39, %37, %40 : vector<2x8xi1>, vector<2x8xf32>
    %cst_29 = arith.constant dense<0xFF800000> : vector<2xf32>
    %42 = vector.multi_reduction <maximumf>, %41, %cst_29 [1] : vector<2x8xf32> to vector<2xf32>
    %43 = vector.shape_cast %42 : vector<2xf32> to vector<2x1xf32>
    %44 = vector.broadcast %43 : vector<2x1xf32> to vector<2x8xf32>
    %45 = arith.subf %41, %44 : vector<2x8xf32>
    %46 = math.exp %45 : vector<2x8xf32>
    %cst_30 = arith.constant dense<0.000000e+00> : vector<2xf32>
    %47 = vector.multi_reduction <add>, %46, %cst_30 [1] : vector<2x8xf32> to vector<2xf32>
    %48 = vector.shape_cast %47 : vector<2xf32> to vector<2x1xf32>
    %49 = tpu.reciprocal %48 {approx = true} : vector<2x1xf32> -> vector<2x1xf32>
    %50 = vector.broadcast %49 : vector<2x1xf32> to vector<2x8xf32>
    %51 = arith.mulf %46, %50 : vector<2x8xf32>
    %52 = vector.shape_cast %51 : vector<2x8xf32> to vector<2x8x1xf32>
    %53 = vector.broadcast %52 : vector<2x8x1xf32> to vector<2x8x32xf32>
    %54 = arith.mulf %53, %30 : vector<2x8x32xf32>
    %cst_31 = arith.constant dense<0.000000e+00> : vector<2x32xf32>
    %55 = vector.multi_reduction <add>, %54, %cst_31 [1] : vector<2x8x32xf32> to vector<2x32xf32>
    %56 = arith.truncf %55 : vector<2x32xf32> to vector<2x32xbf16>
    %c0_32 = arith.constant 0 : index
    %c0_33 = arith.constant 0 : index
    %57 = vector.load %arg12[%c0_32, %c0_33] : memref<32x32xbf16, #tpu.memory_space<vmem>>, vector<32x32xbf16>
    %cst_34 = arith.constant dense<0.000000e+00> : vector<2x32xf32>
    %58 = tpu.matmul %56, %57, %cst_34 {dimension_numbers = #tpu.dot_dimension_numbers<[1], [0], [0], [1], [0, 0, 1, 1], [], []>} : vector<2x32xbf16>, vector<32x32xbf16>, vector<2x32xf32> -> vector<2x32xf32>
    %c0_35 = arith.constant 0 : index
    %c0_36 = arith.constant 0 : index
    %59 = vector.load %arg13[%c0_35, %c0_36] : memref<1x32xf32, #tpu.memory_space<vmem>>, vector<1x32xf32>
    %60 = vector.broadcast %59 : vector<1x32xf32> to vector<2x32xf32>
    %61 = arith.addf %58, %60 : vector<2x32xf32>
    %62 = arith.truncf %61 : vector<2x32xf32> to vector<2x32xbf16>
    %c0_37 = arith.constant 0 : index
    %c0_38 = arith.constant 0 : index
    %63 = vector.load %arg14[%c0_37, %c0_38] : memref<32x16xbf16, #tpu.memory_space<vmem>>, vector<32x16xbf16>
    %cst_39 = arith.constant dense<0.000000e+00> : vector<2x16xf32>
    %64 = tpu.matmul %62, %63, %cst_39 {dimension_numbers = #tpu.dot_dimension_numbers<[1], [0], [0], [1], [0, 0, 1, 1], [], []>} : vector<2x32xbf16>, vector<32x16xbf16>, vector<2x16xf32> -> vector<2x16xf32>
    %c0_40 = arith.constant 0 : index
    %c0_41 = arith.constant 0 : index
    %65 = vector.load %arg15[%c0_40, %c0_41] : memref<1x16xf32, #tpu.memory_space<vmem>>, vector<1x16xf32>
    %66 = vector.broadcast %65 : vector<1x16xf32> to vector<2x16xf32>
    %67 = arith.addf %64, %66 : vector<2x16xf32>
    %68 = arith.addf %14, %67 : vector<2x16xf32>
    %cst_42 = arith.constant 5.000000e-01 : f32
    %69 = vector.broadcast %cst_42 : f32 to vector<2x16xf32>
    %70 = arith.mulf %69, %68 : vector<2x16xf32>
    %c0_43 = arith.constant 0 : index
    %c0_44 = arith.constant 0 : index
    %71 = vector.load %arg4[%c0_43, %c0_44] : memref<2x16xf32, #tpu.memory_space<vmem>>, vector<2x16xf32>
    %cst_45 = arith.constant 0.707106769 : f32
    %72 = vector.broadcast %cst_45 : f32 to vector<2x16xf32>
    %73 = arith.mulf %71, %72 : vector<2x16xf32>
    %74 = arith.addf %70, %73 : vector<2x16xf32>
    %cst_46 = arith.constant 0.000000e+00 : f32
    %75 = vector.broadcast %cst_46 : f32 to vector<2x128xf32>
    %c0_47 = arith.constant 0 : index
    %c0_48 = arith.constant 0 : index
    %76 = vector.load %arg39[%c0_47, %c0_48] : memref<2x128xf32, #tpu.memory_space<vmem>>, vector<2x128xf32>
    tpu.vector_store %arg39[%c0_47, %c0_48], %75 {strides = array<i32>} : memref<2x128xf32, #tpu.memory_space<vmem>>, vector<2x128xf32>,
    %c0_49 = arith.constant 0 : index
    %c0_50 = arith.constant 0 : index
    %77 = vector.load %arg39[%c0_49, %c0_50] : memref<2x128xf32, #tpu.memory_space<vmem>>, vector<2x16xf32>
    tpu.vector_store %arg39[%c0_49, %c0_50], %70 {strides = array<i32>} : memref<2x128xf32, #tpu.memory_space<vmem>>, vector<2x16xf32>,
    %cst_51 = arith.constant -0.693147182 : f32
    %78 = vector.broadcast %cst_51 : f32 to vector<2x16xf32>
    %c0_52 = arith.constant 0 : index
    %c16 = arith.constant 16 : index
    %79 = vector.load %arg39[%c0_52, %c16] : memref<2x128xf32, #tpu.memory_space<vmem>>, vector<2x16xf32>
    tpu.vector_store %arg39[%c0_52, %c16], %78 {strides = array<i32>} : memref<2x128xf32, #tpu.memory_space<vmem>>, vector<2x16xf32>,
    %80 = arith.truncf %74 : vector<2x16xf32> to vector<2x16xbf16>
    %c0_53 = arith.constant 0 : index
    %c0_54 = arith.constant 0 : index
    %81 = vector.load %arg16[%c0_53, %c0_54] : memref<16x256xbf16, #tpu.memory_space<vmem>>, vector<16x256xbf16>
    %cst_55 = arith.constant dense<0.000000e+00> : vector<2x256xf32>
    %82 = tpu.matmul %80, %81, %cst_55 {dimension_numbers = #tpu.dot_dimension_numbers<[1], [0], [0], [1], [0, 0, 1, 1], [], []>} : vector<2x16xbf16>, vector<16x256xbf16>, vector<2x256xf32> -> vector<2x256xf32>
    %c0_56 = arith.constant 0 : index
    %c0_57 = arith.constant 0 : index
    %83 = vector.load %arg17[%c0_56, %c0_57] : memref<1x256xf32, #tpu.memory_space<vmem>>, vector<1x256xf32>
    %84 = vector.broadcast %83 : vector<1x256xf32> to vector<2x256xf32>
    %85 = arith.addf %82, %84 : vector<2x256xf32>
    %cst_58 = arith.constant 0.000000e+00 : f32
    %86 = vector.broadcast %cst_58 : f32 to vector<2x256xf32>
    %87 = arith.maximumf %85, %86 : vector<2x256xf32>
    %88 = arith.truncf %87 : vector<2x256xf32> to vector<2x256xbf16>
    %c0_59 = arith.constant 0 : index
    %c0_60 = arith.constant 0 : index
    %89 = vector.load %arg18[%c0_59, %c0_60] : memref<256x3200xbf16, #tpu.memory_space<vmem>>, vector<256x3200xbf16>
    %cst_61 = arith.constant dense<0.000000e+00> : vector<2x3200xf32>
    %90 = tpu.matmul %88, %89, %cst_61 {dimension_numbers = #tpu.dot_dimension_numbers<[1], [0], [0], [1], [0, 0, 1, 1], [], []>} : vector<2x256xbf16>, vector<256x3200xbf16>, vector<2x3200xf32> -> vector<2x3200xf32>
    %c0_62 = arith.constant 0 : index
    %c0_63 = arith.constant 0 : index
    %91 = vector.load %arg19[%c0_62, %c0_63] : memref<1x3200xf32, #tpu.memory_space<vmem>>, vector<1x3200xf32>
    %92 = vector.broadcast %91 : vector<1x3200xf32> to vector<2x3200xf32>
    %93 = arith.addf %90, %92 : vector<2x3200xf32>
    %cst_64 = arith.constant 0.000000e+00 : f32
    %94 = vector.broadcast %cst_64 : f32 to vector<2x3200xf32>
    %95 = arith.maximumf %93, %94 : vector<2x3200xf32>
    %96 = arith.truncf %95 : vector<2x3200xf32> to vector<2x3200xbf16>
    %c0_65 = arith.constant 0 : index
    %c0_66 = arith.constant 0 : index
    %97 = vector.load %arg20[%c0_65, %c0_66] : memref<128x128xbf16, #tpu.memory_space<vmem>>, vector<128x128xbf16>
    %98 = vector.extract_strided_slice %96 {offsets = [0, 0], sizes = [2, 128], strides = [1, 1]} : vector<2x3200xbf16> to vector<2x128xbf16>
    %cst_67 = arith.constant dense<0.000000e+00> : vector<2x128xf32>
    %99 = tpu.matmul %98, %97, %cst_67 {dimension_numbers = #tpu.dot_dimension_numbers<[1], [0], [0], [1], [0, 0, 1, 1], [], []>} : vector<2x128xbf16>, vector<128x128xbf16>, vector<2x128xf32> -> vector<2x128xf32>
    %c0_68 = arith.constant 0 : index
    %c0_69 = arith.constant 0 : index
    %100 = vector.load %arg41[%c0_68, %c0_69] : memref<50x128xf32, #tpu.memory_space<vmem>>, vector<2x128xf32>
    tpu.vector_store %arg41[%c0_68, %c0_69], %99 {strides = array<i32>} : memref<50x128xf32, #tpu.memory_space<vmem>>, vector<2x128xf32>,
    %101 = vector.extract_strided_slice %96 {offsets = [0, 128], sizes = [2, 128], strides = [1, 1]} : vector<2x3200xbf16> to vector<2x128xbf16>
    %cst_70 = arith.constant dense<0.000000e+00> : vector<2x128xf32>
    %102 = tpu.matmul %101, %97, %cst_70 {dimension_numbers = #tpu.dot_dimension_numbers<[1], [0], [0], [1], [0, 0, 1, 1], [], []>} : vector<2x128xbf16>, vector<128x128xbf16>, vector<2x128xf32> -> vector<2x128xf32>
    %c2 = arith.constant 2 : index
    %c0_71 = arith.constant 0 : index
    %103 = vector.load %arg41[%c2, %c0_71] : memref<50x128xf32, #tpu.memory_space<vmem>>, vector<2x128xf32>
    tpu.vector_store %arg41[%c2, %c0_71], %102 {strides = array<i32>} : memref<50x128xf32, #tpu.memory_space<vmem>>, vector<2x128xf32>,
    %104 = vector.extract_strided_slice %96 {offsets = [0, 256], sizes = [2, 128], strides = [1, 1]} : vector<2x3200xbf16> to vector<2x128xbf16>
    %cst_72 = arith.constant dense<0.000000e+00> : vector<2x128xf32>
    %105 = tpu.matmul %104, %97, %cst_72 {dimension_numbers = #tpu.dot_dimension_numbers<[1], [0], [0], [1], [0, 0, 1, 1], [], []>} : vector<2x128xbf16>, vector<128x128xbf16>, vector<2x128xf32> -> vector<2x128xf32>
    %c4 = arith.constant 4 : index
    %c0_73 = arith.constant 0 : index
    %106 = vector.load %arg41[%c4, %c0_73] : memref<50x128xf32, #tpu.memory_space<vmem>>, vector<2x128xf32>
    tpu.vector_store %arg41[%c4, %c0_73], %105 {strides = array<i32>} : memref<50x128xf32, #tpu.memory_space<vmem>>, vector<2x128xf32>,
    %107 = vector.extract_strided_slice %96 {offsets = [0, 384], sizes = [2, 128], strides = [1, 1]} : vector<2x3200xbf16> to vector<2x128xbf16>
    %cst_74 = arith.constant dense<0.000000e+00> : vector<2x128xf32>
    %108 = tpu.matmul %107, %97, %cst_74 {dimension_numbers = #tpu.dot_dimension_numbers<[1], [0], [0], [1], [0, 0, 1, 1], [], []>} : vector<2x128xbf16>, vector<128x128xbf16>, vector<2x128xf32> -> vector<2x128xf32>
    %c6 = arith.constant 6 : index
    %c0_75 = arith.constant 0 : index
    %109 = vector.load %arg41[%c6, %c0_75] : memref<50x128xf32, #tpu.memory_space<vmem>>, vector<2x128xf32>
    tpu.vector_store %arg41[%c6, %c0_75], %108 {strides = array<i32>} : memref<50x128xf32, #tpu.memory_space<vmem>>, vector<2x128xf32>,
    %110 = vector.extract_strided_slice %96 {offsets = [0, 512], sizes = [2, 128], strides = [1, 1]} : vector<2x3200xbf16> to vector<2x128xbf16>
    %cst_76 = arith.constant dense<0.000000e+00> : vector<2x128xf32>
    %111 = tpu.matmul %110, %97, %cst_76 {dimension_numbers = #tpu.dot_dimension_numbers<[1], [0], [0], [1], [0, 0, 1, 1], [], []>} : vector<2x128xbf16>, vector<128x128xbf16>, vector<2x128xf32> -> vector<2x128xf32>
    %c8 = arith.constant 8 : index
    %c0_77 = arith.constant 0 : index
    %112 = vector.load %arg41[%c8, %c0_77] : memref<50x128xf32, #tpu.memory_space<vmem>>, vector<2x128xf32>
    tpu.vector_store %arg41[%c8, %c0_77], %111 {strides = array<i32>} : memref<50x128xf32, #tpu.memory_space<vmem>>, vector<2x128xf32>,
    %113 = vector.extract_strided_slice %96 {offsets = [0, 640], sizes = [2, 128], strides = [1, 1]} : vector<2x3200xbf16> to vector<2x128xbf16>
    %cst_78 = arith.constant dense<0.000000e+00> : vector<2x128xf32>
    %114 = tpu.matmul %113, %97, %cst_78 {dimension_numbers = #tpu.dot_dimension_numbers<[1], [0], [0], [1], [0, 0, 1, 1], [], []>} : vector<2x128xbf16>, vector<128x128xbf16>, vector<2x128xf32> -> vector<2x128xf32>
    %c10 = arith.constant 10 : index
    %c0_79 = arith.constant 0 : index
    %115 = vector.load %arg41[%c10, %c0_79] : memref<50x128xf32, #tpu.memory_space<vmem>>, vector<2x128xf32>
    tpu.vector_store %arg41[%c10, %c0_79], %114 {strides = array<i32>} : memref<50x128xf32, #tpu.memory_space<vmem>>, vector<2x128xf32>,
    %116 = vector.extract_strided_slice %96 {offsets = [0, 768], sizes = [2, 128], strides = [1, 1]} : vector<2x3200xbf16> to vector<2x128xbf16>
    %cst_80 = arith.constant dense<0.000000e+00> : vector<2x128xf32>
    %117 = tpu.matmul %116, %97, %cst_80 {dimension_numbers = #tpu.dot_dimension_numbers<[1], [0], [0], [1], [0, 0, 1, 1], [], []>} : vector<2x128xbf16>, vector<128x128xbf16>, vector<2x128xf32> -> vector<2x128xf32>
    %c12 = arith.constant 12 : index
    %c0_81 = arith.constant 0 : index
    %118 = vector.load %arg41[%c12, %c0_81] : memref<50x128xf32, #tpu.memory_space<vmem>>, vector<2x128xf32>
    tpu.vector_store %arg41[%c12, %c0_81], %117 {strides = array<i32>} : memref<50x128xf32, #tpu.memory_space<vmem>>, vector<2x128xf32>,
    %119 = vector.extract_strided_slice %96 {offsets = [0, 896], sizes = [2, 128], strides = [1, 1]} : vector<2x3200xbf16> to vector<2x128xbf16>
    %cst_82 = arith.constant dense<0.000000e+00> : vector<2x128xf32>
    %120 = tpu.matmul %119, %97, %cst_82 {dimension_numbers = #tpu.dot_dimension_numbers<[1], [0], [0], [1], [0, 0, 1, 1], [], []>} : vector<2x128xbf16>, vector<128x128xbf16>, vector<2x128xf32> -> vector<2x128xf32>
    %c14 = arith.constant 14 : index
    %c0_83 = arith.constant 0 : index
    %121 = vector.load %arg41[%c14, %c0_83] : memref<50x128xf32, #tpu.memory_space<vmem>>, vector<2x128xf32>
    tpu.vector_store %arg41[%c14, %c0_83], %120 {strides = array<i32>} : memref<50x128xf32, #tpu.memory_space<vmem>>, vector<2x128xf32>,
    %122 = vector.extract_strided_slice %96 {offsets = [0, 1024], sizes = [2, 128], strides = [1, 1]} : vector<2x3200xbf16> to vector<2x128xbf16>
    %cst_84 = arith.constant dense<0.000000e+00> : vector<2x128xf32>
    %123 = tpu.matmul %122, %97, %cst_84 {dimension_numbers = #tpu.dot_dimension_numbers<[1], [0], [0], [1], [0, 0, 1, 1], [], []>} : vector<2x128xbf16>, vector<128x128xbf16>, vector<2x128xf32> -> vector<2x128xf32>
    %c16_85 = arith.constant 16 : index
    %c0_86 = arith.constant 0 : index
    %124 = vector.load %arg41[%c16_85, %c0_86] : memref<50x128xf32, #tpu.memory_space<vmem>>, vector<2x128xf32>
    tpu.vector_store %arg41[%c16_85, %c0_86], %123 {strides = array<i32>} : memref<50x128xf32, #tpu.memory_space<vmem>>, vector<2x128xf32>,
    %125 = vector.extract_strided_slice %96 {offsets = [0, 1152], sizes = [2, 128], strides = [1, 1]} : vector<2x3200xbf16> to vector<2x128xbf16>
    %cst_87 = arith.constant dense<0.000000e+00> : vector<2x128xf32>
    %126 = tpu.matmul %125, %97, %cst_87 {dimension_numbers = #tpu.dot_dimension_numbers<[1], [0], [0], [1], [0, 0, 1, 1], [], []>} : vector<2x128xbf16>, vector<128x128xbf16>, vector<2x128xf32> -> vector<2x128xf32>
    %c18 = arith.constant 18 : index
    %c0_88 = arith.constant 0 : index
    %127 = vector.load %arg41[%c18, %c0_88] : memref<50x128xf32, #tpu.memory_space<vmem>>, vector<2x128xf32>
    tpu.vector_store %arg41[%c18, %c0_88], %126 {strides = array<i32>} : memref<50x128xf32, #tpu.memory_space<vmem>>, vector<2x128xf32>,
    %128 = vector.extract_strided_slice %96 {offsets = [0, 1280], sizes = [2, 128], strides = [1, 1]} : vector<2x3200xbf16> to vector<2x128xbf16>
    %cst_89 = arith.constant dense<0.000000e+00> : vector<2x128xf32>
    %129 = tpu.matmul %128, %97, %cst_89 {dimension_numbers = #tpu.dot_dimension_numbers<[1], [0], [0], [1], [0, 0, 1, 1], [], []>} : vector<2x128xbf16>, vector<128x128xbf16>, vector<2x128xf32> -> vector<2x128xf32>
    %c20 = arith.constant 20 : index
    %c0_90 = arith.constant 0 : index
    %130 = vector.load %arg41[%c20, %c0_90] : memref<50x128xf32, #tpu.memory_space<vmem>>, vector<2x128xf32>
    tpu.vector_store %arg41[%c20, %c0_90], %129 {strides = array<i32>} : memref<50x128xf32, #tpu.memory_space<vmem>>, vector<2x128xf32>,
    %131 = vector.extract_strided_slice %96 {offsets = [0, 1408], sizes = [2, 128], strides = [1, 1]} : vector<2x3200xbf16> to vector<2x128xbf16>
    %cst_91 = arith.constant dense<0.000000e+00> : vector<2x128xf32>
    %132 = tpu.matmul %131, %97, %cst_91 {dimension_numbers = #tpu.dot_dimension_numbers<[1], [0], [0], [1], [0, 0, 1, 1], [], []>} : vector<2x128xbf16>, vector<128x128xbf16>, vector<2x128xf32> -> vector<2x128xf32>
    %c22 = arith.constant 22 : index
    %c0_92 = arith.constant 0 : index
    %133 = vector.load %arg41[%c22, %c0_92] : memref<50x128xf32, #tpu.memory_space<vmem>>, vector<2x128xf32>
    tpu.vector_store %arg41[%c22, %c0_92], %132 {strides = array<i32>} : memref<50x128xf32, #tpu.memory_space<vmem>>, vector<2x128xf32>,
    %134 = vector.extract_strided_slice %96 {offsets = [0, 1536], sizes = [2, 128], strides = [1, 1]} : vector<2x3200xbf16> to vector<2x128xbf16>
    %cst_93 = arith.constant dense<0.000000e+00> : vector<2x128xf32>
    %135 = tpu.matmul %134, %97, %cst_93 {dimension_numbers = #tpu.dot_dimension_numbers<[1], [0], [0], [1], [0, 0, 1, 1], [], []>} : vector<2x128xbf16>, vector<128x128xbf16>, vector<2x128xf32> -> vector<2x128xf32>
    %c24 = arith.constant 24 : index
    %c0_94 = arith.constant 0 : index
    %136 = vector.load %arg41[%c24, %c0_94] : memref<50x128xf32, #tpu.memory_space<vmem>>, vector<2x128xf32>
    tpu.vector_store %arg41[%c24, %c0_94], %135 {strides = array<i32>} : memref<50x128xf32, #tpu.memory_space<vmem>>, vector<2x128xf32>,
    %137 = vector.extract_strided_slice %96 {offsets = [0, 1664], sizes = [2, 128], strides = [1, 1]} : vector<2x3200xbf16> to vector<2x128xbf16>
    %cst_95 = arith.constant dense<0.000000e+00> : vector<2x128xf32>
    %138 = tpu.matmul %137, %97, %cst_95 {dimension_numbers = #tpu.dot_dimension_numbers<[1], [0], [0], [1], [0, 0, 1, 1], [], []>} : vector<2x128xbf16>, vector<128x128xbf16>, vector<2x128xf32> -> vector<2x128xf32>
    %c26 = arith.constant 26 : index
    %c0_96 = arith.constant 0 : index
    %139 = vector.load %arg41[%c26, %c0_96] : memref<50x128xf32, #tpu.memory_space<vmem>>, vector<2x128xf32>
    tpu.vector_store %arg41[%c26, %c0_96], %138 {strides = array<i32>} : memref<50x128xf32, #tpu.memory_space<vmem>>, vector<2x128xf32>,
    %140 = vector.extract_strided_slice %96 {offsets = [0, 1792], sizes = [2, 128], strides = [1, 1]} : vector<2x3200xbf16> to vector<2x128xbf16>
    %cst_97 = arith.constant dense<0.000000e+00> : vector<2x128xf32>
    %141 = tpu.matmul %140, %97, %cst_97 {dimension_numbers = #tpu.dot_dimension_numbers<[1], [0], [0], [1], [0, 0, 1, 1], [], []>} : vector<2x128xbf16>, vector<128x128xbf16>, vector<2x128xf32> -> vector<2x128xf32>
    %c28 = arith.constant 28 : index
    %c0_98 = arith.constant 0 : index
    %142 = vector.load %arg41[%c28, %c0_98] : memref<50x128xf32, #tpu.memory_space<vmem>>, vector<2x128xf32>
    tpu.vector_store %arg41[%c28, %c0_98], %141 {strides = array<i32>} : memref<50x128xf32, #tpu.memory_space<vmem>>, vector<2x128xf32>,
    %143 = vector.extract_strided_slice %96 {offsets = [0, 1920], sizes = [2, 128], strides = [1, 1]} : vector<2x3200xbf16> to vector<2x128xbf16>
    %cst_99 = arith.constant dense<0.000000e+00> : vector<2x128xf32>
    %144 = tpu.matmul %143, %97, %cst_99 {dimension_numbers = #tpu.dot_dimension_numbers<[1], [0], [0], [1], [0, 0, 1, 1], [], []>} : vector<2x128xbf16>, vector<128x128xbf16>, vector<2x128xf32> -> vector<2x128xf32>
    %c30 = arith.constant 30 : index
    %c0_100 = arith.constant 0 : index
    %145 = vector.load %arg41[%c30, %c0_100] : memref<50x128xf32, #tpu.memory_space<vmem>>, vector<2x128xf32>
    tpu.vector_store %arg41[%c30, %c0_100], %144 {strides = array<i32>} : memref<50x128xf32, #tpu.memory_space<vmem>>, vector<2x128xf32>,
    %146 = vector.extract_strided_slice %96 {offsets = [0, 2048], sizes = [2, 128], strides = [1, 1]} : vector<2x3200xbf16> to vector<2x128xbf16>
    %cst_101 = arith.constant dense<0.000000e+00> : vector<2x128xf32>
    %147 = tpu.matmul %146, %97, %cst_101 {dimension_numbers = #tpu.dot_dimension_numbers<[1], [0], [0], [1], [0, 0, 1, 1], [], []>} : vector<2x128xbf16>, vector<128x128xbf16>, vector<2x128xf32> -> vector<2x128xf32>
    %c32 = arith.constant 32 : index
    %c0_102 = arith.constant 0 : index
    %148 = vector.load %arg41[%c32, %c0_102] : memref<50x128xf32, #tpu.memory_space<vmem>>, vector<2x128xf32>
    tpu.vector_store %arg41[%c32, %c0_102], %147 {strides = array<i32>} : memref<50x128xf32, #tpu.memory_space<vmem>>, vector<2x128xf32>,
    %149 = vector.extract_strided_slice %96 {offsets = [0, 2176], sizes = [2, 128], strides = [1, 1]} : vector<2x3200xbf16> to vector<2x128xbf16>
    %cst_103 = arith.constant dense<0.000000e+00> : vector<2x128xf32>
    %150 = tpu.matmul %149, %97, %cst_103 {dimension_numbers = #tpu.dot_dimension_numbers<[1], [0], [0], [1], [0, 0, 1, 1], [], []>} : vector<2x128xbf16>, vector<128x128xbf16>, vector<2x128xf32> -> vector<2x128xf32>
    %c34 = arith.constant 34 : index
    %c0_104 = arith.constant 0 : index
    %151 = vector.load %arg41[%c34, %c0_104] : memref<50x128xf32, #tpu.memory_space<vmem>>, vector<2x128xf32>
    tpu.vector_store %arg41[%c34, %c0_104], %150 {strides = array<i32>} : memref<50x128xf32, #tpu.memory_space<vmem>>, vector<2x128xf32>,
    %152 = vector.extract_strided_slice %96 {offsets = [0, 2304], sizes = [2, 128], strides = [1, 1]} : vector<2x3200xbf16> to vector<2x128xbf16>
    %cst_105 = arith.constant dense<0.000000e+00> : vector<2x128xf32>
    %153 = tpu.matmul %152, %97, %cst_105 {dimension_numbers = #tpu.dot_dimension_numbers<[1], [0], [0], [1], [0, 0, 1, 1], [], []>} : vector<2x128xbf16>, vector<128x128xbf16>, vector<2x128xf32> -> vector<2x128xf32>
    %c36 = arith.constant 36 : index
    %c0_106 = arith.constant 0 : index
    %154 = vector.load %arg41[%c36, %c0_106] : memref<50x128xf32, #tpu.memory_space<vmem>>, vector<2x128xf32>
    tpu.vector_store %arg41[%c36, %c0_106], %153 {strides = array<i32>} : memref<50x128xf32, #tpu.memory_space<vmem>>, vector<2x128xf32>,
    %155 = vector.extract_strided_slice %96 {offsets = [0, 2432], sizes = [2, 128], strides = [1, 1]} : vector<2x3200xbf16> to vector<2x128xbf16>
    %cst_107 = arith.constant dense<0.000000e+00> : vector<2x128xf32>
    %156 = tpu.matmul %155, %97, %cst_107 {dimension_numbers = #tpu.dot_dimension_numbers<[1], [0], [0], [1], [0, 0, 1, 1], [], []>} : vector<2x128xbf16>, vector<128x128xbf16>, vector<2x128xf32> -> vector<2x128xf32>
    %c38 = arith.constant 38 : index
    %c0_108 = arith.constant 0 : index
    %157 = vector.load %arg41[%c38, %c0_108] : memref<50x128xf32, #tpu.memory_space<vmem>>, vector<2x128xf32>
    tpu.vector_store %arg41[%c38, %c0_108], %156 {strides = array<i32>} : memref<50x128xf32, #tpu.memory_space<vmem>>, vector<2x128xf32>,
    %158 = vector.extract_strided_slice %96 {offsets = [0, 2560], sizes = [2, 128], strides = [1, 1]} : vector<2x3200xbf16> to vector<2x128xbf16>
    %cst_109 = arith.constant dense<0.000000e+00> : vector<2x128xf32>
    %159 = tpu.matmul %158, %97, %cst_109 {dimension_numbers = #tpu.dot_dimension_numbers<[1], [0], [0], [1], [0, 0, 1, 1], [], []>} : vector<2x128xbf16>, vector<128x128xbf16>, vector<2x128xf32> -> vector<2x128xf32>
    %c40 = arith.constant 40 : index
    %c0_110 = arith.constant 0 : index
    %160 = vector.load %arg41[%c40, %c0_110] : memref<50x128xf32, #tpu.memory_space<vmem>>, vector<2x128xf32>
    tpu.vector_store %arg41[%c40, %c0_110], %159 {strides = array<i32>} : memref<50x128xf32, #tpu.memory_space<vmem>>, vector<2x128xf32>,
    %161 = vector.extract_strided_slice %96 {offsets = [0, 2688], sizes = [2, 128], strides = [1, 1]} : vector<2x3200xbf16> to vector<2x128xbf16>
    %cst_111 = arith.constant dense<0.000000e+00> : vector<2x128xf32>
    %162 = tpu.matmul %161, %97, %cst_111 {dimension_numbers = #tpu.dot_dimension_numbers<[1], [0], [0], [1], [0, 0, 1, 1], [], []>} : vector<2x128xbf16>, vector<128x128xbf16>, vector<2x128xf32> -> vector<2x128xf32>
    %c42 = arith.constant 42 : index
    %c0_112 = arith.constant 0 : index
    %163 = vector.load %arg41[%c42, %c0_112] : memref<50x128xf32, #tpu.memory_space<vmem>>, vector<2x128xf32>
    tpu.vector_store %arg41[%c42, %c0_112], %162 {strides = array<i32>} : memref<50x128xf32, #tpu.memory_space<vmem>>, vector<2x128xf32>,
    %164 = vector.extract_strided_slice %96 {offsets = [0, 2816], sizes = [2, 128], strides = [1, 1]} : vector<2x3200xbf16> to vector<2x128xbf16>
    %cst_113 = arith.constant dense<0.000000e+00> : vector<2x128xf32>
    %165 = tpu.matmul %164, %97, %cst_113 {dimension_numbers = #tpu.dot_dimension_numbers<[1], [0], [0], [1], [0, 0, 1, 1], [], []>} : vector<2x128xbf16>, vector<128x128xbf16>, vector<2x128xf32> -> vector<2x128xf32>
    %c44 = arith.constant 44 : index
    %c0_114 = arith.constant 0 : index
    %166 = vector.load %arg41[%c44, %c0_114] : memref<50x128xf32, #tpu.memory_space<vmem>>, vector<2x128xf32>
    tpu.vector_store %arg41[%c44, %c0_114], %165 {strides = array<i32>} : memref<50x128xf32, #tpu.memory_space<vmem>>, vector<2x128xf32>,
    %167 = vector.extract_strided_slice %96 {offsets = [0, 2944], sizes = [2, 128], strides = [1, 1]} : vector<2x3200xbf16> to vector<2x128xbf16>
    %cst_115 = arith.constant dense<0.000000e+00> : vector<2x128xf32>
    %168 = tpu.matmul %167, %97, %cst_115 {dimension_numbers = #tpu.dot_dimension_numbers<[1], [0], [0], [1], [0, 0, 1, 1], [], []>} : vector<2x128xbf16>, vector<128x128xbf16>, vector<2x128xf32> -> vector<2x128xf32>
    %c46 = arith.constant 46 : index
    %c0_116 = arith.constant 0 : index
    %169 = vector.load %arg41[%c46, %c0_116] : memref<50x128xf32, #tpu.memory_space<vmem>>, vector<2x128xf32>
    tpu.vector_store %arg41[%c46, %c0_116], %168 {strides = array<i32>} : memref<50x128xf32, #tpu.memory_space<vmem>>, vector<2x128xf32>,
    %170 = vector.extract_strided_slice %96 {offsets = [0, 3072], sizes = [2, 128], strides = [1, 1]} : vector<2x3200xbf16> to vector<2x128xbf16>
    %cst_117 = arith.constant dense<0.000000e+00> : vector<2x128xf32>
    %171 = tpu.matmul %170, %97, %cst_117 {dimension_numbers = #tpu.dot_dimension_numbers<[1], [0], [0], [1], [0, 0, 1, 1], [], []>} : vector<2x128xbf16>, vector<128x128xbf16>, vector<2x128xf32> -> vector<2x128xf32>
    %c48 = arith.constant 48 : index
    %c0_118 = arith.constant 0 : index
    %172 = vector.load %arg41[%c48, %c0_118] : memref<50x128xf32, #tpu.memory_space<vmem>>, vector<2x128xf32>
    tpu.vector_store %arg41[%c48, %c0_118], %171 {strides = array<i32>} : memref<50x128xf32, #tpu.memory_space<vmem>>, vector<2x128xf32>,
    %173 = arith.truncf %74 : vector<2x16xf32> to vector<2x16xbf16>
    %c0_119 = arith.constant 0 : index
    %c0_120 = arith.constant 0 : index
    %174 = vector.load %arg21[%c0_119, %c0_120] : memref<16x32xbf16, #tpu.memory_space<vmem>>, vector<16x32xbf16>
    %cst_121 = arith.constant dense<0.000000e+00> : vector<2x32xf32>
    %175 = tpu.matmul %173, %174, %cst_121 {dimension_numbers = #tpu.dot_dimension_numbers<[1], [0], [0], [1], [0, 0, 1, 1], [], []>} : vector<2x16xbf16>, vector<16x32xbf16>, vector<2x32xf32> -> vector<2x32xf32>
    %c0_122 = arith.constant 0 : index
    %c0_123 = arith.constant 0 : index
    %176 = vector.load %arg22[%c0_122, %c0_123] : memref<1x32xf32, #tpu.memory_space<vmem>>, vector<1x32xf32>
    %177 = vector.broadcast %176 : vector<1x32xf32> to vector<2x32xf32>
    %178 = arith.addf %175, %177 : vector<2x32xf32>
    %c0_124 = arith.constant 0 : index
    %c0_125 = arith.constant 0 : index
    %179 = vector.load %arg23[%c0_124, %c0_125] : memref<1x32xf32, #tpu.memory_space<vmem>>, vector<1x32xf32>
    %180 = vector.broadcast %179 : vector<1x32xf32> to vector<2x32xf32>
    %181 = arith.addf %178, %180 : vector<2x32xf32>
    %c0_126 = arith.constant 0 : index
    %c0_127 = arith.constant 0 : index
    %182 = vector.load %arg24[%c0_126, %c0_127] : memref<1x32xf32, #tpu.memory_space<vmem>>, vector<1x32xf32>
    %c0_128 = arith.constant 0 : index
    %c0_129 = arith.constant 0 : index
    %183 = vector.load %arg25[%c0_128, %c0_129] : memref<1x32xf32, #tpu.memory_space<vmem>>, vector<1x32xf32>
    %cst_130 = arith.constant dense<0.000000e+00> : vector<2xf32>
    %184 = vector.multi_reduction <add>, %181, %cst_130 [1] : vector<2x32xf32> to vector<2xf32>
    %185 = vector.shape_cast %184 : vector<2xf32> to vector<2x1xf32>
    %cst_131 = arith.constant 3.200000e+01 : f32
    %186 = vector.broadcast %cst_131 : f32 to vector<2x1xf32>
    %187 = arith.divf %185, %186 : vector<2x1xf32>
    %188 = vector.broadcast %187 : vector<2x1xf32> to vector<2x32xf32>
    %189 = arith.subf %181, %188 : vector<2x32xf32>
    %190 = arith.mulf %189, %189 : vector<2x32xf32>
    %cst_132 = arith.constant dense<0.000000e+00> : vector<2xf32>
    %191 = vector.multi_reduction <add>, %190, %cst_132 [1] : vector<2x32xf32> to vector<2xf32>
    %192 = vector.shape_cast %191 : vector<2xf32> to vector<2x1xf32>
    %cst_133 = arith.constant 3.200000e+01 : f32
    %193 = vector.broadcast %cst_133 : f32 to vector<2x1xf32>
    %194 = arith.divf %192, %193 : vector<2x1xf32>
    %195 = vector.broadcast %187 : vector<2x1xf32> to vector<2x32xf32>
    %196 = arith.subf %181, %195 : vector<2x32xf32>
    %cst_134 = arith.constant 9.99999974E-6 : f32
    %197 = vector.broadcast %cst_134 : f32 to vector<2x1xf32>
    %198 = arith.addf %194, %197 : vector<2x1xf32>
    %199 = math.rsqrt %198 : vector<2x1xf32>
    %200 = vector.broadcast %199 : vector<2x1xf32> to vector<2x32xf32>
    %201 = arith.mulf %196, %200 : vector<2x32xf32>
    %202 = vector.broadcast %182 : vector<1x32xf32> to vector<2x32xf32>
    %203 = arith.mulf %201, %202 : vector<2x32xf32>
    %204 = vector.broadcast %183 : vector<1x32xf32> to vector<2x32xf32>
    %205 = arith.addf %203, %204 : vector<2x32xf32>
    %206 = arith.truncf %205 : vector<2x32xf32> to vector<2x32xbf16>
    %c0_135 = arith.constant 0 : index
    %c0_136 = arith.constant 0 : index
    %207 = vector.load %arg26[%c0_135, %c0_136] : memref<32x32xbf16, #tpu.memory_space<vmem>>, vector<32x32xbf16>
    %cst_137 = arith.constant dense<0.000000e+00> : vector<2x32xf32>
    %208 = tpu.matmul %206, %207, %cst_137 {dimension_numbers = #tpu.dot_dimension_numbers<[1], [0], [0], [1], [0, 0, 1, 1], [], []>} : vector<2x32xbf16>, vector<32x32xbf16>, vector<2x32xf32> -> vector<2x32xf32>
    %c0_138 = arith.constant 0 : index
    %c0_139 = arith.constant 0 : index
    %209 = vector.load %arg27[%c0_138, %c0_139] : memref<1x32xf32, #tpu.memory_space<vmem>>, vector<1x32xf32>
    %210 = vector.broadcast %209 : vector<1x32xf32> to vector<2x32xf32>
    %211 = arith.addf %208, %210 : vector<2x32xf32>
    %212 = arith.truncf %211 : vector<2x32xf32> to vector<2x32xbf16>
    %c0_140 = arith.constant 0 : index
    %c0_141 = arith.constant 0 : index
    %213 = vector.load %arg28[%c0_140, %c0_141] : memref<32x32xbf16, #tpu.memory_space<vmem>>, vector<32x32xbf16>
    %cst_142 = arith.constant dense<0.000000e+00> : vector<2x32xf32>
    %214 = tpu.matmul %212, %213, %cst_142 {dimension_numbers = #tpu.dot_dimension_numbers<[1], [0], [0], [1], [0, 0, 1, 1], [], []>} : vector<2x32xbf16>, vector<32x32xbf16>, vector<2x32xf32> -> vector<2x32xf32>
    %c0_143 = arith.constant 0 : index
    %c0_144 = arith.constant 0 : index
    %215 = vector.load %arg29[%c0_143, %c0_144] : memref<1x32xf32, #tpu.memory_space<vmem>>, vector<1x32xf32>
    %216 = vector.broadcast %215 : vector<1x32xf32> to vector<2x32xf32>
    %217 = arith.addf %214, %216 : vector<2x32xf32>
    %218 = arith.addf %181, %217 : vector<2x32xf32>
    %c0_145 = arith.constant 0 : index
    %c0_146 = arith.constant 0 : index
    %219 = vector.load %arg30[%c0_145, %c0_146] : memref<1x32xf32, #tpu.memory_space<vmem>>, vector<1x32xf32>
    %c0_147 = arith.constant 0 : index
    %c0_148 = arith.constant 0 : index
    %220 = vector.load %arg31[%c0_147, %c0_148] : memref<1x32xf32, #tpu.memory_space<vmem>>, vector<1x32xf32>
    %cst_149 = arith.constant dense<0.000000e+00> : vector<2xf32>
    %221 = vector.multi_reduction <add>, %218, %cst_149 [1] : vector<2x32xf32> to vector<2xf32>
    %222 = vector.shape_cast %221 : vector<2xf32> to vector<2x1xf32>
    %cst_150 = arith.constant 3.200000e+01 : f32
    %223 = vector.broadcast %cst_150 : f32 to vector<2x1xf32>
    %224 = arith.divf %222, %223 : vector<2x1xf32>
    %225 = vector.broadcast %224 : vector<2x1xf32> to vector<2x32xf32>
    %226 = arith.subf %218, %225 : vector<2x32xf32>
    %227 = arith.mulf %226, %226 : vector<2x32xf32>
    %cst_151 = arith.constant dense<0.000000e+00> : vector<2xf32>
    %228 = vector.multi_reduction <add>, %227, %cst_151 [1] : vector<2x32xf32> to vector<2xf32>
    %229 = vector.shape_cast %228 : vector<2xf32> to vector<2x1xf32>
    %cst_152 = arith.constant 3.200000e+01 : f32
    %230 = vector.broadcast %cst_152 : f32 to vector<2x1xf32>
    %231 = arith.divf %229, %230 : vector<2x1xf32>
    %232 = vector.broadcast %224 : vector<2x1xf32> to vector<2x32xf32>
    %233 = arith.subf %218, %232 : vector<2x32xf32>
    %cst_153 = arith.constant 9.99999974E-6 : f32
    %234 = vector.broadcast %cst_153 : f32 to vector<2x1xf32>
    %235 = arith.addf %231, %234 : vector<2x1xf32>
    %236 = math.rsqrt %235 : vector<2x1xf32>
    %237 = vector.broadcast %236 : vector<2x1xf32> to vector<2x32xf32>
    %238 = arith.mulf %233, %237 : vector<2x32xf32>
    %239 = vector.broadcast %219 : vector<1x32xf32> to vector<2x32xf32>
    %240 = arith.mulf %238, %239 : vector<2x32xf32>
    %241 = vector.broadcast %220 : vector<1x32xf32> to vector<2x32xf32>
    %242 = arith.addf %240, %241 : vector<2x32xf32>
    %243 = arith.truncf %242 : vector<2x32xf32> to vector<2x32xbf16>
    %c0_154 = arith.constant 0 : index
    %c0_155 = arith.constant 0 : index
    %244 = vector.load %arg32[%c0_154, %c0_155] : memref<32x128xbf16, #tpu.memory_space<vmem>>, vector<32x128xbf16>
    %cst_156 = arith.constant dense<0.000000e+00> : vector<2x128xf32>
    %245 = tpu.matmul %243, %244, %cst_156 {dimension_numbers = #tpu.dot_dimension_numbers<[1], [0], [0], [1], [0, 0, 1, 1], [], []>} : vector<2x32xbf16>, vector<32x128xbf16>, vector<2x128xf32> -> vector<2x128xf32>
    %c0_157 = arith.constant 0 : index
    %c0_158 = arith.constant 0 : index
    %246 = vector.load %arg33[%c0_157, %c0_158] : memref<1x128xf32, #tpu.memory_space<vmem>>, vector<1x128xf32>
    %247 = vector.broadcast %246 : vector<1x128xf32> to vector<2x128xf32>
    %248 = arith.addf %245, %247 : vector<2x128xf32>
    %cst_159 = arith.constant 5.000000e-01 : f32
    %249 = vector.broadcast %cst_159 : f32 to vector<2x128xf32>
    %250 = arith.mulf %249, %248 : vector<2x128xf32>
    %251 = arith.mulf %248, %248 : vector<2x128xf32>
    %252 = arith.mulf %248, %251 : vector<2x128xf32>
    %cst_160 = arith.constant 4.471500e-02 : f32
    %253 = vector.broadcast %cst_160 : f32 to vector<2x128xf32>
    %254 = arith.mulf %253, %252 : vector<2x128xf32>
    %255 = arith.addf %248, %254 : vector<2x128xf32>
    %cst_161 = arith.constant 0.797884583 : f32
    %256 = vector.broadcast %cst_161 : f32 to vector<2x128xf32>
    %257 = arith.mulf %256, %255 : vector<2x128xf32>
    %258 = math.tanh %257 : vector<2x128xf32>
    %cst_162 = arith.constant 1.000000e+00 : f32
    %259 = vector.broadcast %cst_162 : f32 to vector<2x128xf32>
    %260 = arith.addf %259, %258 : vector<2x128xf32>
    %261 = arith.mulf %250, %260 : vector<2x128xf32>
    %262 = arith.truncf %261 : vector<2x128xf32> to vector<2x128xbf16>
    %c0_163 = arith.constant 0 : index
    %c0_164 = arith.constant 0 : index
    %263 = vector.load %arg34[%c0_163, %c0_164] : memref<128x32xbf16, #tpu.memory_space<vmem>>, vector<128x32xbf16>
    %cst_165 = arith.constant dense<0.000000e+00> : vector<2x32xf32>
    %264 = tpu.matmul %262, %263, %cst_165 {dimension_numbers = #tpu.dot_dimension_numbers<[1], [0], [0], [1], [0, 0, 1, 1], [], []>} : vector<2x128xbf16>, vector<128x32xbf16>, vector<2x32xf32> -> vector<2x32xf32>
    %265 = arith.addf %218, %264 : vector<2x32xf32>
    %c0_166 = arith.constant 0 : index
    %c0_167 = arith.constant 0 : index
    %266 = vector.load %arg35[%c0_166, %c0_167] : memref<1x32xf32, #tpu.memory_space<vmem>>, vector<1x32xf32>
    %267 = vector.broadcast %266 : vector<1x32xf32> to vector<2x32xf32>
    %268 = arith.addf %265, %267 : vector<2x32xf32>
    %c0_168 = arith.constant 0 : index
    %c0_169 = arith.constant 0 : index
    %269 = vector.load %arg36[%c0_168, %c0_169] : memref<1x32xf32, #tpu.memory_space<vmem>>, vector<1x32xf32>
    %c0_170 = arith.constant 0 : index
    %c0_171 = arith.constant 0 : index
    %270 = vector.load %arg37[%c0_170, %c0_171] : memref<1x32xf32, #tpu.memory_space<vmem>>, vector<1x32xf32>
    %cst_172 = arith.constant dense<0.000000e+00> : vector<2xf32>
    %271 = vector.multi_reduction <add>, %268, %cst_172 [1] : vector<2x32xf32> to vector<2xf32>
    %272 = vector.shape_cast %271 : vector<2xf32> to vector<2x1xf32>
    %cst_173 = arith.constant 3.200000e+01 : f32
    %273 = vector.broadcast %cst_173 : f32 to vector<2x1xf32>
    %274 = arith.divf %272, %273 : vector<2x1xf32>
    %275 = vector.broadcast %274 : vector<2x1xf32> to vector<2x32xf32>
    %276 = arith.subf %268, %275 : vector<2x32xf32>
    %277 = arith.mulf %276, %276 : vector<2x32xf32>
    %cst_174 = arith.constant dense<0.000000e+00> : vector<2xf32>
    %278 = vector.multi_reduction <add>, %277, %cst_174 [1] : vector<2x32xf32> to vector<2xf32>
    %279 = vector.shape_cast %278 : vector<2xf32> to vector<2x1xf32>
    %cst_175 = arith.constant 3.200000e+01 : f32
    %280 = vector.broadcast %cst_175 : f32 to vector<2x1xf32>
    %281 = arith.divf %279, %280 : vector<2x1xf32>
    %282 = vector.broadcast %274 : vector<2x1xf32> to vector<2x32xf32>
    %283 = arith.subf %268, %282 : vector<2x32xf32>
    %cst_176 = arith.constant 9.99999974E-6 : f32
    %284 = vector.broadcast %cst_176 : f32 to vector<2x1xf32>
    %285 = arith.addf %281, %284 : vector<2x1xf32>
    %286 = math.rsqrt %285 : vector<2x1xf32>
    %287 = vector.broadcast %286 : vector<2x1xf32> to vector<2x32xf32>
    %288 = arith.mulf %283, %287 : vector<2x32xf32>
    %289 = vector.broadcast %269 : vector<1x32xf32> to vector<2x32xf32>
    %290 = arith.mulf %288, %289 : vector<2x32xf32>
    %291 = vector.broadcast %270 : vector<1x32xf32> to vector<2x32xf32>
    %292 = arith.addf %290, %291 : vector<2x32xf32>
    %293 = arith.truncf %292 : vector<2x32xf32> to vector<2x32xbf16>
    %c0_177 = arith.constant 0 : index
    %c0_178 = arith.constant 0 : index
    %294 = vector.load %arg38[%c0_177, %c0_178] : memref<32x128xbf16, #tpu.memory_space<vmem>>, vector<32x128xbf16>
    %cst_179 = arith.constant dense<0.000000e+00> : vector<2x128xf32>
    %295 = tpu.matmul %293, %294, %cst_179 {dimension_numbers = #tpu.dot_dimension_numbers<[1], [0], [0], [1], [0, 0, 1, 1], [], []>} : vector<2x32xbf16>, vector<32x128xbf16>, vector<2x128xf32> -> vector<2x128xf32>
    %c0_180 = arith.constant 0 : index
    %c0_181 = arith.constant 0 : index
    %296 = vector.load %arg40[%c0_180, %c0_181] : memref<2x128xf32, #tpu.memory_space<vmem>>, vector<2x128xf32>
    tpu.vector_store %arg40[%c0_180, %c0_181], %295 {strides = array<i32>} : memref<2x128xf32, #tpu.memory_space<vmem>>, vector<2x128xf32>,
    return
  }
  func.func @transform_0(%arg0: i32) -> (i32, i32) {
    %c0_i32 = arith.constant 0 : i32
    %c0_i32_0 = arith.constant 0 : i32
    %c0_i32_1 = arith.constant 0 : i32
    return %c0_i32, %c0_i32_0 : i32, i32
  }
  func.func @transform_1(%arg0: i32) -> (i32, i32, i32) {
    %c0_i32 = arith.constant 0 : i32
    %c0_i32_0 = arith.constant 0 : i32
    %c0_i32_1 = arith.constant 0 : i32
    %c0_i32_2 = arith.constant 0 : i32
    return %c0_i32, %c0_i32_0, %c0_i32_1 : i32, i32, i32
  }
  func.func @transform_2(%arg0: i32) -> (i32, i32) {
    %c0_i32 = arith.constant 0 : i32
    %c0_i32_0 = arith.constant 0 : i32
    %c0_i32_1 = arith.constant 0 : i32
    return %c0_i32, %c0_i32_0 : i32, i32
  }
  func.func @transform_3(%arg0: i32) -> (i32, i32) {
    %c0_i32 = arith.constant 0 : i32
    %c0_i32_0 = arith.constant 0 : i32
    %c0_i32_1 = arith.constant 0 : i32
    return %c0_i32, %c0_i32_0 : i32, i32
  }
  func.func @transform_4(%arg0: i32) -> (i32, i32) {
    %c0_i32 = arith.constant 0 : i32
    %c0_i32_0 = arith.constant 0 : i32
    %c0_i32_1 = arith.constant 0 : i32
    return %c0_i32, %c0_i32_0 : i32, i32
  }
  func.func @transform_5(%arg0: i32) -> (i32, i32) {
    %c0_i32 = arith.constant 0 : i32
    %c0_i32_0 = arith.constant 0 : i32
    %c0_i32_1 = arith.constant 0 : i32
    return %c0_i32, %c0_i32_0 : i32, i32
  }
  func.func @transform_6(%arg0: i32) -> (i32, i32) {
    %c0_i32 = arith.constant 0 : i32
    %c0_i32_0 = arith.constant 0 : i32
    %c0_i32_1 = arith.constant 0 : i32
    return %c0_i32, %c0_i32_0 : i32, i32
  }
  func.func @transform_7(%arg0: i32) -> (i32, i32) {
    %c0_i32 = arith.constant 0 : i32
    %c0_i32_0 = arith.constant 0 : i32
    %c0_i32_1 = arith.constant 0 : i32
    return %c0_i32, %c0_i32_0 : i32, i32
  }
  func.func @transform_8(%arg0: i32) -> (i32, i32) {
    %c0_i32 = arith.constant 0 : i32
    %c0_i32_0 = arith.constant 0 : i32
    %c0_i32_1 = arith.constant 0 : i32
    return %c0_i32, %c0_i32_0 : i32, i32
  }
  func.func @transform_9(%arg0: i32) -> (i32, i32) {
    %c0_i32 = arith.constant 0 : i32
    %c0_i32_0 = arith.constant 0 : i32
    %c0_i32_1 = arith.constant 0 : i32
    return %c0_i32, %c0_i32_0 : i32, i32
  }
  func.func @transform_10(%arg0: i32) -> (i32, i32) {
    %c0_i32 = arith.constant 0 : i32
    %c0_i32_0 = arith.constant 0 : i32
    %c0_i32_1 = arith.constant 0 : i32
    return %c0_i32, %c0_i32_0 : i32, i32
  }
  func.func @transform_11(%arg0: i32) -> (i32, i32) {
    %c0_i32 = arith.constant 0 : i32
    %c0_i32_0 = arith.constant 0 : i32
    %c0_i32_1 = arith.constant 0 : i32
    return %c0_i32, %c0_i32_0 : i32, i32
  }
  func.func @transform_12(%arg0: i32) -> (i32, i32) {
    %c0_i32 = arith.constant 0 : i32
    %c0_i32_0 = arith.constant 0 : i32
    %c0_i32_1 = arith.constant 0 : i32
    return %c0_i32, %c0_i32_0 : i32, i32
  }
  func.func @transform_13(%arg0: i32) -> (i32, i32) {
    %c0_i32 = arith.constant 0 : i32
    %c0_i32_0 = arith.constant 0 : i32
    %c0_i32_1 = arith.constant 0 : i32
    return %c0_i32, %c0_i32_0 : i32, i32
  }
  func.func @transform_14(%arg0: i32) -> (i32, i32) {
    %c0_i32 = arith.constant 0 : i32
    %c0_i32_0 = arith.constant 0 : i32
    %c0_i32_1 = arith.constant 0 : i32
    return %c0_i32, %c0_i32_0 : i32, i32
  }
  func.func @transform_15(%arg0: i32) -> (i32, i32) {
    %c0_i32 = arith.constant 0 : i32
    %c0_i32_0 = arith.constant 0 : i32
    %c0_i32_1 = arith.constant 0 : i32
    return %c0_i32, %c0_i32_0 : i32, i32
  }
  func.func @transform_16(%arg0: i32) -> (i32, i32) {
    %c0_i32 = arith.constant 0 : i32
    %c0_i32_0 = arith.constant 0 : i32
    %c0_i32_1 = arith.constant 0 : i32
    return %c0_i32, %c0_i32_0 : i32, i32
  }
  func.func @transform_17(%arg0: i32) -> (i32, i32) {
    %c0_i32 = arith.constant 0 : i32
    %c0_i32_0 = arith.constant 0 : i32
    %c0_i32_1 = arith.constant 0 : i32
    return %c0_i32, %c0_i32_0 : i32, i32
  }
  func.func @transform_18(%arg0: i32) -> (i32, i32) {
    %c0_i32 = arith.constant 0 : i32
    %c0_i32_0 = arith.constant 0 : i32
    %c0_i32_1 = arith.constant 0 : i32
    return %c0_i32, %c0_i32_0 : i32, i32
  }
  func.func @transform_19(%arg0: i32) -> (i32, i32) {
    %c0_i32 = arith.constant 0 : i32
    %c0_i32_0 = arith.constant 0 : i32
    %c0_i32_1 = arith.constant 0 : i32
    return %c0_i32, %c0_i32_0 : i32, i32
  }
  func.func @transform_20(%arg0: i32) -> (i32, i32) {
    %c0_i32 = arith.constant 0 : i32
    %c0_i32_0 = arith.constant 0 : i32
    %c0_i32_1 = arith.constant 0 : i32
    return %c0_i32, %c0_i32_0 : i32, i32
  }
  func.func @transform_21(%arg0: i32) -> (i32, i32) {
    %c0_i32 = arith.constant 0 : i32
    %c0_i32_0 = arith.constant 0 : i32
    %c0_i32_1 = arith.constant 0 : i32
    return %c0_i32, %c0_i32_0 : i32, i32
  }
  func.func @transform_22(%arg0: i32) -> (i32, i32) {
    %c0_i32 = arith.constant 0 : i32
    %c0_i32_0 = arith.constant 0 : i32
    %c0_i32_1 = arith.constant 0 : i32
    return %c0_i32, %c0_i32_0 : i32, i32
  }
  func.func @transform_23(%arg0: i32) -> (i32, i32) {
    %c0_i32 = arith.constant 0 : i32
    %c0_i32_0 = arith.constant 0 : i32
    %c0_i32_1 = arith.constant 0 : i32
    return %c0_i32, %c0_i32_0 : i32, i32
  }
  func.func @transform_24(%arg0: i32) -> (i32, i32) {
    %c0_i32 = arith.constant 0 : i32
    %c0_i32_0 = arith.constant 0 : i32
    %c0_i32_1 = arith.constant 0 : i32
    return %c0_i32, %c0_i32_0 : i32, i32
  }
  func.func @transform_25(%arg0: i32) -> (i32, i32) {
    %c0_i32 = arith.constant 0 : i32
    %c0_i32_0 = arith.constant 0 : i32
    %c0_i32_1 = arith.constant 0 : i32
    return %c0_i32, %c0_i32_0 : i32, i32
  }
  func.func @transform_26(%arg0: i32) -> (i32, i32) {
    %c0_i32 = arith.constant 0 : i32
    %c0_i32_0 = arith.constant 0 : i32
    %c0_i32_1 = arith.constant 0 : i32
    return %c0_i32, %c0_i32_0 : i32, i32
  }
  func.func @transform_27(%arg0: i32) -> (i32, i32) {
    %c0_i32 = arith.constant 0 : i32
    %c0_i32_0 = arith.constant 0 : i32
    %c0_i32_1 = arith.constant 0 : i32
    return %c0_i32, %c0_i32_0 : i32, i32
  }
  func.func @transform_28(%arg0: i32) -> (i32, i32) {
    %c0_i32 = arith.constant 0 : i32
    %c0_i32_0 = arith.constant 0 : i32
    %c0_i32_1 = arith.constant 0 : i32
    return %c0_i32, %c0_i32_0 : i32, i32
  }
  func.func @transform_29(%arg0: i32) -> (i32, i32) {
    %c0_i32 = arith.constant 0 : i32
    %c0_i32_0 = arith.constant 0 : i32
    %c0_i32_1 = arith.constant 0 : i32
    return %c0_i32, %c0_i32_0 : i32, i32
  }
  func.func @transform_30(%arg0: i32) -> (i32, i32) {
    %c0_i32 = arith.constant 0 : i32
    %c0_i32_0 = arith.constant 0 : i32
    %c0_i32_1 = arith.constant 0 : i32
    return %c0_i32, %c0_i32_0 : i32, i32
  }
  func.func @transform_31(%arg0: i32) -> (i32, i32) {
    %c0_i32 = arith.constant 0 : i32
    %c0_i32_0 = arith.constant 0 : i32
    %c0_i32_1 = arith.constant 0 : i32
    return %c0_i32, %c0_i32_0 : i32, i32
  }
  func.func @transform_32(%arg0: i32) -> (i32, i32) {
    %c0_i32 = arith.constant 0 : i32
    %c0_i32_0 = arith.constant 0 : i32
    %c0_i32_1 = arith.constant 0 : i32
    return %c0_i32, %c0_i32_0 : i32, i32
  }
  func.func @transform_33(%arg0: i32) -> (i32, i32) {
    %c0_i32 = arith.constant 0 : i32
    %c0_i32_0 = arith.constant 0 : i32
    %c0_i32_1 = arith.constant 0 : i32
    return %c0_i32, %c0_i32_0 : i32, i32
  }
  func.func @transform_34(%arg0: i32) -> (i32, i32) {
    %c0_i32 = arith.constant 0 : i32
    %c0_i32_0 = arith.constant 0 : i32
    %c0_i32_1 = arith.constant 0 : i32
    return %c0_i32, %c0_i32_0 : i32, i32
  }
  func.func @transform_35(%arg0: i32) -> (i32, i32) {
    %c0_i32 = arith.constant 0 : i32
    %c0_i32_0 = arith.constant 0 : i32
    %c0_i32_1 = arith.constant 0 : i32
    return %c0_i32, %c0_i32_0 : i32, i32
  }
  func.func @transform_36(%arg0: i32) -> (i32, i32) {
    %c0_i32 = arith.constant 0 : i32
    %c0_i32_0 = arith.constant 0 : i32
    %c0_i32_1 = arith.constant 0 : i32
    return %c0_i32, %c0_i32_0 : i32, i32
  }
  func.func @transform_37(%arg0: i32) -> (i32, i32) {
    %c0_i32 = arith.constant 0 : i32
    %c0_i32_0 = arith.constant 0 : i32
    %c0_i32_1 = arith.constant 0 : i32
    return %c0_i32, %c0_i32_0 : i32, i32
  }
  func.func @transform_38(%arg0: i32) -> (i32, i32) {
    %c0_i32 = arith.constant 0 : i32
    %c0_i32_0 = arith.constant 0 : i32
    %c0_i32_1 = arith.constant 0 : i32
    return %c0_i32, %c0_i32_0 : i32, i32
  }
  func.func @transform_39(%arg0: i32) -> (i32, i32) {
    %c0_i32 = arith.constant 0 : i32
    %c0_i32_0 = arith.constant 0 : i32
    %c0_i32_1 = arith.constant 0 : i32
    return %c0_i32, %c0_i32_0 : i32, i32
  }
  func.func @transform_40(%arg0: i32) -> (i32, i32) {
    %c0_i32 = arith.constant 0 : i32
    %c0_i32_0 = arith.constant 0 : i32
    %c0_i32_1 = arith.constant 0 : i32
    return %c0_i32, %c0_i32_0 : i32, i32
  }
}

</mosaic_0001>

<bundles_post_ra>
// kernel: multimodal_vae_forward.1
= control target key start
LH: loop header
LB: loop body
LE: loop exit
PB: predicated region body
PF: predicated region fallthrough
CT: control target
= control target key end

     0   :  { %s9569_s6 = smov 1   ;;  %s9570_s10 = smov 2   ;;  %s10906_s0 = inlined_call_operand.smem [shape: u32[41], index: -1, kind: input, shape index: {}] }
   0x1   :  { %s9661_s5 = sld [smem:[%s10906_s0]]   ;;  %s9571_s14 = smov 3  }
   0x2   :  { %s9666_s9 = sld [smem:[%s10906_s0 + %s9569_s6]]   ;;  %s9572_s18 = smov 4  }
   0x3   :  { %s9671_s13 = sld [smem:[%s10906_s0 + %s9570_s10]]   ;;  %s9573_s22 = smov 5  }
   0x4   :  { %s9676_s17 = sld [smem:[%s10906_s0 + %s9571_s14]]   ;;  %s9574_s26 = smov 6  }
   0x5   :  { %s9681_s21 = sld [smem:[%s10906_s0 + %s9572_s18]]   ;;  %s9575_s30 = smov 7  }
   0x6   :  { %s9686_s25 = sld [smem:[%s10906_s0 + %s9573_s22]]   ;;  %s9576_s4 = smov 8  }
   0x7   :  { %10929 = sst [smem:[#allocation68_spill]] %s9661_s5  ;;  %s9577_s10 = smov 9  }
   0x8   :  { %10930 = sst [smem:[#allocation69_spill]] %s9666_s9  ;;  %s9578_s15 = smov 10  }
   0x9   :  { %10931 = sst [smem:[#allocation70_spill]] %s9671_s13  ;;  %s9579_s20 = smov 11  }
   0xa   :  { %10932 = sst [smem:[#allocation71_spill]] %s9676_s17  ;;  %s9581_s1 = smov 13  }
   0xb   :  { %10933 = sst [smem:[#allocation72_spill]] %s9681_s21  ;;  %s9582_s7 = smov 14  }
   0xc   :  { %s9691_s29 = sld [smem:[%s10906_s0 + %s9574_s26]]   ;;  %s9580_s26 = smov 12  }
   0xd   :  { %s9696_s3 = sld [smem:[%s10906_s0 + %s9575_s30]]   ;;  %s9584_s22 = smov 16  }
   0xe   :  { %s9701_s8 = sld [smem:[%s10906_s0 + %s9576_s4]]   ;;  %s9585_s28 = smov 17  }
   0xf   :  { %s9706_s14 = sld [smem:[%s10906_s0 + %s9577_s10]]  }
  0x10   :  { %s9711_s19 = sld [smem:[%s10906_s0 + %s9578_s15]]   ;;  %s9583_s15 = smov 15  }
  0x11   :  { %s9716_s24 = sld [smem:[%s10906_s0 + %s9579_s20]]  }
  0x12   :  { %10934 = sst [smem:[#allocation73_spill]] %s9691_s29 }
  0x13   :  { %10935 = sst [smem:[#allocation74_spill]] %s9696_s3 }
  0x14   :  { %s9721_s30 = sld [smem:[%s10906_s0 + %s9580_s26]]  }
  0x15   :  { %10936 = sst [smem:[#allocation75_spill]] %s9706_s14 }
  0x16   :  { %s9726_s6 = sld [smem:[%s10906_s0 + %s9581_s1]]  }
  0x17   :  { %10937 = sst [smem:[#allocation76_spill]] %s9716_s24 }
  0x18   :  { %s9731_s12 = sld [smem:[%s10906_s0 + %s9582_s7]]   ;;  %s9586_s7 = smov 18  }
  0x19   :  { %s9736_s20 = sld [smem:[%s10906_s0 + %s9583_s15]]   ;;  %s9587_s15 = smov 19  }
  0x1a   :  { %s9741_s27 = sld [smem:[%s10906_s0 + %s9584_s22]]   ;;  %s9588_s22 = smov 20  }
  0x1b   :  { %s9746_s4 = sld [smem:[%s10906_s0 + %s9585_s28]]   ;;  %s9589_s28 = smov 21  }
  0x1c   :  { %10938 = sst [smem:[#allocation77_spill]] %s9726_s6 }
  0x1d   :  { %s9751_s6 = sld [smem:[%s10906_s0 + %s9586_s7]]   ;;  %s9590_s7 = smov 22  }
  0x1e   :  { %10939 = sst [smem:[#allocation78_spill]] %s9731_s12 }
  0x1f   :  { %s9756_s13 = sld [smem:[%s10906_s0 + %s9587_s15]]   ;;  %s9591_s15 = smov 23  }
  0x20   :  { %10940 = sst [smem:[#allocation79_spill]] %s9741_s27 }
  0x21   :  { %s9761_s9 = sld [smem:[%s10906_s0 + %s9588_s22]]   ;;  %s9592_s22 = smov 24  }
  0x22   :  { %s9766_s29 = sld [smem:[%s10906_s0 + %s9589_s28]]   ;;  %s9593_s28 = smov 25  }
  0x23   :  { %10941 = sst [smem:[#allocation80_spill]] %s9751_s6 }
  0x24   :  { %s9771_s5 = sld [smem:[%s10906_s0 + %s9590_s7]]   ;;  %s9594_s7 = smov 26  }
  0x25   :  { %s9776_s21 = sld [smem:[%s10906_s0 + %s9591_s15]]   ;;  %s9595_s15 = smov 27  }
  0x26   :  { %s9786_s6 = sld [smem:[%s10906_s0 + %s9593_s28]]   ;;  %s9597_s28 = smov 29  }
  0x27   :  { %10942 = sst [smem:[#allocation81_spill]] %s9761_s9 }
  0x28   :  { %s9781_s9 = sld [smem:[%s10906_s0 + %s9592_s22]]   ;;  %s9596_s22 = smov 28  }
  0x29   :  { %s9796_s27 = sld [smem:[%s10906_s0 + %s9595_s15]]   ;;  %s9599_s15 = smov 31  }
  0x2a   :  { %10943 = sst [smem:[#allocation82_spill]] %s9771_s5 }
  0x2b   :  { %s9791_s5 = sld [smem:[%s10906_s0 + %s9594_s7]]   ;;  %s9598_s7 = smov 30  }
  0x2c   :  { %s9806_s12 = sld [smem:[%s10906_s0 + %s9597_s28]]   ;;  %s9601_s28 = smov 33  }
  0x2d   :  { %s9816_s24 = sld [smem:[%s10906_s0 + %s9599_s15]]   ;;  %s9603_s15 = smov 35  }
  0x2e   :  { %10944 = sst [smem:[#allocation83_spill]] %s9781_s9 }
  0x2f   :  { %s9801_s9 = sld [smem:[%s10906_s0 + %s9596_s22]]   ;;  %s9600_s22 = smov 32  }
  0x30   :  { %s9826_s14 = sld [smem:[%s10906_s0 + %s9601_s28]]   ;;  %s9605_s28 = smov 37  }
  0x31   :  { %10945 = sst [smem:[#allocation84_spill]] %s9791_s5 }
  0x32   :  { %s9811_s5 = sld [smem:[%s10906_s0 + %s9598_s7]]   ;;  %s9602_s7 = smov 34  }
  0x33   :  { %s9836_s3 = sld [smem:[%s10906_s0 + %s9603_s15]]   ;;  %s9607_s15 = smov 39  }
  0x35   :  { %10946 = sst [smem:[#allocation85_spill]] %s9801_s9 }
  0x36   :  { %s9821_s9 = sld [smem:[%s10906_s0 + %s9600_s22]]   ;;  %s9604_s22 = smov 36  }
  0x37   :  { %10949 = sst [smem:[#allocation88_spill]] %s9826_s14 }
  0x38   :  { %10947 = sst [smem:[#allocation86_spill]] %s9811_s5 }
  0x39   :  { %s9831_s5 = sld [smem:[%s10906_s0 + %s9602_s7]]   ;;  %s9606_s7 = smov 38  }
  0x3a   :  { %10950 = sst [smem:[#allocation89_spill]] %s9836_s3 }
  0x3b   :  { %s9846_s14 = sld [smem:[%s10906_s0 + %s9605_s28]]  }
  0x3c   :  { %10948 = sst [smem:[#allocation87_spill]] %s9821_s9 }
  0x3d   :  { %s9841_s9 = sld [smem:[%s10906_s0 + %s9604_s22]]   ;;  %s9608_s22 = smov 40  }
  0x3e   :  { %s9851_s17 = sld [smem:[%s10906_s0 + %s9606_s7]]  }
  0x3f   :  { %s9856_s3 = sld [smem:[%s10906_s0 + %s9607_s15]]  }
  0x43   :  { %10951 = sst [smem:[#allocation90_spill]] %s9841_s9 }
  0x44   :  { %s9861_s9 = sld [smem:[%s10906_s0 + %s9608_s22]]  }
  0x45   :  { %87 = vsyncpa [#allocation3], 0 }
  0x46   :  { %88 = vsyncpa [#allocation6], 0 }
  0x47   :  { %89 = vsyncpa [#allocation9], 0 }
  0x48   :  { %90 = vsyncpa [#allocation12], 0 }
  0x49   :  { %91 = vsyncpa [#allocation15], 0 }
  0x4a   :  { %92 = vsyncpa [#allocation18], 0 }
  0x4b   :  { %93 = vsyncpa [#allocation21], 0 }
  0x4c   :  { %94 = vsyncpa [#allocation24], 0 }
  0x4d   :  { %95 = vsyncpa [#allocation27], 0 }
  0x4e   :  { %96 = vsyncpa [#allocation30], 0 }
  0x4f   :  { %97 = vsyncpa [#allocation33], 0 }
  0x50   :  { %98 = vsyncpa [#allocation36], 0 }
  0x51   :  { %99 = vsyncpa [#allocation39], 0 }
  0x52   :  { %100 = vsyncpa [#allocation42], 0 }
  0x53   :  { %101 = vsyncpa [#allocation45], 0 }
  0x54   :  { %102 = vsyncpa [#allocation48], 0 }
  0x55   :  { %103 = vsyncpa [#allocation4], 0  ;;  %s9609_s0 = smov [#allocation5]   ;;  %s9610_s1 = smov [#allocation8]  }
  0x56   :  { %s128_s28 = sshll.u32 %s9609_s0, 4  ;;  %s149_s2 = sshll.u32 %s9610_s1, 4  ;;  %s129_s28 = int_to_ptr.vmem [resolvable:$true] %s128_s28  ;;  %s9863_s2 = int_to_ptr.vmem [resolvable:$true] %s149_s2 }
  0x57   :  { %s8831_s7 = scalar_lea.hbm %s9686_s25, 16 }
  0x58   :  { %p8832_p0 = scmp.ne.s32.totalorder %s9686_s25, %s8831_s7  ;;  %p8835_p1 = scmp.lt.u32.totalorder %s8831_s7, %s9686_s25 }
  0x5a   :  { %p8837_p2 = pnand %p8835_p1, %p8832_p0 }
  0x5c   :  { %8840 = shalt.err (!%p8837_p2)
}
  0x5d   :  { %s8841_s10 = scalar_lea.vmem %s129_s28, 16  ;;  %s8845_s11 = scalar_lea.vmem %s129_s28, 32 }
  0x5e   :  { %p8842_p3 = scmp.ne.s32.totalorder %s129_s28, %s8841_s10  ;;  %p8846_p4 = scmp.lt.s32.totalorder %s129_s28, %s129_s28 }
  0x5f   :  { %p8847_p5 = scmp.lt.s32.totalorder %s8845_s11, %s8841_s10 }
  0x61   :  { %p8848_p6 = por %p8847_p5, %p8846_p4 }
  0x63   :  { %p8849_p7 = pnand %p8848_p6, %p8842_p3 }
  0x65   :  { %8852 = shalt.err (!%p8849_p7)
}
  0x66   :  { %131 = dma.hbm_to_vmem [thread:$0]  %s9686_s25, 16, %s129_s28, [#allocation6]  }
  0x67   :  { %s8853_s15 = scalar_lea.hbm %s9701_s8, 256 }
  0x68   :  { %p8854_p8 = scmp.ne.s32.totalorder %s9701_s8, %s8853_s15  ;;  %p8857_p9 = scmp.lt.u32.totalorder %s8853_s15, %s9701_s8 }
  0x6a   :  { %p8859_p10 = pnand %p8857_p9, %p8854_p8 }
  0x6c   :  { %8862 = shalt.err (!%p8859_p10)
}
  0x6d   :  { %s8863_s16 = scalar_lea.vmem %s9863_s2, 256  ;;  %p8868_p12 = scmp.lt.s32.totalorder %s9863_s2, %s9863_s2 }
  0x6e   :  { %p8864_p11 = scmp.ne.s32.totalorder %s9863_s2, %s8863_s16  ;;  %p8869_p13 = scmp.lt.s32.totalorder %s8863_s16, %s8863_s16 }
  0x70   :  { %p8870_p0 = por %p8869_p13, %p8868_p12 }
  0x72   :  { %p8871_p1 = pnand %p8870_p0, %p8864_p11 }
  0x74   :  { %8874 = shalt.err (!%p8871_p1)
}
  0x75   :  { %s9611_s18 = smov 64   ;;  %s9612_s25 = smov 4  }
  0x76   :  { %155 = dma.hbm_to_vmem [thread:$0]  %s9701_s8, 256, %s9863_s2, [#allocation9], %s9611_s18, %s9611_s18, %s9612_s25  }
  0x77   :  { %s9613_s22 = smov [#allocation11]   ;;  %s9614_s26 = smov [#allocation14]  }
  0x78   :  { %s173_s23 = sshll.u32 %s9613_s22, 4  ;;  %s198_s0 = sshll.u32 %s9614_s26, 4  ;;  %s174_s23 = int_to_ptr.vmem [resolvable:$true] %s173_s23  ;;  %s199_s0 = int_to_ptr.vmem [resolvable:$true] %s198_s0 }
  0x79   :  { %s8875_s28 = scalar_lea.hbm %s9711_s19, 256 }
  0x7a   :  { %p8876_p2 = scmp.ne.s32.totalorder %s9711_s19, %s8875_s28  ;;  %p8879_p3 = scmp.lt.u32.totalorder %s8875_s28, %s9711_s19 }
  0x7c   :  { %p8881_p4 = pnand %p8879_p3, %p8876_p2 }
  0x7e   :  { %8884 = shalt.err (!%p8881_p4)
}
  0x7f   :  { %s8885_s1 = scalar_lea.vmem %s174_s23, 256  ;;  %p8890_p6 = scmp.lt.s32.totalorder %s174_s23, %s174_s23 }
  0x80   :  { %p8886_p5 = scmp.ne.s32.totalorder %s174_s23, %s8885_s1  ;;  %p8891_p7 = scmp.lt.s32.totalorder %s8885_s1, %s8885_s1 }
  0x82   :  { %p8892_p8 = por %p8891_p7, %p8890_p6 }
  0x84   :  { %p8893_p9 = pnand %p8892_p8, %p8886_p5 }
  0x86   :  { %8896 = shalt.err (!%p8893_p9)
}
  0x87   :  { %179 = dma.hbm_to_vmem [thread:$0]  %s9711_s19, 256, %s174_s23, [#allocation12], %s9611_s18, %s9611_s18, %s9612_s25  }
  0x88   :  { %s8897_s8 = scalar_lea.hbm %s9721_s30, 16 }
  0x89   :  { %p8898_p10 = scmp.ne.s32.totalorder %s9721_s30, %s8897_s8  ;;  %p8901_p11 = scmp.lt.u32.totalorder %s8897_s8, %s9721_s30 }
  0x8b   :  { %p8903_p12 = pnand %p8901_p11, %p8898_p10 }
  0x8d   :  { %8906 = shalt.err (!%p8903_p12)
}
  0x8e   :  { %s8907_s2 = scalar_lea.vmem %s199_s0, 16  ;;  %s8911_s7 = scalar_lea.vmem %s199_s0, 32 }
  0x8f   :  { %p8908_p13 = scmp.ne.s32.totalorder %s199_s0, %s8907_s2  ;;  %p8912_p0 = scmp.lt.s32.totalorder %s199_s0, %s199_s0 }
  0x90   :  { %p8913_p1 = scmp.lt.s32.totalorder %s8911_s7, %s8907_s2 }
  0x92   :  { %p8914_p2 = por %p8913_p1, %p8912_p0 }
  0x94   :  { %p8915_p3 = pnand %p8914_p2, %p8908_p13 }
  0x96   :  { %8918 = shalt.err (!%p8915_p3)
}
  0x97   :  { %201 = dma.hbm_to_vmem [thread:$0]  %s9721_s30, 16, %s199_s0, [#allocation15]  }
  0x98   :  { %s9615_s10 = smov [#allocation17]   ;;  %s8919_s11 = scalar_lea.hbm %s9736_s20, 256 }
  0x99   :  { %s219_s19 = sshll.u32 %s9615_s10, 4  ;;  %p8920_p4 = scmp.ne.s32.totalorder %s9736_s20, %s8919_s11  ;;  %s220_s19 = int_to_ptr.vmem [resolvable:$true] %s219_s19 }
  0x9a   :  { %p8923_p5 = scmp.lt.u32.totalorder %s8919_s11, %s9736_s20 }
  0x9c   :  { %p8925_p6 = pnand %p8923_p5, %p8920_p4 }
  0x9e   :  { %8928 = shalt.err (!%p8925_p6)
}
  0x9f   :  { %s8929_s15 = scalar_lea.vmem %s220_s19, 256  ;;  %p8934_p8 = scmp.lt.s32.totalorder %s220_s19, %s220_s19 }
  0xa0   :  { %p8930_p7 = scmp.ne.s32.totalorder %s220_s19, %s8929_s15  ;;  %p8935_p9 = scmp.lt.s32.totalorder %s8929_s15, %s8929_s15 }
  0xa2   :  { %p8936_p10 = por %p8935_p9, %p8934_p8 }
  0xa4   :  { %p8937_p11 = pnand %p8936_p10, %p8930_p7 }
  0xa6   :  { %8940 = shalt.err (!%p8937_p11)
}
  0xa7   :  { %s9616_s16 = smov 128   ;;  %s9617_s30 = smov 8  }
  0xa8   :  { %225 = dma.hbm_to_vmem [thread:$0]  %s9736_s20, 256, %s220_s19, [#allocation18], %s9616_s16, %s9616_s16, %s9617_s30  }
  0xa9   :  { %s9618_s22 = smov [#allocation20]   ;;  %s8941_s26 = scalar_lea.hbm %s9746_s4, 51200 }
  0xaa   :  { %s241_s23 = sshll.u32 %s9618_s22, 4  ;;  %p8942_p12 = scmp.ne.s32.totalorder %s9746_s4, %s8941_s26  ;;  %s242_s23 = int_to_ptr.vmem [resolvable:$true] %s241_s23 }
  0xab   :  { %p8945_p13 = scmp.lt.u32.totalorder %s8941_s26, %s9746_s4 }
  0xad   :  { %p8947_p0 = pnand %p8945_p13, %p8942_p12 }
  0xaf   :  { %8950 = shalt.err (!%p8947_p0)
}
  0xb0   :  { %s8951_s0 = scalar_lea.vmem %s242_s23, 51200  ;;  %p8956_p2 = scmp.lt.s32.totalorder %s242_s23, %s242_s23 }
  0xb1   :  { %p8952_p1 = scmp.ne.s32.totalorder %s242_s23, %s8951_s0  ;;  %p8957_p3 = scmp.lt.s32.totalorder %s8951_s0, %s8951_s0 }
  0xb3   :  { %p8958_p4 = por %p8957_p3, %p8956_p2 }
  0xb5   :  { %p8959_p5 = pnand %p8958_p4, %p8952_p1 }
  0xb7   :  { %8962 = shalt.err (!%p8959_p5)
}
  0xb8   :  { %s9619_s28 = smov 1600   ;;  %s9620_s20 = smov 100  }
  0xb9   :  { %247 = dma.hbm_to_vmem [thread:$0]  %s9746_s4, 51200, %s242_s23, [#allocation21], %s9619_s28, %s9619_s28, %s9620_s20  }
  0xba   :  { %s9621_s1 = smov [#allocation23]   ;;  %s9622_s2 = smov [#allocation26]  }
  0xbb   :  { %s263_s8 = sshll.u32 %s9621_s1, 4  ;;  %s288_s7 = sshll.u32 %s9622_s2, 4  ;;  %s264_s8 = int_to_ptr.vmem [resolvable:$true] %s263_s8  ;;  %s289_s7 = int_to_ptr.vmem [resolvable:$true] %s288_s7 }
  0xbc   :  { %s8963_s10 = scalar_lea.hbm %s9756_s13, 1024 }
  0xbd   :  { %p8964_p6 = scmp.ne.s32.totalorder %s9756_s13, %s8963_s10  ;;  %p8967_p7 = scmp.lt.u32.totalorder %s8963_s10, %s9756_s13 }
  0xbf   :  { %p8969_p8 = pnand %p8967_p7, %p8964_p6 }
  0xc1   :  { %8972 = shalt.err (!%p8969_p8)
}
  0xc2   :  { %s8973_s19 = scalar_lea.vmem %s264_s8, 1024  ;;  %p8978_p10 = scmp.lt.s32.totalorder %s264_s8, %s264_s8 }
  0xc3   :  { %p8974_p9 = scmp.ne.s32.totalorder %s264_s8, %s8973_s19  ;;  %p8979_p11 = scmp.lt.s32.totalorder %s8973_s19, %s8973_s19 }
  0xc5   :  { %p8980_p12 = por %p8979_p11, %p8978_p10 }
  0xc7   :  { %p8981_p13 = pnand %p8980_p12, %p8974_p9 }
  0xc9   :  { %8984 = shalt.err (!%p8981_p13)
}
  0xca   :  { %269 = dma.hbm_to_vmem [thread:$0]  %s9756_s13, 1024, %s264_s8, [#allocation24], %s9611_s18, %s9611_s18, %s9612_s25  }
  0xcb   :  { %s8985_s4 = scalar_lea.hbm %s9766_s29, 16 }
  0xcc   :  { %p8986_p0 = scmp.ne.s32.totalorder %s9766_s29, %s8985_s4  ;;  %p8989_p1 = scmp.lt.u32.totalorder %s8985_s4, %s9766_s29 }
  0xce   :  { %p8991_p2 = pnand %p8989_p1, %p8986_p0 }
  0xd0   :  { %8994 = shalt.err (!%p8991_p2)
}
  0xd1   :  { %s8995_s11 = scalar_lea.vmem %s289_s7, 16  ;;  %s8999_s15 = scalar_lea.vmem %s289_s7, 32 }
  0xd2   :  { %p8996_p3 = scmp.ne.s32.totalorder %s289_s7, %s8995_s11  ;;  %p9000_p4 = scmp.lt.s32.totalorder %s289_s7, %s289_s7 }
  0xd3   :  { %p9001_p5 = scmp.lt.s32.totalorder %s8999_s15, %s8995_s11 }
  0xd5   :  { %p9002_p6 = por %p9001_p5, %p9000_p4 }
  0xd7   :  { %p9003_p7 = pnand %p9002_p6, %p8996_p3 }
  0xd9   :  { %9006 = shalt.err (!%p9003_p7)
}
  0xda   :  { %291 = dma.hbm_to_vmem [thread:$0]  %s9766_s29, 16, %s289_s7, [#allocation27]  }
  0xdb   :  { %s9623_s16 = smov [#allocation29]   ;;  %s9624_s30 = smov [#allocation32]  }
  0xdc   :  { %s308_s13 = sshll.u32 %s9623_s16, 4  ;;  %s327_s22 = sshll.u32 %s9624_s30, 4  ;;  %s309_s13 = int_to_ptr.vmem [resolvable:$true] %s308_s13  ;;  %s9911_s22 = int_to_ptr.vmem [resolvable:$true] %s327_s22 }
  0xdd   :  { %s9007_s23 = scalar_lea.hbm %s9776_s21, 16 }
  0xde   :  { %p9008_p8 = scmp.ne.s32.totalorder %s9776_s21, %s9007_s23  ;;  %p9011_p9 = scmp.lt.u32.totalorder %s9007_s23, %s9776_s21 }
  0xe0   :  { %p9013_p10 = pnand %p9011_p9, %p9008_p8 }
  0xe2   :  { %9016 = shalt.err (!%p9013_p10)
}
  0xe3   :  { %s9017_s26 = scalar_lea.vmem %s309_s13, 16  ;;  %s9021_s0 = scalar_lea.vmem %s309_s13, 32 }
  0xe4   :  { %p9018_p11 = scmp.ne.s32.totalorder %s309_s13, %s9017_s26  ;;  %p9022_p12 = scmp.lt.s32.totalorder %s309_s13, %s309_s13 }
  0xe5   :  { %p9023_p13 = scmp.lt.s32.totalorder %s9021_s0, %s9017_s26 }
  0xe7   :  { %p9024_p0 = por %p9023_p13, %p9022_p12 }
  0xe9   :  { %p9025_p1 = pnand %p9024_p0, %p9018_p11 }
  0xeb   :  { %9028 = shalt.err (!%p9025_p1)
}
  0xec   :  { %311 = dma.hbm_to_vmem [thread:$0]  %s9776_s21, 16, %s309_s13, [#allocation30]  }
  0xed   :  { %s9029_s29 = scalar_lea.hbm %s9786_s6, 256 }
  0xee   :  { %p9030_p2 = scmp.ne.s32.totalorder %s9786_s6, %s9029_s29  ;;  %p9033_p3 = scmp.lt.u32.totalorder %s9029_s29, %s9786_s6 }
  0xf0   :  { %p9035_p4 = pnand %p9033_p3, %p9030_p2 }
  0xf2   :  { %9038 = shalt.err (!%p9035_p4)
}
  0xf3   :  { %s9039_s28 = scalar_lea.vmem %s9911_s22, 256  ;;  %p9044_p6 = scmp.lt.s32.totalorder %s9911_s22, %s9911_s22 }
  0xf4   :  { %p9040_p5 = scmp.ne.s32.totalorder %s9911_s22, %s9039_s28  ;;  %p9045_p7 = scmp.lt.s32.totalorder %s9039_s28, %s9039_s28 }
  0xf6   :  { %p9046_p8 = por %p9045_p7, %p9044_p6 }
  0xf8   :  { %p9047_p9 = pnand %p9046_p8, %p9040_p5 }
  0xfa   :  { %9050 = shalt.err (!%p9047_p9)
}
  0xfb   :  { %333 = dma.hbm_to_vmem [thread:$0]  %s9786_s6, 256, %s9911_s22, [#allocation33], %s9611_s18, %s9611_s18, %s9612_s25  }
  0xfc   :  { %s9625_s21 = smov [#allocation35]   ;;  %s9626_s1 = smov [#allocation38]  }
  0xfd   :  { %s349_s20 = sshll.u32 %s9625_s21, 4  ;;  %s372_s8 = sshll.u32 %s9626_s1, 4  ;;  %s350_s20 = int_to_ptr.vmem [resolvable:$true] %s349_s20  ;;  %s373_s8 = int_to_ptr.vmem [resolvable:$true] %s372_s8 }
  0xfe   :  { %s9051_s2 = scalar_lea.hbm %s9796_s27, 256 }
  0xff   :  { %p9052_p10 = scmp.ne.s32.totalorder %s9796_s27, %s9051_s2  ;;  %p9055_p11 = scmp.lt.u32.totalorder %s9051_s2, %s9796_s27 }
 0x101   :  { %p9057_p12 = pnand %p9055_p11, %p9052_p10 }
 0x103   :  { %9060 = shalt.err (!%p9057_p12)
}
 0x104   :  { %s9061_s7 = scalar_lea.vmem %s350_s20, 256  ;;  %p9066_p0 = scmp.lt.s32.totalorder %s350_s20, %s350_s20 }
 0x105   :  { %p9062_p13 = scmp.ne.s32.totalorder %s350_s20, %s9061_s7  ;;  %p9067_p1 = scmp.lt.s32.totalorder %s9061_s7, %s9061_s7 }
 0x107   :  { %p9068_p2 = por %p9067_p1, %p9066_p0 }
 0x109   :  { %p9069_p3 = pnand %p9068_p2, %p9062_p13 }
 0x10b   :  { %9072 = shalt.err (!%p9069_p3)
}
 0x10c   :  { %355 = dma.hbm_to_vmem [thread:$0]  %s9796_s27, 256, %s350_s20, [#allocation36], %s9611_s18, %s9611_s18, %s9612_s25  }
 0x10d   :  { %s9073_s6 = scalar_lea.hbm %s9806_s12, 16 }
 0x10e   :  { %p9074_p4 = scmp.ne.s32.totalorder %s9806_s12, %s9073_s6  ;;  %p9077_p5 = scmp.lt.u32.totalorder %s9073_s6, %s9806_s12 }
 0x110   :  { %p9079_p6 = pnand %p9077_p5, %p9074_p4 }
 0x112   :  { %9082 = shalt.err (!%p9079_p6)
}
 0x113   :  { %s9083_s10 = scalar_lea.vmem %s373_s8, 16  ;;  %s9087_s19 = scalar_lea.vmem %s373_s8, 32 }
 0x114   :  { %p9084_p7 = scmp.ne.s32.totalorder %s373_s8, %s9083_s10  ;;  %p9088_p8 = scmp.lt.s32.totalorder %s373_s8, %s373_s8 }
 0x115   :  { %p9089_p9 = scmp.lt.s32.totalorder %s9087_s19, %s9083_s10 }
 0x117   :  { %p9090_p10 = por %p9089_p9, %p9088_p8 }
 0x119   :  { %p9091_p11 = pnand %p9090_p10, %p9084_p7 }
 0x11b   :  { %9094 = shalt.err (!%p9091_p11)
}
 0x11c   :  { %375 = dma.hbm_to_vmem [thread:$0]  %s9806_s12, 16, %s373_s8, [#allocation39]  }
 0x11d   :  { %s9627_s4 = smov [#allocation41]   ;;  %s9628_s11 = smov [#allocation44]  }
 0x11e   :  { %s391_s27 = sshll.u32 %s9627_s4, 4  ;;  %s416_s15 = sshll.u32 %s9628_s11, 4  ;;  %s392_s27 = int_to_ptr.vmem [resolvable:$true] %s391_s27  ;;  %s417_s15 = int_to_ptr.vmem [resolvable:$true] %s416_s15 }
 0x11f   :  { %s9095_s16 = scalar_lea.hbm %s9816_s24, 256 }
 0x120   :  { %p9096_p12 = scmp.ne.s32.totalorder %s9816_s24, %s9095_s16  ;;  %p9099_p13 = scmp.lt.u32.totalorder %s9095_s16, %s9816_s24 }
 0x122   :  { %p9101_p0 = pnand %p9099_p13, %p9096_p12 }
 0x124   :  { %9104 = shalt.err (!%p9101_p0)
}
 0x125   :  { %s9105_s13 = scalar_lea.vmem %s392_s27, 256  ;;  %p9110_p2 = scmp.lt.s32.totalorder %s392_s27, %s392_s27 }
 0x126   :  { %p9106_p1 = scmp.ne.s32.totalorder %s392_s27, %s9105_s13  ;;  %p9111_p3 = scmp.lt.s32.totalorder %s9105_s13, %s9105_s13 }
 0x128   :  { %p9112_p4 = por %p9111_p3, %p9110_p2 }
 0x12a   :  { %p9113_p5 = pnand %p9112_p4, %p9106_p1 }
 0x12c   :  { %9116 = shalt.err (!%p9113_p5)
}
 0x12d   :  { %397 = dma.hbm_to_vmem [thread:$0]  %s9816_s24, 256, %s392_s27, [#allocation42], %s9611_s18, %s9611_s18, %s9612_s25  }
 0x12e   :  { %s9117_s12 = scalar_lea.hbm %s9831_s5, 16 }
 0x12f   :  { %p9118_p6 = scmp.ne.s32.totalorder %s9831_s5, %s9117_s12  ;;  %p9121_p7 = scmp.lt.u32.totalorder %s9117_s12, %s9831_s5 }
 0x131   :  { %p9123_p8 = pnand %p9121_p7, %p9118_p6 }
 0x133   :  { %9126 = shalt.err (!%p9123_p8)
}
 0x134   :  { %s9127_s30 = scalar_lea.vmem %s417_s15, 16  ;;  %s9131_s22 = scalar_lea.vmem %s417_s15, 32 }
 0x135   :  { %p9128_p9 = scmp.ne.s32.totalorder %s417_s15, %s9127_s30  ;;  %p9132_p10 = scmp.lt.s32.totalorder %s417_s15, %s417_s15 }
 0x136   :  { %p9133_p11 = scmp.lt.s32.totalorder %s9131_s22, %s9127_s30 }
 0x138   :  { %p9134_p12 = por %p9133_p11, %p9132_p10 }
 0x13a   :  { %p9135_p13 = pnand %p9134_p12, %p9128_p9 }
 0x13c   :  { %9138 = shalt.err (!%p9135_p13)
}
 0x13d   :  { %s10952_s23 = sld [smem:[#allocation90_spill]]  ;;  %s9629_s26 = smov [#allocation47]  }
 0x13e   :  { %419 = dma.hbm_to_vmem [thread:$0]  %s9831_s5, 16, %s417_s15, [#allocation45]  }
 0x13f   :  { %s436_s24 = sshll.u32 %s9629_s26, 4  ;;  %s9630_s0 = smov [#allocation2]   ;;  %s437_s24 = int_to_ptr.vmem [resolvable:$true] %s436_s24 }
 0x140   :  { %s116_s29 = sshll.u32 %s9630_s0, 4  ;;  %s117_s29 = int_to_ptr.vmem [resolvable:$true] %s116_s29 }
 0x143   :  { %s9139_s28 = scalar_lea.hbm %s10952_s23, 16 }
 0x144   :  { %p9140_p0 = scmp.ne.s32.totalorder %s10952_s23, %s9139_s28  ;;  %p9143_p1 = scmp.lt.u32.totalorder %s9139_s28, %s10952_s23 }
 0x146   :  { %p9145_p2 = pnand %p9143_p1, %p9140_p0 }
 0x148   :  { %9148 = shalt.err (!%p9145_p2)
}
 0x149   :  { %s9149_s21 = scalar_lea.vmem %s437_s24, 16  ;;  %s9153_s20 = scalar_lea.vmem %s437_s24, 32 }
 0x14a   :  { %p9150_p3 = scmp.ne.s32.totalorder %s437_s24, %s9149_s21  ;;  %p9154_p4 = scmp.lt.s32.totalorder %s437_s24, %s437_s24 }
 0x14b   :  { %p9155_p5 = scmp.lt.s32.totalorder %s9153_s20, %s9149_s21 }
 0x14d   :  { %p9156_p6 = por %p9155_p5, %p9154_p4 }
 0x14f   :  { %p9157_p7 = pnand %p9156_p6, %p9150_p3 }
 0x151   :  { %9160 = shalt.err (!%p9157_p7)
}
 0x152   :  { %s10953_s5 = sld [smem:[#allocation71_spill]] }
 0x153   :  { %439 = dma.hbm_to_vmem [thread:$0]  %s10952_s23, 16, %s437_s24, [#allocation48]  }
 0x158   :  { %s9161_s1 = scalar_lea.hbm %s10953_s5, 32 }
 0x159   :  { %p9162_p8 = scmp.ne.s32.totalorder %s10953_s5, %s9161_s1  ;;  %p9165_p9 = scmp.lt.u32.totalorder %s9161_s1, %s10953_s5 }
 0x15b   :  { %p9167_p10 = pnand %p9165_p9, %p9162_p8 }
 0x15d   :  { %9170 = shalt.err (!%p9167_p10)
}
 0x15e   :  { %s9171_s8 = scalar_lea.vmem %s117_s29, 32  ;;  %p9176_p12 = scmp.lt.s32.totalorder %s117_s29, %s117_s29 }
 0x15f   :  { %p9172_p11 = scmp.ne.s32.totalorder %s117_s29, %s9171_s8  ;;  %p9177_p13 = scmp.lt.s32.totalorder %s9171_s8, %s9171_s8 }
 0x161   :  { %p9178_p0 = por %p9177_p13, %p9176_p12 }
 0x163   :  { %p9179_p1 = pnand %p9178_p0, %p9172_p11 }
 0x165   :  { %9182 = shalt.err (!%p9179_p1)
}
 0x166   :  { %s10954_s2 = sld [smem:[#allocation74_spill]]  ;;  %s9631_s7 = smov [#allocation7]  }
 0x167   :  { %119 = dma.hbm_to_vmem [thread:$0]  %s10953_s5, 32, %s117_s29, [#allocation3]  }
 0x168   :  { %s140_s6 = sshll.u32 %s9631_s7, 4  ;;  %s9632_s10 = smov [#allocation10]   ;;  %s141_s6 = int_to_ptr.vmem [resolvable:$true] %s140_s6 }
 0x169   :  { %s161_s19 = sshll.u32 %s9632_s10, 4  ;;  %s9959_s19 = int_to_ptr.vmem [resolvable:$true] %s161_s19 }
 0x16c   :  { %s9183_s4 = scalar_lea.hbm %s10954_s2, 16 }
 0x16d   :  { %p9184_p2 = scmp.ne.s32.totalorder %s10954_s2, %s9183_s4  ;;  %p9187_p3 = scmp.lt.u32.totalorder %s9183_s4, %s10954_s2 }
 0x16f   :  { %p9189_p4 = pnand %p9187_p3, %p9184_p2 }
 0x171   :  { %9192 = shalt.err (!%p9189_p4)
}
 0x172   :  { %s9193_s27 = scalar_lea.vmem %s141_s6, 16  ;;  %s9197_s11 = scalar_lea.vmem %s141_s6, 32 }
 0x173   :  { %p9194_p5 = scmp.ne.s32.totalorder %s141_s6, %s9193_s27  ;;  %p9198_p6 = scmp.lt.s32.totalorder %s141_s6, %s141_s6 }
 0x174   :  { %p9199_p7 = scmp.lt.s32.totalorder %s9197_s11, %s9193_s27 }
 0x176   :  { %p9200_p8 = por %p9199_p7, %p9198_p6 }
 0x178   :  { %p9201_p9 = pnand %p9200_p8, %p9194_p5 }
 0x17a   :  { %9204 = shalt.err (!%p9201_p9)
}
 0x17b   :  { %s10955_s15 = sld [smem:[#allocation75_spill]] }
 0x17c   :  { %143 = dma.hbm_to_vmem [thread:$0]  %s10954_s2, 16, %s141_s6, [#allocation6]  }
 0x181   :  { %s9205_s16 = scalar_lea.hbm %s10955_s15, 256 }
 0x182   :  { %p9206_p10 = scmp.ne.s32.totalorder %s10955_s15, %s9205_s16  ;;  %p9209_p11 = scmp.lt.u32.totalorder %s9205_s16, %s10955_s15 }
 0x184   :  { %p9211_p12 = pnand %p9209_p11, %p9206_p10 }
 0x186   :  { %9214 = shalt.err (!%p9211_p12)
}
 0x187   :  { %s9215_s13 = scalar_lea.vmem %s9959_s19, 256  ;;  %p9220_p0 = scmp.lt.s32.totalorder %s9959_s19, %s9959_s19 }
 0x188   :  { %p9216_p13 = scmp.ne.s32.totalorder %s9959_s19, %s9215_s13  ;;  %p9221_p1 = scmp.lt.s32.totalorder %s9215_s13, %s9215_s13 }
 0x18a   :  { %p9222_p2 = por %p9221_p1, %p9220_p0 }
 0x18c   :  { %p9223_p3 = pnand %p9222_p2, %p9216_p13 }
 0x18e   :  { %9226 = shalt.err (!%p9223_p3)
}
 0x18f   :  { %s10956_s12 = sld [smem:[#allocation76_spill]]  ;;  %s9633_s30 = smov [#allocation13]  }
 0x190   :  { %167 = dma.hbm_to_vmem [thread:$0]  %s10955_s15, 256, %s9959_s19, [#allocation9], %s9611_s18, %s9611_s18, %s9612_s25  }
 0x191   :  { %s185_s22 = sshll.u32 %s9633_s30, 4  ;;  %s9634_s23 = smov [#allocation16]   ;;  %s186_s22 = int_to_ptr.vmem [resolvable:$true] %s185_s22 }
 0x192   :  { %s210_s26 = sshll.u32 %s9634_s23, 4  ;;  %s211_s26 = int_to_ptr.vmem [resolvable:$true] %s210_s26 }
 0x195   :  { %s9227_s24 = scalar_lea.hbm %s10956_s12, 256 }
 0x196   :  { %p9228_p4 = scmp.ne.s32.totalorder %s10956_s12, %s9227_s24  ;;  %p9231_p5 = scmp.lt.u32.totalorder %s9227_s24, %s10956_s12 }
 0x198   :  { %p9233_p6 = pnand %p9231_p5, %p9228_p4 }
 0x19a   :  { %9236 = shalt.err (!%p9233_p6)
}
 0x19b   :  { %s9237_s0 = scalar_lea.vmem %s186_s22, 256  ;;  %p9242_p8 = scmp.lt.s32.totalorder %s186_s22, %s186_s22 }
 0x19c   :  { %p9238_p7 = scmp.ne.s32.totalorder %s186_s22, %s9237_s0  ;;  %p9243_p9 = scmp.lt.s32.totalorder %s9237_s0, %s9237_s0 }
 0x19e   :  { %p9244_p10 = por %p9243_p9, %p9242_p8 }
 0x1a0   :  { %p9245_p11 = pnand %p9244_p10, %p9238_p7 }
 0x1a2   :  { %9248 = shalt.err (!%p9245_p11)
}
 0x1a3   :  { %s10957_s29 = sld [smem:[#allocation78_spill]] }
 0x1a4   :  { %191 = dma.hbm_to_vmem [thread:$0]  %s10956_s12, 256, %s186_s22, [#allocation12], %s9611_s18, %s9611_s18, %s9612_s25  }
 0x1a9   :  { %s9249_s28 = scalar_lea.hbm %s10957_s29, 16 }
 0x1aa   :  { %p9250_p12 = scmp.ne.s32.totalorder %s10957_s29, %s9249_s28  ;;  %p9253_p13 = scmp.lt.u32.totalorder %s9249_s28, %s10957_s29 }
 0x1ac   :  { %p9255_p0 = pnand %p9253_p13, %p9250_p12 }
 0x1ae   :  { %9258 = shalt.err (!%p9255_p0)
}
 0x1af   :  { %s9259_s21 = scalar_lea.vmem %s211_s26, 16  ;;  %s9263_s20 = scalar_lea.vmem %s211_s26, 32 }
 0x1b0   :  { %p9260_p1 = scmp.ne.s32.totalorder %s211_s26, %s9259_s21  ;;  %p9264_p2 = scmp.lt.s32.totalorder %s211_s26, %s211_s26 }
 0x1b1   :  { %p9265_p3 = scmp.lt.s32.totalorder %s9263_s20, %s9259_s21 }
 0x1b3   :  { %p9266_p4 = por %p9265_p3, %p9264_p2 }
 0x1b5   :  { %p9267_p5 = pnand %p9266_p4, %p9260_p1 }
 0x1b7   :  { %9270 = shalt.err (!%p9267_p5)
}
 0x1b8   :  { %s10958_s5 = sld [smem:[#allocation79_spill]]  ;;  %s9635_s1 = smov [#allocation19]  }
 0x1b9   :  { %213 = dma.hbm_to_vmem [thread:$0]  %s10957_s29, 16, %s211_s26, [#allocation15]  }
 0x1ba   :  { %s232_s8 = sshll.u32 %s9635_s1, 4  ;;  %s9636_s2 = smov [#allocation22]   ;;  %s233_s8 = int_to_ptr.vmem [resolvable:$true] %s232_s8 }
 0x1bb   :  { %s254_s7 = sshll.u32 %s9636_s2, 4  ;;  %s255_s7 = int_to_ptr.vmem [resolvable:$true] %s254_s7 }
 0x1be   :  { %s9271_s6 = scalar_lea.hbm %s10958_s5, 32 }
 0x1bf   :  { %p9272_p6 = scmp.ne.s32.totalorder %s10958_s5, %s9271_s6  ;;  %p9275_p7 = scmp.lt.u32.totalorder %s9271_s6, %s10958_s5 }
 0x1c1   :  { %p9277_p8 = pnand %p9275_p7, %p9272_p6 }
 0x1c3   :  { %9280 = shalt.err (!%p9277_p8)
}
 0x1c4   :  { %s9281_s10 = scalar_lea.vmem %s233_s8, 32  ;;  %p9286_p10 = scmp.lt.s32.totalorder %s233_s8, %s233_s8 }
 0x1c5   :  { %p9282_p9 = scmp.ne.s32.totalorder %s233_s8, %s9281_s10  ;;  %p9287_p11 = scmp.lt.s32.totalorder %s9281_s10, %s9281_s10 }
 0x1c7   :  { %p9288_p12 = por %p9287_p11, %p9286_p10 }
 0x1c9   :  { %p9289_p13 = pnand %p9288_p12, %p9282_p9 }
 0x1cb   :  { %9292 = shalt.err (!%p9289_p13)
}
 0x1cc   :  { %s10959_s19 = sld [smem:[#allocation80_spill]] }
 0x1cd   :  { %235 = dma.hbm_to_vmem [thread:$0]  %s10958_s5, 32, %s233_s8, [#allocation18]  }
 0x1d2   :  { %s9293_s4 = scalar_lea.hbm %s10959_s19, 400 }
 0x1d3   :  { %p9294_p0 = scmp.ne.s32.totalorder %s10959_s19, %s9293_s4  ;;  %p9297_p1 = scmp.lt.u32.totalorder %s9293_s4, %s10959_s19 }
 0x1d5   :  { %p9299_p2 = pnand %p9297_p1, %p9294_p0 }
 0x1d7   :  { %9302 = shalt.err (!%p9299_p2)
}
 0x1d8   :  { %s9303_s27 = scalar_lea.vmem %s255_s7, 400  ;;  %s9307_s11 = scalar_lea.vmem %s255_s7, 416 }
 0x1d9   :  { %p9304_p3 = scmp.ne.s32.totalorder %s255_s7, %s9303_s27  ;;  %p9308_p4 = scmp.lt.s32.totalorder %s255_s7, %s255_s7 }
 0x1da   :  { %p9309_p5 = scmp.lt.s32.totalorder %s9307_s11, %s9303_s27 }
 0x1dc   :  { %p9310_p6 = por %p9309_p5, %p9308_p4 }
 0x1de   :  { %p9311_p7 = pnand %p9310_p6, %p9304_p3 }
 0x1e0   :  { %9314 = shalt.err (!%p9311_p7)
}
 0x1e1   :  { %s10960_s15 = sld [smem:[#allocation81_spill]]  ;;  %s9637_s16 = smov [#allocation25]  }
 0x1e2   :  { %257 = dma.hbm_to_vmem [thread:$0]  %s10959_s19, 400, %s255_s7, [#allocation21]  }
 0x1e3   :  { %s275_s13 = sshll.u32 %s9637_s16, 4  ;;  %s9638_s12 = smov [#allocation28]   ;;  %s276_s13 = int_to_ptr.vmem [resolvable:$true] %s275_s13 }
 0x1e4   :  { %s298_s30 = sshll.u32 %s9638_s12, 4  ;;  %s299_s30 = int_to_ptr.vmem [resolvable:$true] %s298_s30 }
 0x1e7   :  { %s9315_s22 = scalar_lea.hbm %s10960_s15, 128 }
 0x1e8   :  { %p9316_p8 = scmp.ne.s32.totalorder %s10960_s15, %s9315_s22  ;;  %p9319_p9 = scmp.lt.u32.totalorder %s9315_s22, %s10960_s15 }
 0x1ea   :  { %p9321_p10 = pnand %p9319_p9, %p9316_p8 }
 0x1ec   :  { %9324 = shalt.err (!%p9321_p10)
}
 0x1ed   :  { %s9325_s23 = scalar_lea.vmem %s276_s13, 128  ;;  %p9330_p12 = scmp.lt.s32.totalorder %s276_s13, %s276_s13 }
 0x1ee   :  { %p9326_p11 = scmp.ne.s32.totalorder %s276_s13, %s9325_s23  ;;  %p9331_p13 = scmp.lt.s32.totalorder %s9325_s23, %s9325_s23 }
 0x1f0   :  { %p9332_p0 = por %p9331_p13, %p9330_p12 }
 0x1f2   :  { %p9333_p1 = pnand %p9332_p0, %p9326_p11 }
 0x1f4   :  { %9336 = shalt.err (!%p9333_p1)
}
 0x1f5   :  { %s10961_s26 = sld [smem:[#allocation82_spill]] }
 0x1f6   :  { %281 = dma.hbm_to_vmem [thread:$0]  %s10960_s15, 128, %s276_s13, [#allocation24], %s9611_s18, %s9611_s18, %s9612_s25  }
 0x1fb   :  { %s9337_s24 = scalar_lea.hbm %s10961_s26, 16 }
 0x1fc   :  { %p9338_p2 = scmp.ne.s32.totalorder %s10961_s26, %s9337_s24  ;;  %p9341_p3 = scmp.lt.u32.totalorder %s9337_s24, %s10961_s26 }
 0x1fe   :  { %p9343_p4 = pnand %p9341_p3, %p9338_p2 }
 0x200   :  { %9346 = shalt.err (!%p9343_p4)
}
 0x201   :  { %s9347_s0 = scalar_lea.vmem %s299_s30, 16  ;;  %s9351_s29 = scalar_lea.vmem %s299_s30, 32 }
 0x202   :  { %p9348_p5 = scmp.ne.s32.totalorder %s299_s30, %s9347_s0  ;;  %p9352_p6 = scmp.lt.s32.totalorder %s299_s30, %s299_s30 }
 0x203   :  { %p9353_p7 = scmp.lt.s32.totalorder %s9351_s29, %s9347_s0 }
 0x205   :  { %p9354_p8 = por %p9353_p7, %p9352_p6 }
 0x207   :  { %p9355_p9 = pnand %p9354_p8, %p9348_p5 }
 0x209   :  { %9358 = shalt.err (!%p9355_p9)
}
 0x20a   :  { %s10962_s28 = sld [smem:[#allocation83_spill]]  ;;  %s9639_s21 = smov [#allocation31]  }
 0x20b   :  { %301 = dma.hbm_to_vmem [thread:$0]  %s10961_s26, 16, %s299_s30, [#allocation27]  }
 0x20c   :  { %s318_s20 = sshll.u32 %s9639_s21, 4  ;;  %s9640_s5 = smov [#allocation34]   ;;  %s319_s20 = int_to_ptr.vmem [resolvable:$true] %s318_s20 }
 0x20d   :  { %s340_s1 = sshll.u32 %s9640_s5, 4  ;;  %s341_s1 = int_to_ptr.vmem [resolvable:$true] %s340_s1 }
 0x210   :  { %s9359_s8 = scalar_lea.hbm %s10962_s28, 16 }
 0x211   :  { %p9360_p10 = scmp.ne.s32.totalorder %s10962_s28, %s9359_s8  ;;  %p9363_p11 = scmp.lt.u32.totalorder %s9359_s8, %s10962_s28 }
 0x213   :  { %p9365_p12 = pnand %p9363_p11, %p9360_p10 }
 0x215   :  { %9368 = shalt.err (!%p9365_p12)
}
 0x216   :  { %s9369_s2 = scalar_lea.vmem %s319_s20, 16  ;;  %s9373_s7 = scalar_lea.vmem %s319_s20, 32 }
 0x217   :  { %p9370_p13 = scmp.ne.s32.totalorder %s319_s20, %s9369_s2  ;;  %p9374_p0 = scmp.lt.s32.totalorder %s319_s20, %s319_s20 }
 0x218   :  { %p9375_p1 = scmp.lt.s32.totalorder %s9373_s7, %s9369_s2 }
 0x21a   :  { %p9376_p2 = por %p9375_p1, %p9374_p0 }
 0x21c   :  { %p9377_p3 = pnand %p9376_p2, %p9370_p13 }
 0x21e   :  { %9380 = shalt.err (!%p9377_p3)
}
 0x21f   :  { %s10963_s6 = sld [smem:[#allocation84_spill]] }
 0x220   :  { %321 = dma.hbm_to_vmem [thread:$0]  %s10962_s28, 16, %s319_s20, [#allocation30]  }
 0x225   :  { %s9381_s10 = scalar_lea.hbm %s10963_s6, 16 }
 0x226   :  { %p9382_p4 = scmp.ne.s32.totalorder %s10963_s6, %s9381_s10  ;;  %p9385_p5 = scmp.lt.u32.totalorder %s9381_s10, %s10963_s6 }
 0x228   :  { %p9387_p6 = pnand %p9385_p5, %p9382_p4 }
 0x22a   :  { %9390 = shalt.err (!%p9387_p6)
}
 0x22b   :  { %s9391_s19 = scalar_lea.vmem %s341_s1, 16  ;;  %s9395_s4 = scalar_lea.vmem %s341_s1, 32 }
 0x22c   :  { %p9392_p7 = scmp.ne.s32.totalorder %s341_s1, %s9391_s19  ;;  %p9396_p8 = scmp.lt.s32.totalorder %s341_s1, %s341_s1 }
 0x22d   :  { %p9397_p9 = scmp.lt.s32.totalorder %s9395_s4, %s9391_s19 }
 0x22f   :  { %p9398_p10 = por %p9397_p9, %p9396_p8 }
 0x231   :  { %p9399_p11 = pnand %p9398_p10, %p9392_p7 }
 0x233   :  { %9402 = shalt.err (!%p9399_p11)
}
 0x234   :  { %s10964_s27 = sld [smem:[#allocation85_spill]]  ;;  %s9641_s11 = smov [#allocation37]  }
 0x235   :  { %343 = dma.hbm_to_vmem [thread:$0]  %s10963_s6, 16, %s341_s1, [#allocation33]  }
 0x236   :  { %s362_s15 = sshll.u32 %s9641_s11, 4  ;;  %s9642_s16 = smov [#allocation40]   ;;  %s363_s15 = int_to_ptr.vmem [resolvable:$true] %s362_s15 }
 0x237   :  { %s382_s13 = sshll.u32 %s9642_s16, 4  ;;  %s383_s13 = int_to_ptr.vmem [resolvable:$true] %s382_s13 }
 0x23a   :  { %s9403_s12 = scalar_lea.hbm %s10964_s27, 16 }
 0x23b   :  { %p9404_p12 = scmp.ne.s32.totalorder %s10964_s27, %s9403_s12  ;;  %p9407_p13 = scmp.lt.u32.totalorder %s9403_s12, %s10964_s27 }
 0x23d   :  { %p9409_p0 = pnand %p9407_p13, %p9404_p12 }
 0x23f   :  { %9412 = shalt.err (!%p9409_p0)
}
 0x240   :  { %s9413_s30 = scalar_lea.vmem %s363_s15, 16  ;;  %s9417_s22 = scalar_lea.vmem %s363_s15, 32 }
 0x241   :  { %p9414_p1 = scmp.ne.s32.totalorder %s363_s15, %s9413_s30  ;;  %p9418_p2 = scmp.lt.s32.totalorder %s363_s15, %s363_s15 }
 0x242   :  { %p9419_p3 = scmp.lt.s32.totalorder %s9417_s22, %s9413_s30 }
 0x244   :  { %p9420_p4 = por %p9419_p3, %p9418_p2 }
 0x246   :  { %p9421_p5 = pnand %p9420_p4, %p9414_p1 }
 0x248   :  { %9424 = shalt.err (!%p9421_p5)
}
 0x249   :  { %s10965_s23 = sld [smem:[#allocation86_spill]] }
 0x24a   :  { %365 = dma.hbm_to_vmem [thread:$0]  %s10964_s27, 16, %s363_s15, [#allocation36]  }
 0x24f   :  { %s9425_s26 = scalar_lea.hbm %s10965_s23, 16 }
 0x250   :  { %p9426_p6 = scmp.ne.s32.totalorder %s10965_s23, %s9425_s26  ;;  %p9429_p7 = scmp.lt.u32.totalorder %s9425_s26, %s10965_s23 }
 0x252   :  { %p9431_p8 = pnand %p9429_p7, %p9426_p6 }
 0x254   :  { %9434 = shalt.err (!%p9431_p8)
}
 0x255   :  { %s9435_s24 = scalar_lea.vmem %s383_s13, 16  ;;  %s9439_s0 = scalar_lea.vmem %s383_s13, 32 }
 0x256   :  { %p9436_p9 = scmp.ne.s32.totalorder %s383_s13, %s9435_s24  ;;  %p9440_p10 = scmp.lt.s32.totalorder %s383_s13, %s383_s13 }
 0x257   :  { %p9441_p11 = scmp.lt.s32.totalorder %s9439_s0, %s9435_s24 }
 0x259   :  { %p9442_p12 = por %p9441_p11, %p9440_p10 }
 0x25b   :  { %p9443_p13 = pnand %p9442_p12, %p9436_p9 }
 0x25d   :  { %9446 = shalt.err (!%p9443_p13)
}
 0x25e   :  { %s10966_s29 = sld [smem:[#allocation87_spill]]  ;;  %s9643_s28 = smov [#allocation43]  }
 0x25f   :  { %385 = dma.hbm_to_vmem [thread:$0]  %s10965_s23, 16, %s383_s13, [#allocation39]  }
 0x260   :  { %s404_s21 = sshll.u32 %s9643_s28, 4  ;;  %s9644_s20 = smov [#allocation46]   ;;  %s405_s21 = int_to_ptr.vmem [resolvable:$true] %s404_s21 }
 0x261   :  { %s426_s5 = sshll.u32 %s9644_s20, 4  ;;  %s427_s5 = int_to_ptr.vmem [resolvable:$true] %s426_s5 }
 0x264   :  { %s9447_s1 = scalar_lea.hbm %s10966_s29, 16 }
 0x265   :  { %p9448_p0 = scmp.ne.s32.totalorder %s10966_s29, %s9447_s1  ;;  %p9451_p1 = scmp.lt.u32.totalorder %s9447_s1, %s10966_s29 }
 0x267   :  { %p9453_p2 = pnand %p9451_p1, %p9448_p0 }
 0x269   :  { %9456 = shalt.err (!%p9453_p2)
}
 0x26a   :  { %s9457_s8 = scalar_lea.vmem %s405_s21, 16  ;;  %s9461_s2 = scalar_lea.vmem %s405_s21, 32 }
 0x26b   :  { %p9458_p3 = scmp.ne.s32.totalorder %s405_s21, %s9457_s8  ;;  %p9462_p4 = scmp.lt.s32.totalorder %s405_s21, %s405_s21 }
 0x26c   :  { %p9463_p5 = scmp.lt.s32.totalorder %s9461_s2, %s9457_s8 }
 0x26e   :  { %p9464_p6 = por %p9463_p5, %p9462_p4 }
 0x270   :  { %p9465_p7 = pnand %p9464_p6, %p9458_p3 }
 0x272   :  { %9468 = shalt.err (!%p9465_p7)
}
 0x273   :  { %s10967_s7 = sld [smem:[#allocation89_spill]] }
 0x274   :  { %407 = dma.hbm_to_vmem [thread:$0]  %s10966_s29, 16, %s405_s21, [#allocation42]  }
 0x279   :  { %s9469_s6 = scalar_lea.hbm %s10967_s7, 16 }
 0x27a   :  { %p9470_p8 = scmp.ne.s32.totalorder %s10967_s7, %s9469_s6  ;;  %p9473_p9 = scmp.lt.u32.totalorder %s9469_s6, %s10967_s7 }
 0x27c   :  { %p9475_p10 = pnand %p9473_p9, %p9470_p8 }
 0x27e   :  { %9478 = shalt.err (!%p9475_p10)
}
 0x27f   :  { %s9479_s10 = scalar_lea.vmem %s427_s5, 16  ;;  %s9483_s19 = scalar_lea.vmem %s427_s5, 32 }
 0x280   :  { %p9480_p11 = scmp.ne.s32.totalorder %s427_s5, %s9479_s10  ;;  %p9484_p12 = scmp.lt.s32.totalorder %s427_s5, %s427_s5 }
 0x281   :  { %p9485_p13 = scmp.lt.s32.totalorder %s9483_s19, %s9479_s10 }
 0x283   :  { %p9486_p0 = por %p9485_p13, %p9484_p12 }
 0x285   :  { %p9487_p1 = pnand %p9486_p0, %p9480_p11 }
 0x287   :  { %9490 = shalt.err (!%p9487_p1)
}
 0x288   :  { %429 = dma.hbm_to_vmem [thread:$0]  %s10967_s7, 16, %s427_s5, [#allocation45]  }
 0x289   :  { %s9645_s4 = smov [#allocation49]   ;;  %s9491_s11 = scalar_lea.hbm %s9846_s14, 256 }
 0x28a   :  { %s445_s27 = sshll.u32 %s9645_s4, 4  ;;  %p9492_p2 = scmp.ne.s32.totalorder %s9846_s14, %s9491_s11  ;;  %s446_s27 = int_to_ptr.vmem [resolvable:$true] %s445_s27 }
 0x28b   :  { %p9495_p3 = scmp.lt.u32.totalorder %s9491_s11, %s9846_s14 }
 0x28d   :  { %p9497_p4 = pnand %p9495_p3, %p9492_p2 }
 0x28f   :  { %9500 = shalt.err (!%p9497_p4)
}
 0x290   :  { %s9501_s15 = scalar_lea.vmem %s446_s27, 256  ;;  %p9506_p6 = scmp.lt.s32.totalorder %s446_s27, %s446_s27 }
 0x291   :  { %p9502_p5 = scmp.ne.s32.totalorder %s446_s27, %s9501_s15  ;;  %p9507_p7 = scmp.lt.s32.totalorder %s9501_s15, %s9501_s15 }
 0x293   :  { %p9508_p8 = por %p9507_p7, %p9506_p6 }
 0x295   :  { %p9509_p9 = pnand %p9508_p8, %p9502_p5 }
 0x297   :  { %9512 = shalt.err (!%p9509_p9)
}
 0x298   :  { %451 = dma.hbm_to_vmem [thread:$0]  %s9846_s14, 256, %s446_s27, [#allocation48], %s9611_s18, %s9611_s18, %s9612_s25  }
 0x299   :  { %9535 = dma.done.wait [#allocation3], 32  }
 0x29a   :  { %9536 = vsyncadd [#allocation3], 4294967264 }
 0x29b   :  { %9537 = dma.done.wait [#allocation6], 32  }
 0x29c   :  { %9538 = vsyncadd [#allocation6], 4294967264 }
 0x29d   :  { %9539 = dma.done.wait [#allocation9], 512  }
 0x29e   :  { %9540 = vsyncadd [#allocation9], 4294966784 }
 0x29f   :  { %9541 = dma.done.wait [#allocation12], 512  }
 0x2a0   :  { %9542 = vsyncadd [#allocation12], 4294966784 }
 0x2a1   :  { %9543 = dma.done.wait [#allocation15], 32  }
 0x2a2   :  { %9544 = vsyncadd [#allocation15], 4294967264 }
 0x2a3   :  { %9545 = dma.done.wait [#allocation18], 288  }
 0x2a4   :  { %9546 = vsyncadd [#allocation18], 4294967008 }
 0x2a5   :  { %9547 = dma.done.wait [#allocation21], 51600  }
 0x2a6   :  { %9548 = vsyncadd [#allocation21], 4294915696 }
 0x2a7   :  { %9549 = dma.done.wait [#allocation24], 1152  }
 0x2a8   :  { %9550 = vsyncadd [#allocation24], 4294966144 }
 0x2a9   :  { %9551 = dma.done.wait [#allocation27], 32  }
 0x2aa   :  { %9552 = vsyncadd [#allocation27], 4294967264 }
 0x2ab   :  { %9553 = dma.done.wait [#allocation30], 32  }
 0x2ac   :  { %9554 = vsyncadd [#allocation30], 4294967264 }
 0x2ad   :  { %9555 = dma.done.wait [#allocation33], 272  }
 0x2ae   :  { %9556 = vsyncadd [#allocation33], 4294967024 }
 0x2af   :  { %9557 = dma.done.wait [#allocation36], 272  }
 0x2b0   :  { %9558 = vsyncadd [#allocation36], 4294967024 }
 0x2b1   :  { %9559 = dma.done.wait [#allocation39], 32  }
 0x2b2   :  { %9560 = vsyncadd [#allocation39], 4294967264 }
 0x2b3   :  { %9561 = dma.done.wait [#allocation42], 272  }
 0x2b4   :  { %9562 = vsyncadd [#allocation42], 4294967024 }
 0x2b5   :  { %9563 = dma.done.wait [#allocation45], 32  }
 0x2b6   :  { %9564 = vsyncadd [#allocation45], 4294967264 }
 0x2b7   :  { %9565 = dma.done.wait [#allocation48], 272  }
 0x2b8   :  { %9566 = vsyncadd [#allocation48], 4294967024  ;;  %s10968_s14 = sld [smem:[#allocation72_spill]]  ;;  %v9646_v21 = vmov 1983009808   ;;  %v554_v23 = vlaneseq  ;;  %s10969_s18 = sld [smem:[#allocation68_spill]] }
 0x2b9   :  { %v552_v22 = vunpack.c.l.s4 %v9646_v21  ;;  %s10970_s25 = sld [smem:[#allocation73_spill]]  ;;  %s10971_s16 = sld [smem:[#allocation69_spill]]  ;;  %vm9648_vm0 = vmmov 0   ;;  %vm1139_vm1 = vcmask 523264   ;;  %vm1197_vm2 = vcmask 1041409  }
 0x2ba   :  { %v10064_v29 = vshrl.u32 %v554_v23, 7  ;;  %vm1212_vm3 = vcmask 261120   ;;  %s10972_s13 = sld [smem:[#allocation70_spill]]  ;;  %vm1434_vm5 = vcmask 58368   ;;  %s10973_s12 = sld [smem:[#allocation77_spill]]  ;;  %vm1623_vm6 = vcmask 123904  }
 0x2bb   :  { %v553_v28 = vunpack.c.0.s8 %v552_v22  ;;  %vm1625_vm7 = vcmask 255104   ;;  %vm1652_vm8 = vcmask 130048   ;;  %vm6002_vm9 = vcmask 254976  }
 0x2bd   :  { %v556_v34 = vsub.s32 %v553_v28, %v10064_v29 }
 0x2be   :  { %v8128_v0 = vld [vmem:[%s10968_s14 + $0x40] sm:$0xff]   ;;  %v8132_v4 = vld [vmem:[%s10968_s14 + $0x48] sm:$0xff]   ;;  %v8136_v8 = vld [vmem:[%s10968_s14 + $0x50] sm:$0xff]  }
 0x2bf   :  { %v8129_v1 = vld [vmem:[%s10968_s14] sm:$0xff]   ;;  %7072 = vmatprep.subr.bf16.mxu0 %v8128_v0  ;;  %v8133_v5 = vld [vmem:[%s10968_s14 + $0x8] sm:$0xff]   ;;  %v8137_v9 = vld [vmem:[%s10968_s14 + $0x10] sm:$0xff]  }
 0x2c0   :  { %v8130_v2 = vld [vmem:[%s10968_s14 + $0xc0] sm:$0xff]   ;;  %7073 = vmatpush3.bf16.msra.mxu0 %v8129_v1  ;;  %v8134_v6 = vld [vmem:[%s10968_s14 + $0xc8] sm:$0xff]   ;;  %v8138_v10 = vld [vmem:[%s10968_s14 + $0xd0] sm:$0xff]  }
 0x2c1   :  { %v8131_v3 = vld [vmem:[%s10968_s14 + $0x80] sm:$0xff]   ;;  %7094 = vmatprep.subr.bf16.mxu1 %v8130_v2  ;;  %7074 = vmatprep.subr.bf16.mxu0 %v8132_v4  ;;  %v8135_v7 = vld [vmem:[%s10968_s14 + $0x88] sm:$0xff]   ;;  %v8139_v11 = vld [vmem:[%s10968_s14 + $0x90] sm:$0xff]  }
 0x2c2   :  { %7095 = vmatpush3.bf16.msra.mxu1 %v8131_v3  ;;  %v8140_v12 = vld [vmem:[%s10968_s14 + $0x58] sm:$0xff]   ;;  %v8144_v16 = vld [vmem:[%s10968_s14 + $0x60] sm:$0xff]   ;;  %v8148_v20 = vld [vmem:[%s10968_s14 + $0x68] sm:$0xff]  }
 0x2c3   :  { %7096 = vmatprep.subr.bf16.mxu1 %v8134_v6  ;;  %v8141_v13 = vld [vmem:[%s10968_s14 + $0x18] sm:$0xff]   ;;  %v8145_v17 = vld [vmem:[%s10968_s14 + $0x20] sm:$0xff]   ;;  %v8149_v24 = vld [vmem:[%s10968_s14 + $0x28] sm:$0xff]   ;;  %v9647_v6 = vmov 0.0  }
 0x2c4   :  { %7075 = vmatpush3.bf16.msra.mxu0 %v8133_v5  ;;  %v8142_v14 = vld [vmem:[%s10968_s14 + $0xd8] sm:$0xff]   ;;  %v8146_v18 = vld [vmem:[%s10968_s14 + $0xe0] sm:$0xff]   ;;  %v8150_v25 = vld [vmem:[%s10968_s14 + $0xe8] sm:$0xff]   ;;  %1622 = vst [vmem:[%s9851_s17] sm:$0x3] %v9647_v6 }
 0x2c5   :  { %7076 = vmatprep.subr.bf16.mxu0 %v8136_v8  ;;  %v8143_v15 = vld [vmem:[%s10968_s14 + $0x98] sm:$0xff]   ;;  %v8147_v19 = vld [vmem:[%s10968_s14 + $0xa0] sm:$0xff]   ;;  %v8151_v26 = vld [vmem:[%s10968_s14 + $0xa8] sm:$0xff]  }
 0x2c6   :  { %7097 = vmatpush3.bf16.msra.mxu1 %v8135_v7  ;;  %v8152_v27 = vld [vmem:[%s10968_s14 + $0x70] sm:$0xff]   ;;  %v8156_v33 = vld [vmem:[%s10968_s14 + $0x78] sm:$0xff]   ;;  %v546_v37 = vld [vmem:[%s10969_s18] sm:$0xff] }
 0x2c7   :  { %7098 = vmatprep.subr.bf16.mxu1 %v8138_v10  ;;  %v8153_v30 = vld [vmem:[%s10968_s14 + $0x30] sm:$0xff]   ;;  %v8157_v35 = vld [vmem:[%s10968_s14 + $0x38] sm:$0xff]   ;;  %v557_v38 = vrot.slane %v546_v37, %v556_v34  ;;  %v550_v40 = vcombine.high %v546_v37, %v546_v37  ;;  %v8160_v41 = vld [vmem:[%s10968_s14 + $0x140] sm:$0xff]  }
 0x2c8   :  { %7077 = vmatpush3.bf16.msra.mxu0 %v8137_v9  ;;  %v8154_v31 = vld [vmem:[%s10968_s14 + $0xf0] sm:$0xff]   ;;  %v8158_v36 = vld [vmem:[%s10968_s14 + $0xf8] sm:$0xff]   ;;  %v8162_v47 = vld [vmem:[%s10968_s14 + $0x100] sm:$0xff]  }
 0x2c9   :  { %7078 = vmatprep.subr.bf16.mxu0 %v8140_v12  ;;  %v8155_v32 = vld [vmem:[%s10968_s14 + $0xb0] sm:$0xff]   ;;  %v8159_v39 = vld [vmem:[%s10968_s14 + $0xb8] sm:$0xff]   ;;  %v565_v42 = vcombine.high %v557_v38, %v557_v38  ;;  %v564_v43 = vrot.slane %v550_v40, %v556_v34  ;;  %v581_v44 = vpack.c.bf16 %v557_v38, %v557_v38  ;;  %v8163_v49 = vld [vmem:[%s10968_s14 + $0x148] sm:$0xff]  }
 0x2ca   :  { %7099 = vmatpush3.bf16.msra.mxu1 %v8139_v11  ;;  %v8164_v51 = vld [vmem:[%s10968_s14 + $0x108] sm:$0xff]   ;;  %v8165_v52 = vld [vmem:[%s10968_s14 + $0x150] sm:$0xff]   ;;  %v8167_v54 = vld [vmem:[%s10968_s14 + $0x158] sm:$0xff]  }
 0x2cb   :  { %7100 = vmatprep.subr.bf16.mxu1 %v8142_v14  ;;  %v582_v45 = vpack.c.bf16 %v565_v42, %v565_v42  ;;  %v566_v46 = vcombine.high %v564_v43, %v564_v43  ;;  %v583_v48 = vpack.c.bf16 %v564_v43, %v564_v43  ;;  %v8166_v53 = vld [vmem:[%s10968_s14 + $0x110] sm:$0xff]   ;;  %v8168_v55 = vld [vmem:[%s10968_s14 + $0x118] sm:$0xff]   ;;  %v8169_v56 = vld [vmem:[%s10968_s14 + $0x160] sm:$0xff]  }
 0x2cc   :  { %7079 = vmatpush3.bf16.msra.mxu0 %v8141_v13  ;;  %v6553_v57 = vld.sshfl [vmem:[%s10969_s18 + $0x8] sm:$0x33 pattern:$0x76325410]  ;;  %v8170_v59 = vld [vmem:[%s10968_s14 + $0x120] sm:$0xff]   ;;  %v8173_v63 = vld [vmem:[%s10968_s14 + $0x170] sm:$0xff]  }
 0x2cd   :  { %7080 = vmatprep.subr.bf16.mxu0 %v8144_v16  ;;  %1010 = vmatprep.mubr.bf16.mxu0 %v582_v45  ;;  %v584_v50 = vpack.c.bf16 %v566_v46, %v566_v46  ;;  %v574_v58 = vcombine.high %v6553_v57, %v6553_v57  ;;  %v8171_v60 = vld [vmem:[%s10968_s14 + $0x168] sm:$0xff]   ;;  %v8174_v0 = vld [vmem:[%s10968_s14 + $0x130] sm:$0xff]   ;;  %v8175_v1 = vld [vmem:[%s10968_s14 + $0x178] sm:$0xff]   ;;  %v585_v3 = vpack.c.bf16 %v6553_v57, %v6553_v57  ;;  %v9649_v46 = vmov 1966171168  }
 0x2ce   :  { %7101 = vmatpush3.bf16.msra.mxu1 %v8143_v15  ;;  %v8172_v62 = vld [vmem:[%s10968_s14 + $0x128] sm:$0xff]   ;;  %v8176_v2 = vld [vmem:[%s10968_s14 + $0x138] sm:$0xff]   ;;  %v8177_v4 = vld [vmem:[%s10970_s25] sm:$0xff]   ;;  %v10122_v57 = vsub.s32 0, %v10064_v29 }
 0x2cf   :  { %7102 = vmatprep.subr.bf16.mxu1 %v8146_v18  ;;  %1050 = vmatprep.mubr.bf16.mxu1 %v584_v50  ;;  %v586_v61 = vpack.c.bf16 %v574_v58, %v574_v58  ;;  %v8178_v5 = vld [vmem:[%s10970_s25 + $0x8] sm:$0xff]   ;;  %v8179_v7 = vld [vmem:[%s10970_s25 + $0x10] sm:$0xff]   ;;  %v8180_v8 = vld [vmem:[%s10970_s25 + $0x18] sm:$0xff]  }
 0x2d0   :  { %7081 = vmatpush3.bf16.msra.mxu0 %v8145_v17  ;;  %v6554_v10 = vld [vmem:[#allocation5] ss:$0 sm:$0xff]  ;;  %v1184_v22 = vld [vmem:[%s10971_s16 + $0x8] sm:$0xff]  ;;  %v8183_v43 = vld [vmem:[#allocation10] sm:$0xff]  }
 0x2d1   :  { %7082 = vmatprep.subr.bf16.mxu0 %v8148_v20  ;;  %v8182_v40 = vld [vmem:[#allocation8 + $0x8] sm:$0xff]  }
 0x2d2   :  { %7103 = vmatpush3.bf16.msra.mxu1 %v8147_v19 }
 0x2d3   :  { %7104 = vmatprep.subr.bf16.mxu1 %v8150_v25 }
 0x2d4   :  { %7083 = vmatpush3.bf16.msra.mxu0 %v8149_v24  ;;  %v1187_v24 = vpack.c.bf16 %v1184_v22, %v1184_v22 }
 0x2d5   :  { %7084 = vmatprep.subr.bf16.mxu0 %v8152_v27 }
 0x2d6   :  { %7105 = vmatpush3.bf16.msra.mxu1 %v8151_v26  ;;  %v1183_v26 = vld [vmem:[%s10971_s16] sm:$0xff] }
 0x2d7   :  { %7106 = vmatprep.subr.bf16.mxu1 %v8154_v31  ;;  %v1256_v45 = vpack.c.bf16 %v1184_v22, %v1183_v26 }
 0x2d8   :  { %7085 = vmatpush3.bf16.msra.mxu0 %v8153_v30 }
 0x2d9   :  { %7086 = vmatprep.subr.bf16.mxu0 %v8156_v33  ;;  %v1195_v33 = vunpack.c.l.b16 %v1187_v24 }
 0x2da   :  { %7107 = vmatpush3.bf16.msra.mxu1 %v8155_v32  ;;  %v1186_v32 = vpack.c.bf16 %v1183_v26, %v1183_v26 }
 0x2db   :  { %7108 = vmatprep.subr.bf16.mxu1 %v8158_v36  ;;  %v8181_v36 = vld [vmem:[#allocation8] sm:$0xff]   ;;  %v1196_v38 = vrot.slane %v1195_v33, 7 }
 0x2dc   :  { %7087 = vmatpush3.bf16.msra.mxu0 %v8157_v35  ;;  %v1194_v37 = vunpack.c.l.b16 %v1186_v32 }
 0x2dd   :  { %7116 = vmatprep.subr.bf16.mxu0 %v8160_v41 }
 0x2de   :  { %7109 = vmatpush3.bf16.msra.mxu1 %v8159_v39  ;;  %v1198_v41 = vsel %vm1197_vm2, %v1196_v38, %v1194_v37  ;;  %v8188_v37 = vld [vmem:[#allocation13 + $0x8] sm:$0xff]  }
 0x2df   :  { %1011 = vmatmul.mubr.bf16.vlgmr.msra.gmra.mrb[0].mxu0 %v581_v44  ;;  %7428 = vmatprep.subr.bf16.mxu1 %v9647_v6  ;;  %v1199_v42 = vpack.c.b16 %v1198_v41, %v1198_v41  ;;  %v8184_v44 = vld [vmem:[#allocation10 + $0x8] sm:$0xff]  }
 0x2e0   :  { %7117 = vmatpush3.bf16.msra.mxu0 %v8162_v47  ;;  %1090 = vmatprep.mubr.bf16.mxu0 %v586_v61  ;;  %v1376_v47 = vunpack.c.l.s4 %v9649_v46 }
 0x2e1   :  { %1051 = vmatmul.mubr.bf16.vlgmr.msra.gmra.mrb[0].mxu1 %v583_v48  ;;  %7118 = vmatprep.subr.bf16.mxu0 %v8163_v49 }
 0x2e2   :  { %7429 = vmatpush3.bf16.msra.mxu1 %v8177_v4  ;;  %7436 = vmatprep.mubr.msk.bf16.mxu1 %vm9648_vm0, %v9647_v6  ;;  %v1377_v48 = vunpack.c.0.s8 %v1376_v47 }
 0x2e3   :  { %7430 = vmatprep.subr.bf16.mxu1 %v9647_v6 }
 0x2e4   :  { %7119 = vmatpush3.bf16.msra.mxu0 %v8164_v51  ;;  %v1380_v49 = vsub.s32 %v1377_v48, %v10064_v29 }
 0x2e5   :  { %7120 = vmatprep.subr.bf16.mxu0 %v8165_v52 }
 0x2e6   :  { %7431 = vmatpush3.bf16.msra.mxu1 %v8178_v5  ;;  %v1422_v5 = vand.u32 127, %v554_v23  ;;  %v8186_v23 = vld [vmem:[#allocation11 + $0x8] sm:$0xff]  }
 0x2e7   :  { %7432 = vmatprep.subr.bf16.mxu1 %v9647_v6 }
 0x2e8   :  { %7121 = vmatpush3.bf16.msra.mxu0 %v8166_v53 }
 0x2e9   :  { %7122 = vmatprep.subr.bf16.mxu0 %v8167_v54 }
 0x2ea   :  { %7433 = vmatpush3.bf16.msra.mxu1 %v8179_v7 }
 0x2eb   :  { %7434 = vmatprep.subr.bf16.mxu1 %v9647_v6 }
 0x2ec   :  { %7123 = vmatpush3.bf16.msra.mxu0 %v8168_v55 }
 0x2ed   :  { %7124 = vmatprep.subr.bf16.mxu0 %v8169_v56 }
 0x2ee   :  { %7435 = vmatpush3.bf16.msra.mxu1 %v8180_v8  ;;  %v1425_v8 = vsub.s32 %v1422_v5, %v10064_v29 }
 0x2ef   :  { %7440 = vmatprep.subr.bf16.mxu1 %v9647_v6 }
 0x2f0   :  { %7125 = vmatpush3.bf16.msra.mxu0 %v8170_v59 }
 0x2f1   :  { %7126 = vmatprep.subr.bf16.mxu0 %v8171_v60 }
 0x2f4   :  { %7127 = vmatpush3.bf16.msra.mxu0 %v8172_v62 }
 0x2f5   :  { %7128 = vmatprep.subr.bf16.mxu0 %v8173_v63 }
 0x2f8   :  { %7129 = vmatpush3.bf16.msra.mxu0 %v8174_v0 }
 0x2f9   :  { %7130 = vmatprep.subr.bf16.mxu0 %v8175_v1 }
 0x2fc   :  { %7131 = vmatpush3.bf16.msra.mxu0 %v8176_v2 }
 0x2ff   :  { %1091 = vmatmul.mubr.bf16.vlgmr.msra.gmra.mrb[4].mxu0 %v585_v3 }
 0x3b2   :  { %v7088_v9 = vpop.f32.mrb[0].mxu0 }
 0x3b3   :  { %v7089_v11 = vpop.f32.mrb[1].mxu0 }
 0x3b4   :  { %v7090_v12 = vadd.f32 %v7089_v11, %v7088_v9  ;;  %v7091_v13 = vpop.f32.mrb[2].mxu0  ;;  %v7110_v14 = vpop.f32.mrb[0].mxu1  ;;  %v1185_v11 = vld [vmem:[%s10972_s13] sm:$0x3] }
 0x3b5   :  { %v7092_v15 = vpop.f32.mrb[3].mxu0  ;;  %v7111_v16 = vpop.f32.mrb[1].mxu1  ;;  %vm1418_vm4 = vcmp.gt.f32.partialorder %v1185_v11, 0.0  ;;  %v9650_v11 = vmov 0  }
 0x3b6   :  { %v1013_v17 = vadd.f32 %v7090_v12, %v6554_v10  ;;  %v7112_v18 = vadd.f32 %v7111_v16, %v7110_v14  ;;  %v7113_v19 = vpop.f32.mrb[2].mxu1  ;;  %1688 = vmatprep.mubr.bf16.mxu0 %v9650_v11  ;;  %v8242_v11 = vld [vmem:[#allocation20 + $0x640] ss:$100 sps:$4 sm:$0xff]  }
 0x3b7   :  { %v7114_v20 = vpop.f32.mrb[3].mxu1 }
 0x3b8   :  { %v1053_v21 = vadd.f32 %v7112_v18, %v1013_v17  ;;  %v8185_v18 = vld [vmem:[#allocation11] sm:$0xff]  }
 0x3d2   :  { %v7132_v25 = vpop.f32.mrb[4].mxu0 }
 0x3d3   :  { %v7133_v27 = vpop.f32.mrb[5].mxu0 }
 0x3d4   :  { %v7134_v28 = vadd.f32 %v7133_v27, %v7132_v25  ;;  %v7135_v30 = vpop.f32.mrb[6].mxu0 }
 0x3d5   :  { %v7136_v31 = vpop.f32.mrb[7].mxu0 }
 0x3d6   :  { %v1093_v34 = vadd.f32 %v7134_v28, %v1053_v21  ;;  %v10140_v31 = vsub.s32 1, %v10064_v29 }
 0x3d8   :  { %v1098_v35 = vmax.f32 %v1093_v34, 0.0 }
 0x3da   :  { %v1099_v39 = vpack.c.bf16 %v1098_v35, %v1098_v35 }
 0x3dc   :  { %7437 = vmatmul.mubr.msk.bf16.vlgmr.msra.gmra.mrb[4].mxu1 %vm1139_vm1, %v1099_v39 }
 0x3dd   :  { %7441 = vmatpush3.bf16.msra.mxu1 %v8181_v36  ;;  %7444 = vmatprep.mubr.msk.bf16.mxu1 %vm9648_vm0, %v9647_v6  ;;  %v8187_v36 = vld [vmem:[#allocation13] sm:$0xff]  }
 0x3de   :  { %7442 = vmatprep.subr.bf16.mxu1 %v9647_v6 }
 0x3e1   :  { %7443 = vmatpush3.bf16.msra.mxu1 %v8182_v40 }
 0x3e2   :  { %7448 = vmatprep.subr.bf16.mxu1 %v9647_v6 }
 0x3e4   :  { %7445 = vmatmul.mubr.msk.bf16.vlgmr.msra.gmra.mrb[8].mxu1 %vm1212_vm3, %v1199_v42 }
 0x3e5   :  { %7449 = vmatpush3.bf16.msra.mxu1 %v8183_v43  ;;  %7452 = vmatprep.mubr.msk.bf16.mxu1 %vm9648_vm0, %v9647_v6 }
 0x3e6   :  { %7450 = vmatprep.subr.bf16.mxu1 %v9647_v6 }
 0x3e9   :  { %7451 = vmatpush3.bf16.msra.mxu1 %v8184_v44 }
 0x3ea   :  { %7456 = vmatprep.subr.bf16.mxu1 %v9647_v6 }
 0x3ec   :  { %7453 = vmatmul.mubr.msk.bf16.vlgmr.msra.gmra.mrb[12].mxu1 %vm1212_vm3, %v1256_v45 }
 0x3ed   :  { %7460 = vmatprep.mubr.msk.bf16.mxu1 %vm9648_vm0, %v9647_v6  ;;  %7457 = vmatpush3.bf16.msra.mxu1 %v8185_v18  ;;  %v8209_v18 = vld [vmem:[#allocation20 + $0x198] ss:$100 sps:$4 sm:$0xff]  }
 0x3ee   :  { %7458 = vmatprep.subr.bf16.mxu1 %v9647_v6 }
 0x3f1   :  { %7459 = vmatpush3.bf16.msra.mxu1 %v8186_v23  ;;  %v8217_v23 = vld [vmem:[#allocation20 + $0x264] ss:$100 sps:$4 sm:$0xff]  }
 0x3f2   :  { %7464 = vmatprep.subr.bf16.mxu1 %v9647_v6 }
 0x3f4   :  { %7461 = vmatmul.mubr.msk.bf16.vlgmr.msra.gmra.mrb[16].mxu1 %vm1212_vm3, %v1256_v45 }
 0x3f5   :  { %7468 = vmatprep.mubr.msk.bf16.mxu1 %vm9648_vm0, %v9647_v6  ;;  %7465 = vmatpush3.bf16.msra.mxu1 %v8187_v36  ;;  %v8257_v36 = vld [vmem:[#allocation20 + $0x7d8] ss:$100 sps:$4 sm:$0xff]  }
 0x3f6   :  { %7466 = vmatprep.subr.bf16.mxu1 %v9647_v6 }
 0x3f9   :  { %7467 = vmatpush3.bf16.msra.mxu1 %v8188_v37  ;;  %v8265_v37 = vld [vmem:[#allocation20 + $0x8a4] ss:$100 sps:$4 sm:$0xff]  }
 0x3fa   :  { %7472 = vmatprep.subr.bf16.mxu1 %v9647_v6 }
 0x4b7   :  { %v1250_v50 = vpop.f32.mrb[8].mxu1 }
 0x4b8   :  { %v1381_v51 = vrot.slane %v1250_v50, %v1380_v49  ;;  %v7446_v52 = vpop.f32.mrb[9].mxu1 }
 0x4b9   :  { %v1253_v53 = vpop.f32.mrb[10].mxu1 }
 0x4ba   :  { %v1382_v54 = vcombine.high %v1381_v51, %v1381_v51  ;;  %v1389_v55 = vrot.slane %v1381_v51, %v1380_v49  ;;  %v7447_v56 = vpop.f32.mrb[11].mxu1 }
 0x4bc   :  { %v1396_v58 = vrot.slane %v1382_v54, %v1380_v49  ;;  %v1400_v59 = vrot.slane %v1389_v55, %v10122_v57 }
 0x4be   :  { %v1404_v63 = vrot.slane %v1396_v58, %v10122_v57 }
 0x4bf   :  { %v1310_v60 = vpop.f32.mrb[12].mxu1 }
 0x4c0   :  { %v1407_v61 = vmul.f32 %v1400_v59, %v1310_v60  ;;  %v7454_v62 = vpop.f32.mrb[13].mxu1 }
 0x4c1   :  { %v1313_v0 = vpop.f32.mrb[14].mxu1  ;;  %v8189_v62 = vld [vmem:[%s10973_s12] sm:$0xff]  }
 0x4c2   :  { %v1408_v1 = vmul.f32 %v1404_v63, %v1313_v0  ;;  %v7455_v2 = vpop.f32.mrb[15].mxu1  ;;  %v1409_v3 = vsel %vm1212_vm3, %v1407_v61, 0.0  ;;  %v8190_v0 = vld [vmem:[%s10973_s12 + $0x8] sm:$0xff]  }
 0x4c3   :  { %1410 = vadd.xlane.f32.xlu0 %v1409_v3 }
 0x4c4   :  { %v1412_v4 = vsel %vm1212_vm3, %v1408_v1, 0.0  ;;  %v6618_v1 = vld [vmem:[#allocation14] ss:$0 sm:$0xff] }
 0x4c7   :  { %1413 = vadd.xlane.f32.xlu0 %v1412_v4  ;;  %v1367_v25 = vpop.f32.mrb[16].mxu1 }
 0x4c8   :  { %v7462_v26 = vpop.f32.mrb[17].mxu1 }
 0x4c9   :  { %v1370_v27 = vpop.f32.mrb[18].mxu1  ;;  %v8233_v26 = vld [vmem:[#allocation20 + $0x4b8] ss:$100 sps:$4 sm:$0xff]  }
 0x4ca   :  { %v7463_v28 = vpop.f32.mrb[19].mxu1 }
 0x4cb   :  { %v8239_v28 = vld [vmem:[#allocation20 + $0x580] ss:$100 sps:$4 sm:$0xff]  }
 0x550   :  { %v1411_v7 = vpop.xlane.xlu0 %1410 }
 0x551   :  { %v1416_v9 = vmul.f32 0.17677669, %v1411_v7 }
 0x553   :  { %v1426_v13 = vrot.slane %v1416_v9, %v1425_v8  ;;  %v8193_v9 = vld [vmem:[#allocation17 + $0x4] ss:$8 sps:$4 sm:$0xff]  }
 0x554   :  { %v1414_v10 = vpop.xlane.xlu0 %1413  ;;  %1656 = vmatprep.subr.bf16.mxu0 %v8193_v9  ;;  %v8236_v9 = vld [vmem:[#allocation20 + $0x578] ss:$100 sps:$4 sm:$0xff]  }
 0x555   :  { %v1417_v12 = vmul.f32 0.17677669, %v1414_v10  ;;  %v8191_v10 = vld [vmem:[#allocation17] ss:$8 sps:$4 sm:$0xff]  }
 0x556   :  { %1657 = vmatpush1.bf16.msra.mxu0 %v8191_v10  ;;  %v8244_v10 = vld [vmem:[#allocation20 + $0x644] ss:$100 sps:$4 sm:$0xff]  }
 0x557   :  { %v1430_v14 = vrot.slane %v1417_v12, %v1425_v8  ;;  %v8196_v12 = vld [vmem:[#allocation20 + $0x4] ss:$100 sps:$4 sm:$0xff]  }
 0x558   :  { %4266 = vmatprep.subr.bf16.mxu0 %v8196_v12  ;;  %v8250_v12 = vld [vmem:[#allocation20 + $0x70c] ss:$100 sps:$4 sm:$0xff]  }
 0x559   :  { %v1431_v15 = vsel %vm1197_vm2, %v1430_v14, %v1426_v13  ;;  %v8197_v13 = vld [vmem:[#allocation20 + $0x8] ss:$100 sps:$4 sm:$0xff]  }
 0x55a   :  { %v1433_v16 = vsel %vm1418_vm4, %v1431_v15, -1e+09  ;;  %v8199_v14 = vld [vmem:[#allocation20 + $0xc] ss:$100 sps:$4 sm:$0xff]   ;;  %v8205_v15 = vld [vmem:[#allocation20 + $0xd4] ss:$100 sps:$4 sm:$0xff]  }
 0x55b   :  { %v1435_v17 = vsel %vm1434_vm5, %v1433_v16, -inf }
 0x55c   :  { %1436 = vmax.xlane.f32.xlu1 %v1435_v17  ;;  %v8211_v17 = vld [vmem:[#allocation20 + $0x19c] ss:$100 sps:$4 sm:$0xff]  }
 0x5e9   :  { %v1437_v19 = vpop.xlane.xlu1 %1436 }
 0x5ea   :  { %v1438_v20 = vsub.f32 %v1433_v16, %v1437_v19  ;;  %v8203_v16 = vld [vmem:[#allocation20 + $0xd0] ss:$100 sps:$4 sm:$0xff]   ;;  %v8215_v19 = vld [vmem:[#allocation20 + $0x260] ss:$100 sps:$4 sm:$0xff]  }
 0x5ec   :  { %v1439_v21 = vmul.f32 1.442695, %v1438_v20  ;;  %v8223_v20 = vld [vmem:[#allocation20 + $0x32c] ss:$100 sps:$4 sm:$0xff]  }
 0x5ee   :  { %8811 = vpow2.f32 %v1439_v21  ;;  %v8221_v21 = vld [vmem:[#allocation20 + $0x328] ss:$100 sps:$4 sm:$0xff]  }
 0x5f8   :  { %v8812_v22 = vpop.eup %8811 }
 0x5f9   :  { %v1441_v24 = vsel %vm1434_vm5, %v8812_v22, 0.0 }
 0x5fa   :  { %1442 = vadd.xlane.f32.xlu1 %v1441_v24  ;;  %v8227_v24 = vld [vmem:[#allocation20 + $0x3f0] ss:$100 sps:$4 sm:$0xff]  }
 0x687   :  { %v1443_v30 = vpop.xlane.xlu1 %1442 }
 0x688   :  { %8813 = vrcp.f32 %v1443_v30  ;;  %v8247_v30 = vld [vmem:[#allocation20 + $0x64c] ss:$100 sps:$4 sm:$0xff]  }
 0x692   :  { %v8814_v32 = vpop.eup %8813 }
 0x693   :  { %v1445_v33 = vmul.f32 %v8814_v32, %v8812_v22  ;;  %v8229_v22 = vld [vmem:[#allocation20 + $0x3f4] ss:$100 sps:$4 sm:$0xff]   ;;  %v8245_v32 = vld [vmem:[#allocation20 + $0x648] ss:$100 sps:$4 sm:$0xff]  }
 0x695   :  { %v1456_v34 = vrot.slane %v1445_v33, %v10140_v31  ;;  %v1449_v35 = vrot.slane %v1445_v33, %v10122_v57  ;;  %v8253_v33 = vld [vmem:[#allocation20 + $0x714] ss:$100 sps:$4 sm:$0xff]  }
 0x697   :  { %1458 = vbcast.lane.b32.xlu1 %v1456_v34, 256  ;;  %1451 = vbcast.lane.b32.xlu0 %v1449_v35, 256  ;;  %v8251_v34 = vld [vmem:[#allocation20 + $0x710] ss:$100 sps:$4 sm:$0xff]   ;;  %v8259_v35 = vld [vmem:[#allocation20 + $0x7dc] ss:$100 sps:$4 sm:$0xff]  }
 0x709   :  { %v1459_v38 = vpop.permute.xlu1 %1458  ;;  %v1452_v39 = vpop.permute.xlu0 %1451 }
 0x70a   :  { %v1461_v40 = vmul.f32 %v1459_v38, %v1370_v27  ;;  %v1460_v41 = vmul.f32 %v1452_v39, %v1367_v25  ;;  %v8235_v25 = vld [vmem:[#allocation20 + $0x4bc] ss:$100 sps:$4 sm:$0xff]   ;;  %v8241_v27 = vld [vmem:[#allocation20 + $0x584] ss:$100 sps:$4 sm:$0xff]   ;;  %v8271_v39 = vld [vmem:[#allocation20 + $0x96c] ss:$100 sps:$4 sm:$0xff]  }
 0x70b   :  { %v8263_v38 = vld [vmem:[#allocation20 + $0x8a0] ss:$100 sps:$4 sm:$0xff]  }
 0x70c   :  { %v1469_v42 = vsel %vm1212_vm3, %v1461_v40, 0.0  ;;  %v1462_v43 = vsel %vm1212_vm3, %v1460_v41, 0.0  ;;  %v8269_v40 = vld [vmem:[#allocation20 + $0x968] ss:$100 sps:$4 sm:$0xff]   ;;  %v8277_v41 = vld [vmem:[#allocation20 + $0xa34] ss:$100 sps:$4 sm:$0xff]  }
 0x70d   :  { %v1470_v44 = vrot.slane %v1469_v42, 4  ;;  %v1463_v45 = vrot.slane %v1462_v43, 4 }
 0x70f   :  { %v1471_v46 = vadd.f32 %v1470_v44, %v1469_v42  ;;  %v1464_v47 = vadd.f32 %v1463_v45, %v1462_v43  ;;  %v8275_v42 = vld [vmem:[#allocation20 + $0xa30] ss:$100 sps:$4 sm:$0xff]   ;;  %v6603_v43 = vld [vmem:[#allocation7] ss:$0 sm:$0xff]  ;;  %v6622_v44 = vld [vmem:[#allocation16] ss:$0 sm:$0xff] }
 0x710   :  { %v8038_v45 = vadd.f32 %v6622_v44, %v6603_v43 }
 0x711   :  { %v1472_v48 = vrot.slane %v1471_v46, 2  ;;  %v1465_v49 = vrot.slane %v1464_v47, 2 }
 0x713   :  { %v1473_v50 = vadd.f32 %v1472_v48, %v1471_v46  ;;  %v1466_v51 = vadd.f32 %v1465_v49, %v1464_v47  ;;  %v1619_v46 = vld [vmem:[#allocation2] sm:$0x3] }
 0x714   :  { %v1620_v49 = vmul.f32 0.70710677, %v1619_v46  ;;  %v8290_v46 = vld [vmem:[#allocation20 + $0x10] ss:$100 sps:$4 sm:$0xff]  }
 0x715   :  { %v1474_v52 = vrot.slane %v1473_v50, 1  ;;  %v1467_v53 = vrot.slane %v1466_v51, 1 }
 0x717   :  { %v1475_v54 = vadd.f32 %v1474_v52, %v1473_v50  ;;  %v1468_v55 = vadd.f32 %v1467_v53, %v1466_v51 }
 0x719   :  { %v1477_v56 = vpack.c.bf16 %v1475_v54, %v1475_v54  ;;  %v1476_v58 = vpack.c.bf16 %v1468_v55, %v1468_v55  ;;  %v9651_v55 = vmov -0.6931472  }
 0x71b   :  { %v1492_v59 = vunpack.c.l.b16 %v1477_v56  ;;  %v1491_v60 = vunpack.c.l.b16 %v1476_v58  ;;  %v8194_v56 = vld [vmem:[#allocation20] ss:$100 sps:$4 sm:$0xff]  }
 0x71d   :  { %v1493_v61 = vsel %vm1197_vm2, %v1492_v59, %v1491_v60  ;;  %v8202_v59 = vld [vmem:[#allocation20 + $0xcc] ss:$100 sps:$4 sm:$0xff]  }
 0x71e   :  { %v1494_v63 = vpack.c.b16 %v1493_v61, %v1493_v61  ;;  %v8200_v60 = vld [vmem:[#allocation20 + $0xc8] ss:$100 sps:$4 sm:$0xff]   ;;  %v8208_v61 = vld [vmem:[#allocation20 + $0x194] ss:$100 sps:$4 sm:$0xff]  }
 0x720   :  { %7469 = vmatmul.mubr.msk.bf16.vlgmr.msra.gmra.mrb[20].mxu1 %vm1212_vm3, %v1494_v63  ;;  %v8214_v63 = vld [vmem:[#allocation20 + $0x25c] ss:$100 sps:$4 sm:$0xff]  }
 0x721   :  { %7473 = vmatpush3.bf16.msra.mxu1 %v8189_v62  ;;  %7476 = vmatprep.mubr.msk.bf16.mxu1 %vm9648_vm0, %v9647_v6  ;;  %v8206_v62 = vld [vmem:[#allocation20 + $0x190] ss:$100 sps:$4 sm:$0xff]  }
 0x722   :  { %7474 = vmatprep.subr.bf16.mxu1 %v9647_v6 }
 0x725   :  { %7475 = vmatpush3.bf16.msra.mxu1 %v8190_v0  ;;  %v8212_v0 = vld [vmem:[#allocation20 + $0x258] ss:$100 sps:$4 sm:$0xff]  }
 0x726   :  { %4307 = vmatprep.subr.bf16.mxu1 %v8199_v14  ;;  %v8256_v14 = vld [vmem:[#allocation20 + $0x7d4] ss:$100 sps:$4 sm:$0xff]  }
 0x7f3   :  { %v1544_v2 = vpop.f32.mrb[20].mxu1 }
 0x7f4   :  { %v1545_v3 = vadd.f32 %v6618_v1, %v1544_v2  ;;  %v7470_v4 = vpop.f32.mrb[21].mxu1  ;;  %v8220_v1 = vld [vmem:[#allocation20 + $0x324] ss:$100 sps:$4 sm:$0xff]  }
 0x7f5   :  { %v1547_v5 = vpop.f32.mrb[22].mxu1  ;;  %v8218_v2 = vld [vmem:[#allocation20 + $0x320] ss:$100 sps:$4 sm:$0xff]   ;;  %v8224_v4 = vld [vmem:[#allocation20 + $0x3e8] ss:$100 sps:$4 sm:$0xff]  }
 0x7f6   :  { %v1550_v7 = vpack.c.bf16 %v1545_v3, %v1545_v3  ;;  %v7471_v8 = vpop.f32.mrb[23].mxu1  ;;  %v8226_v3 = vld [vmem:[#allocation20 + $0x3ec] ss:$100 sps:$4 sm:$0xff]   ;;  %v8232_v5 = vld [vmem:[#allocation20 + $0x4b4] ss:$100 sps:$4 sm:$0xff]  }
 0x7f7   :  { %v8238_v8 = vld [vmem:[#allocation20 + $0x57c] ss:$100 sps:$4 sm:$0xff]  }
 0x7f8   :  { %7477 = vmatmul.mubr.msk.bf16.vlgmr.msra.gmra.mrb[4].mxu1 %vm1212_vm3, %v1550_v7  ;;  %v8230_v7 = vld [vmem:[#allocation20 + $0x4b0] ss:$100 sps:$4 sm:$0xff]  }
 0x7f9   :  { %4308 = vmatpush1.bf16.msra.mxu1 %v8197_v13  ;;  %v8248_v13 = vld [vmem:[#allocation20 + $0x708] ss:$100 sps:$4 sm:$0xff]  }
 0x7fa   :  { %4309 = vmatprep.subr.bf16.mxu1 %v8205_v15  ;;  %v8254_v15 = vld [vmem:[#allocation20 + $0x7d0] ss:$100 sps:$4 sm:$0xff]  }
 0x7fd   :  { %4310 = vmatpush1.bf16.msra.mxu1 %v8203_v16  ;;  %v8262_v16 = vld [vmem:[#allocation20 + $0x89c] ss:$100 sps:$4 sm:$0xff]  }
 0x7fe   :  { %4311 = vmatprep.subr.bf16.mxu1 %v8211_v17  ;;  %v8260_v17 = vld [vmem:[#allocation20 + $0x898] ss:$100 sps:$4 sm:$0xff]  }
 0x801   :  { %4312 = vmatpush1.bf16.msra.mxu1 %v8209_v18  ;;  %v8268_v18 = vld [vmem:[#allocation20 + $0x964] ss:$100 sps:$4 sm:$0xff]  }
 0x802   :  { %4313 = vmatprep.subr.bf16.mxu1 %v8217_v23  ;;  %v8266_v23 = vld [vmem:[#allocation20 + $0x960] ss:$100 sps:$4 sm:$0xff]  }
 0x805   :  { %4314 = vmatpush1.bf16.msra.mxu1 %v8215_v19  ;;  %v8274_v19 = vld [vmem:[#allocation20 + $0xa2c] ss:$100 sps:$4 sm:$0xff]  }
 0x806   :  { %4315 = vmatprep.subr.bf16.mxu1 %v8223_v20  ;;  %v8272_v20 = vld [vmem:[#allocation20 + $0xa28] ss:$100 sps:$4 sm:$0xff]  }
 0x809   :  { %4316 = vmatpush1.bf16.msra.mxu1 %v8221_v21  ;;  %v8280_v21 = vld [vmem:[#allocation20 + $0xaf4] ss:$100 sps:$4 sm:$0xff]  }
 0x80a   :  { %4317 = vmatprep.subr.bf16.mxu1 %v8229_v22  ;;  %v8283_v22 = vld [vmem:[#allocation20 + $0xafc] ss:$100 sps:$4 sm:$0xff]  }
 0x80d   :  { %4318 = vmatpush1.bf16.msra.mxu1 %v8227_v24  ;;  %v8278_v24 = vld [vmem:[#allocation20 + $0xaf0] ss:$100 sps:$4 sm:$0xff]  }
 0x80e   :  { %4319 = vmatprep.subr.bf16.mxu1 %v8235_v25  ;;  %v8281_v25 = vld [vmem:[#allocation20 + $0xaf8] ss:$100 sps:$4 sm:$0xff]  }
 0x811   :  { %4320 = vmatpush1.bf16.msra.mxu1 %v8233_v26  ;;  %v8286_v26 = vld [vmem:[#allocation20 + $0xbbc] ss:$100 sps:$4 sm:$0xff]  }
 0x812   :  { %4321 = vmatprep.subr.bf16.mxu1 %v8241_v27  ;;  %v8289_v27 = vld [vmem:[#allocation20 + $0xbc4] ss:$100 sps:$4 sm:$0xff]  }
 0x815   :  { %4322 = vmatpush1.bf16.msra.mxu1 %v8239_v28  ;;  %v8284_v28 = vld [vmem:[#allocation20 + $0xbb8] ss:$100 sps:$4 sm:$0xff]  }
 0x816   :  { %4323 = vmatprep.subr.bf16.mxu1 %v8247_v30  ;;  %v8287_v30 = vld [vmem:[#allocation20 + $0xbc0] ss:$100 sps:$4 sm:$0xff]  }
 0x819   :  { %4324 = vmatpush1.bf16.msra.mxu1 %v8245_v32  ;;  %v8292_v32 = vld [vmem:[#allocation20 + $0x14] ss:$100 sps:$4 sm:$0xff]  }
 0x81a   :  { %4325 = vmatprep.subr.bf16.mxu1 %v8253_v33  ;;  %v8295_v33 = vld [vmem:[#allocation20 + $0x1c] ss:$100 sps:$4 sm:$0xff]  }
 0x81d   :  { %4326 = vmatpush1.bf16.msra.mxu1 %v8251_v34  ;;  %v1630_v34 = vld [vmem:[#allocation19] sm:$0x3] }
 0x81e   :  { %4327 = vmatprep.subr.bf16.mxu1 %v8259_v35  ;;  %v1635_v35 = vrot.slane %v1630_v34, %v10122_v57 }
 0x821   :  { %4328 = vmatpush1.bf16.msra.mxu1 %v8257_v36  ;;  %v1639_v36 = vrot.slane %v1630_v34, %v10140_v31  ;;  %v8364_v34 = vld [vmem:[#allocation20 + $0x974] ss:$100 sps:$4 sm:$0xff]  }
 0x822   :  { %4329 = vmatprep.subr.bf16.mxu1 %v8265_v37 }
 0x825   :  { %4330 = vmatpush1.bf16.msra.mxu1 %v8263_v38 }
 0x826   :  { %4331 = vmatprep.subr.bf16.mxu1 %v8271_v39 }
 0x829   :  { %4332 = vmatpush1.bf16.msra.mxu1 %v8269_v40 }
 0x82a   :  { %4333 = vmatprep.subr.bf16.mxu1 %v8277_v41 }
 0x82d   :  { %4334 = vmatpush1.bf16.msra.mxu1 %v8275_v42 }
 0x82e   :  { %4335 = vmatprep.subr.bf16.mxu1 %v8283_v22  ;;  %v8347_v22 = vld [vmem:[#allocation20 + $0x720] ss:$100 sps:$4 sm:$0xff]  }
 0x831   :  { %4336 = vmatpush1.bf16.msra.mxu1 %v8281_v25  ;;  %v8355_v25 = vld [vmem:[#allocation20 + $0x7ec] ss:$100 sps:$4 sm:$0xff]  }
 0x832   :  { %4337 = vmatprep.subr.bf16.mxu1 %v8289_v27  ;;  %v8353_v27 = vld [vmem:[#allocation20 + $0x7e8] ss:$100 sps:$4 sm:$0xff]  }
 0x835   :  { %4338 = vmatpush1.bf16.msra.mxu1 %v8287_v30  ;;  %v8361_v30 = vld [vmem:[#allocation20 + $0x8b4] ss:$100 sps:$4 sm:$0xff]  }
 0x836   :  { %4389 = vmatprep.subr.bf16.mxu1 %v8295_v33  ;;  %v8359_v33 = vld [vmem:[#allocation20 + $0x8b0] ss:$100 sps:$4 sm:$0xff]  }
 0x8cb   :  { %v1611_v47 = vpop.f32.mrb[4].mxu1 }
 0x8cc   :  { %v8039_v48 = vadd.f32 %v8038_v45, %v1611_v47  ;;  %v7478_v50 = vpop.f32.mrb[5].mxu1  ;;  %v8293_v47 = vld [vmem:[#allocation20 + $0x18] ss:$100 sps:$4 sm:$0xff]  }
 0x8cd   :  { %v1614_v51 = vpop.f32.mrb[6].mxu1  ;;  %v8301_v50 = vld [vmem:[#allocation20 + $0xe4] ss:$100 sps:$4 sm:$0xff]  }
 0x8ce   :  { %v1618_v52 = vmul.f32 0.5, %v8039_v48  ;;  %v7479_v53 = vpop.f32.mrb[7].mxu1  ;;  %v8296_v51 = vld [vmem:[#allocation20 + $0xd8] ss:$100 sps:$4 sm:$0xff]  }
 0x8cf   :  { %v8304_v53 = vld [vmem:[#allocation20 + $0x1a4] ss:$100 sps:$4 sm:$0xff]  }
 0x8d0   :  { %v1621_v54 = vadd.f32 %v1620_v49, %v1618_v52  ;;  %1624 = vst.msk [vmem:[%s9851_s17] sm:$0x3] %vm1623_vm6, %v1618_v52  ;;  %v8298_v49 = vld [vmem:[#allocation20 + $0xdc] ss:$100 sps:$4 sm:$0xff]  }
 0x8d1   :  { %1626 = vst.msk [vmem:[%s9851_s17] sm:$0x3] %vm1625_vm7, %v9651_v55  ;;  %v8299_v52 = vld [vmem:[#allocation20 + $0xe0] ss:$100 sps:$4 sm:$0xff]   ;;  %s9652_s17 = smov [#allocation50]  }
 0x8d2   :  { %v10158_v58 = vpack.c.bf16 %v1621_v54, %v1621_v54  ;;  %v8307_v54 = vld [vmem:[#allocation20 + $0x1ac] ss:$100 sps:$4 sm:$0xff]   ;;  %v8302_v55 = vld [vmem:[#allocation20 + $0x1a0] ss:$100 sps:$4 sm:$0xff]   ;;  %s6483_s30 = sshll.u32 %s9652_s17, 4  ;;  %s6484_s30 = int_to_ptr.vmem [resolvable:$true] %s6483_s30 }
 0x8d3   :  { %s9513_s22 = scalar_lea.vmem %s6484_s30, 32  ;;  %p9518_p11 = scmp.lt.s32.totalorder %s6484_s30, %s6484_s30 }
 0x8d4   :  { %6628 = vmatmul.mubr.msk.bf16.vlgmr.msra.gmra.mrb[8].mxu0 %vm1652_vm8, %v10158_v58  ;;  %p9514_p10 = scmp.ne.s32.totalorder %s6484_s30, %s9513_s22  ;;  %p9519_p12 = scmp.lt.s32.totalorder %s9513_s22, %s9513_s22 }
 0x8d5   :  { %4267 = vmatpush1.bf16.msra.mxu0 %v8194_v56  ;;  %v8305_v56 = vld [vmem:[#allocation20 + $0x1a8] ss:$100 sps:$4 sm:$0xff]  }
 0x8d6   :  { %4268 = vmatprep.subr.bf16.mxu0 %v8202_v59  ;;  %v8310_v59 = vld [vmem:[#allocation20 + $0x26c] ss:$100 sps:$4 sm:$0xff]   ;;  %p9520_p13 = por %p9519_p12, %p9518_p11 }
 0x8d8   :  { %p9521_p0 = pnand %p9520_p13, %p9514_p10 }
 0x8d9   :  { %4269 = vmatpush1.bf16.msra.mxu0 %v8200_v60  ;;  %v8313_v60 = vld [vmem:[#allocation20 + $0x274] ss:$100 sps:$4 sm:$0xff]  }
 0x8da   :  { %4270 = vmatprep.subr.bf16.mxu0 %v8208_v61  ;;  %v8308_v61 = vld [vmem:[#allocation20 + $0x268] ss:$100 sps:$4 sm:$0xff]  }
 0x8dd   :  { %4271 = vmatpush1.bf16.msra.mxu0 %v8206_v62  ;;  %v8311_v62 = vld [vmem:[#allocation20 + $0x270] ss:$100 sps:$4 sm:$0xff]  }
 0x8de   :  { %4272 = vmatprep.subr.bf16.mxu0 %v8214_v63  ;;  %v8316_v63 = vld [vmem:[#allocation20 + $0x334] ss:$100 sps:$4 sm:$0xff]  }
 0x8e1   :  { %4273 = vmatpush1.bf16.msra.mxu0 %v8212_v0  ;;  %v8319_v0 = vld [vmem:[#allocation20 + $0x33c] ss:$100 sps:$4 sm:$0xff]  }
 0x8e2   :  { %4274 = vmatprep.subr.bf16.mxu0 %v8220_v1  ;;  %v8314_v1 = vld [vmem:[#allocation20 + $0x330] ss:$100 sps:$4 sm:$0xff]  }
 0x8e5   :  { %4275 = vmatpush1.bf16.msra.mxu0 %v8218_v2  ;;  %v8317_v2 = vld [vmem:[#allocation20 + $0x338] ss:$100 sps:$4 sm:$0xff]  }
 0x8e6   :  { %4276 = vmatprep.subr.bf16.mxu0 %v8226_v3  ;;  %v8322_v3 = vld [vmem:[#allocation20 + $0x3fc] ss:$100 sps:$4 sm:$0xff]  }
 0x8e9   :  { %4277 = vmatpush1.bf16.msra.mxu0 %v8224_v4  ;;  %v8325_v4 = vld [vmem:[#allocation20 + $0x404] ss:$100 sps:$4 sm:$0xff]  }
 0x8ea   :  { %4278 = vmatprep.subr.bf16.mxu0 %v8232_v5  ;;  %v8320_v5 = vld [vmem:[#allocation20 + $0x3f8] ss:$100 sps:$4 sm:$0xff]  }
 0x8ed   :  { %4279 = vmatpush1.bf16.msra.mxu0 %v8230_v7  ;;  %v8323_v7 = vld [vmem:[#allocation20 + $0x400] ss:$100 sps:$4 sm:$0xff]  }
 0x8ee   :  { %4280 = vmatprep.subr.bf16.mxu0 %v8238_v8  ;;  %v8328_v8 = vld [vmem:[#allocation20 + $0x4c4] ss:$100 sps:$4 sm:$0xff]  }
 0x8f1   :  { %4281 = vmatpush1.bf16.msra.mxu0 %v8236_v9  ;;  %v8331_v9 = vld [vmem:[#allocation20 + $0x4cc] ss:$100 sps:$4 sm:$0xff]  }
 0x8f2   :  { %4282 = vmatprep.subr.bf16.mxu0 %v8244_v10  ;;  %v8326_v10 = vld [vmem:[#allocation20 + $0x4c0] ss:$100 sps:$4 sm:$0xff]  }
 0x8f5   :  { %4283 = vmatpush1.bf16.msra.mxu0 %v8242_v11  ;;  %v8329_v11 = vld [vmem:[#allocation20 + $0x4c8] ss:$100 sps:$4 sm:$0xff]  }
 0x8f6   :  { %4284 = vmatprep.subr.bf16.mxu0 %v8250_v12  ;;  %v8334_v12 = vld [vmem:[#allocation20 + $0x58c] ss:$100 sps:$4 sm:$0xff]  }
 0x8f9   :  { %4285 = vmatpush1.bf16.msra.mxu0 %v8248_v13  ;;  %v8337_v13 = vld [vmem:[#allocation20 + $0x594] ss:$100 sps:$4 sm:$0xff]  }
 0x8fa   :  { %4286 = vmatprep.subr.bf16.mxu0 %v8256_v14  ;;  %v8332_v14 = vld [vmem:[#allocation20 + $0x588] ss:$100 sps:$4 sm:$0xff]  }
 0x8fd   :  { %4287 = vmatpush1.bf16.msra.mxu0 %v8254_v15  ;;  %v8335_v15 = vld [vmem:[#allocation20 + $0x590] ss:$100 sps:$4 sm:$0xff]  }
 0x8fe   :  { %4288 = vmatprep.subr.bf16.mxu0 %v8262_v16  ;;  %v8340_v16 = vld [vmem:[#allocation20 + $0x654] ss:$100 sps:$4 sm:$0xff]  }
 0x901   :  { %4289 = vmatpush1.bf16.msra.mxu0 %v8260_v17  ;;  %v8343_v17 = vld [vmem:[#allocation20 + $0x65c] ss:$100 sps:$4 sm:$0xff]  }
 0x902   :  { %4290 = vmatprep.subr.bf16.mxu0 %v8268_v18  ;;  %v8338_v18 = vld [vmem:[#allocation20 + $0x650] ss:$100 sps:$4 sm:$0xff]  }
 0x905   :  { %4291 = vmatpush1.bf16.msra.mxu0 %v8266_v23  ;;  %v8341_v23 = vld [vmem:[#allocation20 + $0x658] ss:$100 sps:$4 sm:$0xff]  }
 0x906   :  { %4292 = vmatprep.subr.bf16.mxu0 %v8274_v19  ;;  %v8346_v19 = vld [vmem:[#allocation20 + $0x71c] ss:$100 sps:$4 sm:$0xff]  }
 0x909   :  { %4293 = vmatpush1.bf16.msra.mxu0 %v8272_v20  ;;  %v8349_v20 = vld [vmem:[#allocation20 + $0x724] ss:$100 sps:$4 sm:$0xff]  }
 0x90a   :  { %4294 = vmatprep.subr.bf16.mxu0 %v8280_v21  ;;  %v8344_v21 = vld [vmem:[#allocation20 + $0x718] ss:$100 sps:$4 sm:$0xff]  }
 0x90d   :  { %4295 = vmatpush1.bf16.msra.mxu0 %v8278_v24  ;;  %v8352_v24 = vld [vmem:[#allocation20 + $0x7e4] ss:$100 sps:$4 sm:$0xff]  }
 0x90e   :  { %4296 = vmatprep.subr.bf16.mxu0 %v8286_v26  ;;  %v8350_v26 = vld [vmem:[#allocation20 + $0x7e0] ss:$100 sps:$4 sm:$0xff]  }
 0x911   :  { %4297 = vmatpush1.bf16.msra.mxu0 %v8284_v28  ;;  %v8358_v28 = vld [vmem:[#allocation20 + $0x8ac] ss:$100 sps:$4 sm:$0xff]  }
 0x912   :  { %4348 = vmatprep.subr.bf16.mxu0 %v8292_v32  ;;  %v8356_v32 = vld [vmem:[#allocation20 + $0x8a8] ss:$100 sps:$4 sm:$0xff]  }
 0x9a7   :  { %v1690_v37 = vpop.f32.mrb[8].mxu0 }
 0x9a8   :  { %v1691_v38 = vadd.f32 %v1690_v37, %v1635_v35  ;;  %v1692_v39 = vpop.f32.mrb[9].mxu0  ;;  %v8367_v35 = vld [vmem:[#allocation20 + $0x97c] ss:$100 sps:$4 sm:$0xff]  }
 0x9a9   :  { %v1693_v40 = vadd.f32 %v1692_v39, %v1639_v36  ;;  %v1694_v41 = vpop.f32.mrb[10].mxu0  ;;  %v8362_v36 = vld [vmem:[#allocation20 + $0x970] ss:$100 sps:$4 sm:$0xff]   ;;  %v8365_v37 = vld [vmem:[#allocation20 + $0x978] ss:$100 sps:$4 sm:$0xff]  }
 0x9aa   :  { %v1697_v42 = vmax.f32 %v1691_v38, 0.0  ;;  %v1695_v43 = vpop.f32.mrb[11].mxu0  ;;  %v8370_v38 = vld [vmem:[#allocation20 + $0xa3c] ss:$100 sps:$4 sm:$0xff]   ;;  %v8373_v39 = vld [vmem:[#allocation20 + $0xa44] ss:$100 sps:$4 sm:$0xff]  }
 0x9ab   :  { %v1698_v44 = vmax.f32 %v1693_v40, 0.0  ;;  %v8368_v40 = vld [vmem:[#allocation20 + $0xa38] ss:$100 sps:$4 sm:$0xff]   ;;  %v8371_v41 = vld [vmem:[#allocation20 + $0xa40] ss:$100 sps:$4 sm:$0xff]  }
 0x9ac   :  { %v10166_v48 = vpack.c.bf16 %v1697_v42, %v1697_v42  ;;  %v8376_v42 = vld [vmem:[#allocation20 + $0xb04] ss:$100 sps:$4 sm:$0xff]   ;;  %v8379_v43 = vld [vmem:[#allocation20 + $0xb0c] ss:$100 sps:$4 sm:$0xff]  }
 0x9ad   :  { %v10164_v45 = vpack.c.bf16 %v1698_v44, %v1698_v44  ;;  %v8374_v44 = vld [vmem:[#allocation20 + $0xb00] ss:$100 sps:$4 sm:$0xff]  }
 0x9af   :  { %4298 = vmatprep.mubr.bf16.mxu0 %v10164_v45  ;;  %4339 = vmatprep.mubr.bf16.mxu1 %v10164_v45 }
 0x9b0   :  { %4299 = vmatmul.mubr.bf16.vlgmr.msra.gmra.mrb[12].mxu0 %v10166_v48  ;;  %4340 = vmatmul.mubr.bf16.vlgmr.msra.gmra.mrb[24].mxu1 %v10166_v48 }
 0x9b1   :  { %4349 = vmatpush1.bf16.msra.mxu0 %v8290_v46  ;;  %4390 = vmatpush1.bf16.msra.mxu1 %v8293_v47  ;;  %v8377_v46 = vld [vmem:[#allocation20 + $0xb08] ss:$100 sps:$4 sm:$0xff]  }
 0x9b2   :  { %4380 = vmatprep.mubr.bf16.mxu0 %v10164_v45  ;;  %4421 = vmatprep.mubr.bf16.mxu1 %v10164_v45  ;;  %v8382_v47 = vld [vmem:[#allocation20 + $0xbcc] ss:$100 sps:$4 sm:$0xff]  }
 0x9b3   :  { %4350 = vmatprep.subr.bf16.mxu0 %v8298_v49  ;;  %4391 = vmatprep.subr.bf16.mxu1 %v8301_v50  ;;  %v8385_v49 = vld [vmem:[#allocation20 + $0xbd4] ss:$100 sps:$4 sm:$0xff]   ;;  %v8380_v50 = vld [vmem:[#allocation20 + $0xbc8] ss:$100 sps:$4 sm:$0xff]  }
 0x9b5   :  { %4351 = vmatpush1.bf16.msra.mxu0 %v8296_v51  ;;  %4392 = vmatpush1.bf16.msra.mxu1 %v8299_v52  ;;  %v8383_v51 = vld [vmem:[#allocation20 + $0xbd0] ss:$100 sps:$4 sm:$0xff]   ;;  %v8388_v52 = vld [vmem:[#allocation20 + $0x24] ss:$100 sps:$4 sm:$0xff]  }
 0x9b6   :  { %4352 = vmatprep.subr.bf16.mxu0 %v8304_v53  ;;  %4393 = vmatprep.subr.bf16.mxu1 %v8307_v54  ;;  %v8391_v53 = vld [vmem:[#allocation20 + $0x2c] ss:$100 sps:$4 sm:$0xff]   ;;  %v8386_v54 = vld [vmem:[#allocation20 + $0x20] ss:$100 sps:$4 sm:$0xff]  }
 0x9b9   :  { %4353 = vmatpush1.bf16.msra.mxu0 %v8302_v55  ;;  %4394 = vmatpush1.bf16.msra.mxu1 %v8305_v56  ;;  %v8389_v55 = vld [vmem:[#allocation20 + $0x28] ss:$100 sps:$4 sm:$0xff]  }
 0x9ba   :  { %4354 = vmatprep.subr.bf16.mxu0 %v8310_v59  ;;  %4395 = vmatprep.subr.bf16.mxu1 %v8313_v60  ;;  %v8394_v56 = vld [vmem:[#allocation20 + $0xec] ss:$100 sps:$4 sm:$0xff]   ;;  %v8397_v59 = vld [vmem:[#allocation20 + $0xf4] ss:$100 sps:$4 sm:$0xff]  }
 0x9bb   :  { %v8392_v60 = vld [vmem:[#allocation20 + $0xe8] ss:$100 sps:$4 sm:$0xff]  }
 0x9bd   :  { %4355 = vmatpush1.bf16.msra.mxu0 %v8308_v61  ;;  %4396 = vmatpush1.bf16.msra.mxu1 %v8311_v62  ;;  %v8395_v61 = vld [vmem:[#allocation20 + $0xf0] ss:$100 sps:$4 sm:$0xff]  }
 0x9be   :  { %4356 = vmatprep.subr.bf16.mxu0 %v8316_v63  ;;  %4397 = vmatprep.subr.bf16.mxu1 %v8319_v0  ;;  %v8400_v62 = vld [vmem:[#allocation20 + $0x1b4] ss:$100 sps:$4 sm:$0xff]   ;;  %v8403_v63 = vld [vmem:[#allocation20 + $0x1bc] ss:$100 sps:$4 sm:$0xff]  }
 0x9bf   :  { %v8398_v0 = vld [vmem:[#allocation20 + $0x1b0] ss:$100 sps:$4 sm:$0xff]  }
 0x9c1   :  { %4357 = vmatpush1.bf16.msra.mxu0 %v8314_v1  ;;  %4398 = vmatpush1.bf16.msra.mxu1 %v8317_v2  ;;  %v8401_v1 = vld [vmem:[#allocation20 + $0x1b8] ss:$100 sps:$4 sm:$0xff]  }
 0x9c2   :  { %4358 = vmatprep.subr.bf16.mxu0 %v8322_v3  ;;  %4399 = vmatprep.subr.bf16.mxu1 %v8325_v4  ;;  %v8406_v2 = vld [vmem:[#allocation20 + $0x27c] ss:$100 sps:$4 sm:$0xff]   ;;  %v8409_v3 = vld [vmem:[#allocation20 + $0x284] ss:$100 sps:$4 sm:$0xff]  }
 0x9c3   :  { %v8404_v4 = vld [vmem:[#allocation20 + $0x278] ss:$100 sps:$4 sm:$0xff]  }
 0x9c5   :  { %4359 = vmatpush1.bf16.msra.mxu0 %v8320_v5  ;;  %4400 = vmatpush1.bf16.msra.mxu1 %v8323_v7  ;;  %v8407_v5 = vld [vmem:[#allocation20 + $0x280] ss:$100 sps:$4 sm:$0xff]  }
 0x9c6   :  { %4360 = vmatprep.subr.bf16.mxu0 %v8328_v8  ;;  %4401 = vmatprep.subr.bf16.mxu1 %v8331_v9  ;;  %v8412_v7 = vld [vmem:[#allocation20 + $0x344] ss:$100 sps:$4 sm:$0xff]   ;;  %v8415_v8 = vld [vmem:[#allocation20 + $0x34c] ss:$100 sps:$4 sm:$0xff]  }
 0x9c7   :  { %v8410_v9 = vld [vmem:[#allocation20 + $0x340] ss:$100 sps:$4 sm:$0xff]  }
 0x9c9   :  { %4361 = vmatpush1.bf16.msra.mxu0 %v8326_v10  ;;  %4402 = vmatpush1.bf16.msra.mxu1 %v8329_v11  ;;  %v8413_v10 = vld [vmem:[#allocation20 + $0x348] ss:$100 sps:$4 sm:$0xff]  }
 0x9ca   :  { %4362 = vmatprep.subr.bf16.mxu0 %v8334_v12  ;;  %4403 = vmatprep.subr.bf16.mxu1 %v8337_v13  ;;  %v8418_v11 = vld [vmem:[#allocation20 + $0x40c] ss:$100 sps:$4 sm:$0xff]   ;;  %v8421_v12 = vld [vmem:[#allocation20 + $0x414] ss:$100 sps:$4 sm:$0xff]  }
 0x9cb   :  { %v8416_v13 = vld [vmem:[#allocation20 + $0x408] ss:$100 sps:$4 sm:$0xff]  }
 0x9cd   :  { %4363 = vmatpush1.bf16.msra.mxu0 %v8332_v14  ;;  %4404 = vmatpush1.bf16.msra.mxu1 %v8335_v15  ;;  %v8419_v14 = vld [vmem:[#allocation20 + $0x410] ss:$100 sps:$4 sm:$0xff]  }
 0x9ce   :  { %4364 = vmatprep.subr.bf16.mxu0 %v8340_v16  ;;  %4405 = vmatprep.subr.bf16.mxu1 %v8343_v17  ;;  %v8424_v15 = vld [vmem:[#allocation20 + $0x4d4] ss:$100 sps:$4 sm:$0xff]   ;;  %v8427_v16 = vld [vmem:[#allocation20 + $0x4dc] ss:$100 sps:$4 sm:$0xff]  }
 0x9cf   :  { %v8422_v17 = vld [vmem:[#allocation20 + $0x4d0] ss:$100 sps:$4 sm:$0xff]  }
 0x9d1   :  { %4365 = vmatpush1.bf16.msra.mxu0 %v8338_v18  ;;  %4406 = vmatpush1.bf16.msra.mxu1 %v8341_v23  ;;  %v8425_v18 = vld [vmem:[#allocation20 + $0x4d8] ss:$100 sps:$4 sm:$0xff]  }
 0x9d2   :  { %4366 = vmatprep.subr.bf16.mxu0 %v8346_v19  ;;  %4407 = vmatprep.subr.bf16.mxu1 %v8349_v20  ;;  %v8430_v23 = vld [vmem:[#allocation20 + $0x59c] ss:$100 sps:$4 sm:$0xff]   ;;  %v8433_v19 = vld [vmem:[#allocation20 + $0x5a4] ss:$100 sps:$4 sm:$0xff]  }
 0x9d3   :  { %v8428_v20 = vld [vmem:[#allocation20 + $0x598] ss:$100 sps:$4 sm:$0xff]  }
 0x9d5   :  { %4367 = vmatpush1.bf16.msra.mxu0 %v8344_v21  ;;  %4408 = vmatpush1.bf16.msra.mxu1 %v8347_v22  ;;  %v8431_v21 = vld [vmem:[#allocation20 + $0x5a0] ss:$100 sps:$4 sm:$0xff]  }
 0x9d6   :  { %4368 = vmatprep.subr.bf16.mxu0 %v8352_v24  ;;  %4409 = vmatprep.subr.bf16.mxu1 %v8355_v25  ;;  %v8436_v22 = vld [vmem:[#allocation20 + $0x664] ss:$100 sps:$4 sm:$0xff]   ;;  %v8439_v24 = vld [vmem:[#allocation20 + $0x66c] ss:$100 sps:$4 sm:$0xff]  }
 0x9d7   :  { %v8434_v25 = vld [vmem:[#allocation20 + $0x660] ss:$100 sps:$4 sm:$0xff]  }
 0x9d9   :  { %4369 = vmatpush1.bf16.msra.mxu0 %v8350_v26  ;;  %4410 = vmatpush1.bf16.msra.mxu1 %v8353_v27  ;;  %v8437_v26 = vld [vmem:[#allocation20 + $0x668] ss:$100 sps:$4 sm:$0xff]  }
 0x9da   :  { %4370 = vmatprep.subr.bf16.mxu0 %v8358_v28  ;;  %4411 = vmatprep.subr.bf16.mxu1 %v8361_v30  ;;  %v8442_v27 = vld [vmem:[#allocation20 + $0x72c] ss:$100 sps:$4 sm:$0xff]   ;;  %v8445_v28 = vld [vmem:[#allocation20 + $0x734] ss:$100 sps:$4 sm:$0xff]  }
 0x9db   :  { %v8440_v30 = vld [vmem:[#allocation20 + $0x728] ss:$100 sps:$4 sm:$0xff]  }
 0x9dd   :  { %4371 = vmatpush1.bf16.msra.mxu0 %v8356_v32  ;;  %4412 = vmatpush1.bf16.msra.mxu1 %v8359_v33  ;;  %v8443_v32 = vld [vmem:[#allocation20 + $0x730] ss:$100 sps:$4 sm:$0xff]  }
 0x9de   :  { %4372 = vmatprep.subr.bf16.mxu0 %v8364_v34  ;;  %4413 = vmatprep.subr.bf16.mxu1 %v8367_v35  ;;  %v8448_v33 = vld [vmem:[#allocation20 + $0x7f4] ss:$100 sps:$4 sm:$0xff]   ;;  %v8451_v34 = vld [vmem:[#allocation20 + $0x7fc] ss:$100 sps:$4 sm:$0xff]  }
 0x9df   :  { %v8446_v35 = vld [vmem:[#allocation20 + $0x7f0] ss:$100 sps:$4 sm:$0xff]  }
 0x9e1   :  { %4373 = vmatpush1.bf16.msra.mxu0 %v8362_v36  ;;  %4414 = vmatpush1.bf16.msra.mxu1 %v8365_v37  ;;  %v8449_v36 = vld [vmem:[#allocation20 + $0x7f8] ss:$100 sps:$4 sm:$0xff]  }
 0x9e2   :  { %4374 = vmatprep.subr.bf16.mxu0 %v8370_v38  ;;  %4415 = vmatprep.subr.bf16.mxu1 %v8373_v39  ;;  %v8454_v37 = vld [vmem:[#allocation20 + $0x8bc] ss:$100 sps:$4 sm:$0xff]   ;;  %v8457_v38 = vld [vmem:[#allocation20 + $0x8c4] ss:$100 sps:$4 sm:$0xff]  }
 0x9e3   :  { %v8452_v39 = vld [vmem:[#allocation20 + $0x8b8] ss:$100 sps:$4 sm:$0xff]  }
 0x9e5   :  { %4375 = vmatpush1.bf16.msra.mxu0 %v8368_v40  ;;  %4416 = vmatpush1.bf16.msra.mxu1 %v8371_v41  ;;  %v8455_v40 = vld [vmem:[#allocation20 + $0x8c0] ss:$100 sps:$4 sm:$0xff]  }
 0x9e6   :  { %4376 = vmatprep.subr.bf16.mxu0 %v8376_v42  ;;  %4417 = vmatprep.subr.bf16.mxu1 %v8379_v43  ;;  %v8460_v41 = vld [vmem:[#allocation20 + $0x984] ss:$100 sps:$4 sm:$0xff]   ;;  %v8463_v42 = vld [vmem:[#allocation20 + $0x98c] ss:$100 sps:$4 sm:$0xff]  }
 0x9e7   :  { %v8458_v43 = vld [vmem:[#allocation20 + $0x980] ss:$100 sps:$4 sm:$0xff]  }
 0x9e9   :  { %4377 = vmatpush1.bf16.msra.mxu0 %v8374_v44  ;;  %4418 = vmatpush1.bf16.msra.mxu1 %v8377_v46  ;;  %v8461_v44 = vld [vmem:[#allocation20 + $0x988] ss:$100 sps:$4 sm:$0xff]  }
 0x9ea   :  { %4378 = vmatprep.subr.bf16.mxu0 %v8382_v47  ;;  %4419 = vmatprep.subr.bf16.mxu1 %v8385_v49  ;;  %v8466_v46 = vld [vmem:[#allocation20 + $0xa4c] ss:$100 sps:$4 sm:$0xff]   ;;  %v8469_v47 = vld [vmem:[#allocation20 + $0xa54] ss:$100 sps:$4 sm:$0xff]  }
 0x9eb   :  { %v8464_v49 = vld [vmem:[#allocation20 + $0xa48] ss:$100 sps:$4 sm:$0xff]  }
 0x9ed   :  { %4379 = vmatpush1.bf16.msra.mxu0 %v8380_v50  ;;  %4420 = vmatpush1.bf16.msra.mxu1 %v8383_v51  ;;  %v8467_v50 = vld [vmem:[#allocation20 + $0xa50] ss:$100 sps:$4 sm:$0xff]  }
 0x9ee   :  { %4430 = vmatprep.subr.bf16.mxu0 %v8388_v52  ;;  %4471 = vmatprep.subr.bf16.mxu1 %v8391_v53  ;;  %v8472_v51 = vld [vmem:[#allocation20 + $0xb14] ss:$100 sps:$4 sm:$0xff]   ;;  %v8475_v52 = vld [vmem:[#allocation20 + $0xb1c] ss:$100 sps:$4 sm:$0xff]  }
 0x9ef   :  { %v8470_v53 = vld [vmem:[#allocation20 + $0xb10] ss:$100 sps:$4 sm:$0xff]  }
 0x9f0   :  { %4381 = vmatmul.mubr.bf16.vlgmr.msra.gmra.mrb[16].mxu0 %v10166_v48  ;;  %4422 = vmatmul.mubr.bf16.vlgmr.msra.gmra.mrb[28].mxu1 %v10166_v48 }
 0x9f1   :  { %4431 = vmatpush1.bf16.msra.mxu0 %v8386_v54  ;;  %4462 = vmatprep.mubr.bf16.mxu0 %v10164_v45  ;;  %v8473_v54 = vld [vmem:[#allocation20 + $0xb18] ss:$100 sps:$4 sm:$0xff]  }
 0x9f2   :  { %4472 = vmatpush1.bf16.msra.mxu1 %v8389_v55  ;;  %4503 = vmatprep.mubr.bf16.mxu1 %v10164_v45  ;;  %v8478_v55 = vld [vmem:[#allocation20 + $0xbdc] ss:$100 sps:$4 sm:$0xff]  }
 0x9f3   :  { %4432 = vmatprep.subr.bf16.mxu0 %v8394_v56  ;;  %4473 = vmatprep.subr.bf16.mxu1 %v8397_v59  ;;  %v8481_v56 = vld [vmem:[#allocation20 + $0xbe4] ss:$100 sps:$4 sm:$0xff]   ;;  %v8476_v59 = vld [vmem:[#allocation20 + $0xbd8] ss:$100 sps:$4 sm:$0xff]  }
 0x9f5   :  { %4433 = vmatpush1.bf16.msra.mxu0 %v8392_v60  ;;  %v8479_v60 = vld [vmem:[#allocation20 + $0xbe0] ss:$100 sps:$4 sm:$0xff]  }
 0x9f6   :  { %4474 = vmatpush1.bf16.msra.mxu1 %v8395_v61  ;;  %4434 = vmatprep.subr.bf16.mxu0 %v8400_v62  ;;  %v8484_v61 = vld [vmem:[#allocation20 + $0x34] ss:$100 sps:$4 sm:$0xff]   ;;  %v8487_v62 = vld [vmem:[#allocation20 + $0x3c] ss:$100 sps:$4 sm:$0xff]  }
 0x9f7   :  { %4475 = vmatprep.subr.bf16.mxu1 %v8403_v63  ;;  %v8482_v63 = vld [vmem:[#allocation20 + $0x30] ss:$100 sps:$4 sm:$0xff]  }
 0x9f9   :  { %4435 = vmatpush1.bf16.msra.mxu0 %v8398_v0  ;;  %v8485_v0 = vld [vmem:[#allocation20 + $0x38] ss:$100 sps:$4 sm:$0xff]  }
 0x9fa   :  { %4476 = vmatpush1.bf16.msra.mxu1 %v8401_v1  ;;  %4436 = vmatprep.subr.bf16.mxu0 %v8406_v2  ;;  %v8490_v1 = vld [vmem:[#allocation20 + $0xfc] ss:$100 sps:$4 sm:$0xff]   ;;  %v8493_v2 = vld [vmem:[#allocation20 + $0x104] ss:$100 sps:$4 sm:$0xff]  }
 0x9fb   :  { %4477 = vmatprep.subr.bf16.mxu1 %v8409_v3  ;;  %v8488_v3 = vld [vmem:[#allocation20 + $0xf8] ss:$100 sps:$4 sm:$0xff]  }
 0x9fd   :  { %4437 = vmatpush1.bf16.msra.mxu0 %v8404_v4  ;;  %v8491_v4 = vld [vmem:[#allocation20 + $0x100] ss:$100 sps:$4 sm:$0xff]  }
 0x9fe   :  { %4478 = vmatpush1.bf16.msra.mxu1 %v8407_v5  ;;  %4438 = vmatprep.subr.bf16.mxu0 %v8412_v7  ;;  %v8496_v5 = vld [vmem:[#allocation20 + $0x1c4] ss:$100 sps:$4 sm:$0xff]   ;;  %v8499_v7 = vld [vmem:[#allocation20 + $0x1cc] ss:$100 sps:$4 sm:$0xff]  }
 0x9ff   :  { %4479 = vmatprep.subr.bf16.mxu1 %v8415_v8  ;;  %v8494_v8 = vld [vmem:[#allocation20 + $0x1c0] ss:$100 sps:$4 sm:$0xff]  }
 0xa01   :  { %4439 = vmatpush1.bf16.msra.mxu0 %v8410_v9  ;;  %v8497_v9 = vld [vmem:[#allocation20 + $0x1c8] ss:$100 sps:$4 sm:$0xff]  }
 0xa02   :  { %4480 = vmatpush1.bf16.msra.mxu1 %v8413_v10  ;;  %4440 = vmatprep.subr.bf16.mxu0 %v8418_v11  ;;  %v8502_v10 = vld [vmem:[#allocation20 + $0x28c] ss:$100 sps:$4 sm:$0xff]   ;;  %v8505_v11 = vld [vmem:[#allocation20 + $0x294] ss:$100 sps:$4 sm:$0xff]  }
 0xa03   :  { %4481 = vmatprep.subr.bf16.mxu1 %v8421_v12  ;;  %v8500_v12 = vld [vmem:[#allocation20 + $0x288] ss:$100 sps:$4 sm:$0xff]  }
 0xa05   :  { %4441 = vmatpush1.bf16.msra.mxu0 %v8416_v13  ;;  %v8503_v13 = vld [vmem:[#allocation20 + $0x290] ss:$100 sps:$4 sm:$0xff]  }
 0xa06   :  { %4482 = vmatpush1.bf16.msra.mxu1 %v8419_v14  ;;  %4442 = vmatprep.subr.bf16.mxu0 %v8424_v15  ;;  %v8508_v14 = vld [vmem:[#allocation20 + $0x354] ss:$100 sps:$4 sm:$0xff]   ;;  %v8511_v15 = vld [vmem:[#allocation20 + $0x35c] ss:$100 sps:$4 sm:$0xff]  }
 0xa07   :  { %4483 = vmatprep.subr.bf16.mxu1 %v8427_v16  ;;  %v8506_v16 = vld [vmem:[#allocation20 + $0x350] ss:$100 sps:$4 sm:$0xff]  }
 0xa09   :  { %4443 = vmatpush1.bf16.msra.mxu0 %v8422_v17  ;;  %v8509_v17 = vld [vmem:[#allocation20 + $0x358] ss:$100 sps:$4 sm:$0xff]  }
 0xa0a   :  { %4484 = vmatpush1.bf16.msra.mxu1 %v8425_v18  ;;  %4444 = vmatprep.subr.bf16.mxu0 %v8430_v23  ;;  %v8514_v18 = vld [vmem:[#allocation20 + $0x41c] ss:$100 sps:$4 sm:$0xff]   ;;  %v8517_v23 = vld [vmem:[#allocation20 + $0x424] ss:$100 sps:$4 sm:$0xff]  }
 0xa0b   :  { %4485 = vmatprep.subr.bf16.mxu1 %v8433_v19  ;;  %v8512_v19 = vld [vmem:[#allocation20 + $0x418] ss:$100 sps:$4 sm:$0xff]  }
 0xa0d   :  { %4445 = vmatpush1.bf16.msra.mxu0 %v8428_v20  ;;  %v8515_v20 = vld [vmem:[#allocation20 + $0x420] ss:$100 sps:$4 sm:$0xff]  }
 0xa0e   :  { %4486 = vmatpush1.bf16.msra.mxu1 %v8431_v21  ;;  %4446 = vmatprep.subr.bf16.mxu0 %v8436_v22  ;;  %v8520_v21 = vld [vmem:[#allocation20 + $0x4e4] ss:$100 sps:$4 sm:$0xff]   ;;  %v8523_v22 = vld [vmem:[#allocation20 + $0x4ec] ss:$100 sps:$4 sm:$0xff]  }
 0xa0f   :  { %4487 = vmatprep.subr.bf16.mxu1 %v8439_v24  ;;  %v8518_v24 = vld [vmem:[#allocation20 + $0x4e0] ss:$100 sps:$4 sm:$0xff]  }
 0xa11   :  { %4447 = vmatpush1.bf16.msra.mxu0 %v8434_v25  ;;  %v8521_v25 = vld [vmem:[#allocation20 + $0x4e8] ss:$100 sps:$4 sm:$0xff]  }
 0xa12   :  { %4488 = vmatpush1.bf16.msra.mxu1 %v8437_v26  ;;  %4448 = vmatprep.subr.bf16.mxu0 %v8442_v27  ;;  %v8526_v26 = vld [vmem:[#allocation20 + $0x5ac] ss:$100 sps:$4 sm:$0xff]   ;;  %v8529_v27 = vld [vmem:[#allocation20 + $0x5b4] ss:$100 sps:$4 sm:$0xff]  }
 0xa13   :  { %4489 = vmatprep.subr.bf16.mxu1 %v8445_v28  ;;  %v8524_v28 = vld [vmem:[#allocation20 + $0x5a8] ss:$100 sps:$4 sm:$0xff]  }
 0xa15   :  { %4449 = vmatpush1.bf16.msra.mxu0 %v8440_v30  ;;  %v8527_v30 = vld [vmem:[#allocation20 + $0x5b0] ss:$100 sps:$4 sm:$0xff]  }
 0xa16   :  { %4490 = vmatpush1.bf16.msra.mxu1 %v8443_v32  ;;  %4450 = vmatprep.subr.bf16.mxu0 %v8448_v33  ;;  %v8532_v32 = vld [vmem:[#allocation20 + $0x674] ss:$100 sps:$4 sm:$0xff]   ;;  %v8535_v33 = vld [vmem:[#allocation20 + $0x67c] ss:$100 sps:$4 sm:$0xff]  }
 0xa17   :  { %4491 = vmatprep.subr.bf16.mxu1 %v8451_v34  ;;  %v8530_v34 = vld [vmem:[#allocation20 + $0x670] ss:$100 sps:$4 sm:$0xff]  }
 0xa19   :  { %4451 = vmatpush1.bf16.msra.mxu0 %v8446_v35  ;;  %v8533_v35 = vld [vmem:[#allocation20 + $0x678] ss:$100 sps:$4 sm:$0xff]  }
 0xa1a   :  { %4492 = vmatpush1.bf16.msra.mxu1 %v8449_v36  ;;  %4452 = vmatprep.subr.bf16.mxu0 %v8454_v37  ;;  %v8538_v36 = vld [vmem:[#allocation20 + $0x73c] ss:$100 sps:$4 sm:$0xff]   ;;  %v8541_v37 = vld [vmem:[#allocation20 + $0x744] ss:$100 sps:$4 sm:$0xff]  }
 0xa1b   :  { %4493 = vmatprep.subr.bf16.mxu1 %v8457_v38  ;;  %v8536_v38 = vld [vmem:[#allocation20 + $0x738] ss:$100 sps:$4 sm:$0xff]  }
 0xa1d   :  { %4453 = vmatpush1.bf16.msra.mxu0 %v8452_v39  ;;  %v8539_v39 = vld [vmem:[#allocation20 + $0x740] ss:$100 sps:$4 sm:$0xff]  }
 0xa1e   :  { %4494 = vmatpush1.bf16.msra.mxu1 %v8455_v40  ;;  %4454 = vmatprep.subr.bf16.mxu0 %v8460_v41  ;;  %v8544_v40 = vld [vmem:[#allocation20 + $0x804] ss:$100 sps:$4 sm:$0xff]   ;;  %v8547_v41 = vld [vmem:[#allocation20 + $0x80c] ss:$100 sps:$4 sm:$0xff]  }
 0xa1f   :  { %4495 = vmatprep.subr.bf16.mxu1 %v8463_v42  ;;  %v8542_v42 = vld [vmem:[#allocation20 + $0x800] ss:$100 sps:$4 sm:$0xff]  }
 0xa21   :  { %4455 = vmatpush1.bf16.msra.mxu0 %v8458_v43  ;;  %v8545_v43 = vld [vmem:[#allocation20 + $0x808] ss:$100 sps:$4 sm:$0xff]  }
 0xa22   :  { %4496 = vmatpush1.bf16.msra.mxu1 %v8461_v44  ;;  %4456 = vmatprep.subr.bf16.mxu0 %v8466_v46  ;;  %v8550_v44 = vld [vmem:[#allocation20 + $0x8cc] ss:$100 sps:$4 sm:$0xff]   ;;  %v8553_v46 = vld [vmem:[#allocation20 + $0x8d4] ss:$100 sps:$4 sm:$0xff]  }
 0xa23   :  { %4497 = vmatprep.subr.bf16.mxu1 %v8469_v47  ;;  %v8548_v47 = vld [vmem:[#allocation20 + $0x8c8] ss:$100 sps:$4 sm:$0xff]  }
 0xa25   :  { %4457 = vmatpush1.bf16.msra.mxu0 %v8464_v49  ;;  %v8551_v49 = vld [vmem:[#allocation20 + $0x8d0] ss:$100 sps:$4 sm:$0xff]  }
 0xa26   :  { %4498 = vmatpush1.bf16.msra.mxu1 %v8467_v50  ;;  %4458 = vmatprep.subr.bf16.mxu0 %v8472_v51  ;;  %v8556_v50 = vld [vmem:[#allocation20 + $0x994] ss:$100 sps:$4 sm:$0xff]   ;;  %v8559_v51 = vld [vmem:[#allocation20 + $0x99c] ss:$100 sps:$4 sm:$0xff]  }
 0xa27   :  { %4499 = vmatprep.subr.bf16.mxu1 %v8475_v52  ;;  %v8554_v52 = vld [vmem:[#allocation20 + $0x990] ss:$100 sps:$4 sm:$0xff]  }
 0xa29   :  { %4459 = vmatpush1.bf16.msra.mxu0 %v8470_v53  ;;  %v8557_v53 = vld [vmem:[#allocation20 + $0x998] ss:$100 sps:$4 sm:$0xff]  }
 0xa2a   :  { %4500 = vmatpush1.bf16.msra.mxu1 %v8473_v54  ;;  %4460 = vmatprep.subr.bf16.mxu0 %v8478_v55  ;;  %v8562_v54 = vld [vmem:[#allocation20 + $0xa5c] ss:$100 sps:$4 sm:$0xff]   ;;  %v8565_v55 = vld [vmem:[#allocation20 + $0xa64] ss:$100 sps:$4 sm:$0xff]  }
 0xa2b   :  { %4501 = vmatprep.subr.bf16.mxu1 %v8481_v56  ;;  %v8560_v56 = vld [vmem:[#allocation20 + $0xa58] ss:$100 sps:$4 sm:$0xff]  }
 0xa2d   :  { %4461 = vmatpush1.bf16.msra.mxu0 %v8476_v59  ;;  %v8563_v59 = vld [vmem:[#allocation20 + $0xa60] ss:$100 sps:$4 sm:$0xff]  }
 0xa2e   :  { %4502 = vmatpush1.bf16.msra.mxu1 %v8479_v60  ;;  %4512 = vmatprep.subr.bf16.mxu0 %v8484_v61  ;;  %v8568_v60 = vld [vmem:[#allocation20 + $0xb24] ss:$100 sps:$4 sm:$0xff]   ;;  %v8571_v61 = vld [vmem:[#allocation20 + $0xb2c] ss:$100 sps:$4 sm:$0xff]  }
 0xa2f   :  { %4553 = vmatprep.subr.bf16.mxu1 %v8487_v62  ;;  %v8566_v62 = vld [vmem:[#allocation20 + $0xb20] ss:$100 sps:$4 sm:$0xff]  }
 0xa30   :  { %4463 = vmatmul.mubr.bf16.vlgmr.msra.gmra.mrb[20].mxu0 %v10166_v48 }
 0xa31   :  { %4504 = vmatmul.mubr.bf16.vlgmr.msra.gmra.mrb[32].mxu1 %v10166_v48  ;;  %4513 = vmatpush1.bf16.msra.mxu0 %v8482_v63  ;;  %v8569_v63 = vld [vmem:[#allocation20 + $0xb28] ss:$100 sps:$4 sm:$0xff]  }
 0xa32   :  { %4544 = vmatprep.mubr.bf16.mxu0 %v10164_v45  ;;  %4554 = vmatpush1.bf16.msra.mxu1 %v8485_v0  ;;  %v8574_v0 = vld [vmem:[#allocation20 + $0xbec] ss:$100 sps:$4 sm:$0xff]  }
 0xa33   :  { %4585 = vmatprep.mubr.bf16.mxu1 %v10164_v45  ;;  %4514 = vmatprep.subr.bf16.mxu0 %v8490_v1  ;;  %v8577_v1 = vld [vmem:[#allocation20 + $0xbf4] ss:$100 sps:$4 sm:$0xff]  }
 0xa34   :  { %4555 = vmatprep.subr.bf16.mxu1 %v8493_v2  ;;  %v8572_v2 = vld [vmem:[#allocation20 + $0xbe8] ss:$100 sps:$4 sm:$0xff]  }
 0xa35   :  { %4515 = vmatpush1.bf16.msra.mxu0 %v8488_v3  ;;  %v8575_v3 = vld [vmem:[#allocation20 + $0xbf0] ss:$100 sps:$4 sm:$0xff]  }
 0xa36   :  { %4556 = vmatpush1.bf16.msra.mxu1 %v8491_v4  ;;  %4516 = vmatprep.subr.bf16.mxu0 %v8496_v5  ;;  %v8580_v4 = vld [vmem:[#allocation20 + $0x44] ss:$100 sps:$4 sm:$0xff]   ;;  %v8583_v5 = vld [vmem:[#allocation20 + $0x4c] ss:$100 sps:$4 sm:$0xff]  }
 0xa37   :  { %4557 = vmatprep.subr.bf16.mxu1 %v8499_v7  ;;  %v8578_v7 = vld [vmem:[#allocation20 + $0x40] ss:$100 sps:$4 sm:$0xff]  }
 0xa39   :  { %4517 = vmatpush1.bf16.msra.mxu0 %v8494_v8  ;;  %v8581_v8 = vld [vmem:[#allocation20 + $0x48] ss:$100 sps:$4 sm:$0xff]  }
 0xa3a   :  { %4558 = vmatpush1.bf16.msra.mxu1 %v8497_v9  ;;  %4518 = vmatprep.subr.bf16.mxu0 %v8502_v10  ;;  %v8586_v9 = vld [vmem:[#allocation20 + $0x10c] ss:$100 sps:$4 sm:$0xff]   ;;  %v8589_v10 = vld [vmem:[#allocation20 + $0x114] ss:$100 sps:$4 sm:$0xff]  }
 0xa3b   :  { %4559 = vmatprep.subr.bf16.mxu1 %v8505_v11  ;;  %v8584_v11 = vld [vmem:[#allocation20 + $0x108] ss:$100 sps:$4 sm:$0xff]  }
 0xa3d   :  { %4519 = vmatpush1.bf16.msra.mxu0 %v8500_v12  ;;  %v8587_v12 = vld [vmem:[#allocation20 + $0x110] ss:$100 sps:$4 sm:$0xff]  }
 0xa3e   :  { %4560 = vmatpush1.bf16.msra.mxu1 %v8503_v13  ;;  %4520 = vmatprep.subr.bf16.mxu0 %v8508_v14  ;;  %v8592_v13 = vld [vmem:[#allocation20 + $0x1d4] ss:$100 sps:$4 sm:$0xff]   ;;  %v8595_v14 = vld [vmem:[#allocation20 + $0x1dc] ss:$100 sps:$4 sm:$0xff]  }
 0xa3f   :  { %4561 = vmatprep.subr.bf16.mxu1 %v8511_v15  ;;  %v8590_v15 = vld [vmem:[#allocation20 + $0x1d0] ss:$100 sps:$4 sm:$0xff]  }
 0xa41   :  { %4521 = vmatpush1.bf16.msra.mxu0 %v8506_v16  ;;  %v8593_v16 = vld [vmem:[#allocation20 + $0x1d8] ss:$100 sps:$4 sm:$0xff]  }
 0xa42   :  { %4562 = vmatpush1.bf16.msra.mxu1 %v8509_v17  ;;  %4522 = vmatprep.subr.bf16.mxu0 %v8514_v18  ;;  %v8598_v17 = vld [vmem:[#allocation20 + $0x29c] ss:$100 sps:$4 sm:$0xff]   ;;  %v8601_v18 = vld [vmem:[#allocation20 + $0x2a4] ss:$100 sps:$4 sm:$0xff]  }
 0xa43   :  { %4563 = vmatprep.subr.bf16.mxu1 %v8517_v23  ;;  %v8596_v23 = vld [vmem:[#allocation20 + $0x298] ss:$100 sps:$4 sm:$0xff]  }
 0xa45   :  { %4523 = vmatpush1.bf16.msra.mxu0 %v8512_v19  ;;  %v8599_v19 = vld [vmem:[#allocation20 + $0x2a0] ss:$100 sps:$4 sm:$0xff]  }
 0xa46   :  { %4564 = vmatpush1.bf16.msra.mxu1 %v8515_v20  ;;  %4524 = vmatprep.subr.bf16.mxu0 %v8520_v21  ;;  %v8604_v20 = vld [vmem:[#allocation20 + $0x364] ss:$100 sps:$4 sm:$0xff]   ;;  %v8607_v21 = vld [vmem:[#allocation20 + $0x36c] ss:$100 sps:$4 sm:$0xff]  }
 0xa47   :  { %4565 = vmatprep.subr.bf16.mxu1 %v8523_v22  ;;  %v8602_v22 = vld [vmem:[#allocation20 + $0x360] ss:$100 sps:$4 sm:$0xff]  }
 0xa49   :  { %4525 = vmatpush1.bf16.msra.mxu0 %v8518_v24  ;;  %v8605_v24 = vld [vmem:[#allocation20 + $0x368] ss:$100 sps:$4 sm:$0xff]  }
 0xa4a   :  { %4566 = vmatpush1.bf16.msra.mxu1 %v8521_v25  ;;  %4526 = vmatprep.subr.bf16.mxu0 %v8526_v26  ;;  %v8610_v25 = vld [vmem:[#allocation20 + $0x42c] ss:$100 sps:$4 sm:$0xff]   ;;  %v8613_v26 = vld [vmem:[#allocation20 + $0x434] ss:$100 sps:$4 sm:$0xff]  }
 0xa4b   :  { %4567 = vmatprep.subr.bf16.mxu1 %v8529_v27  ;;  %v8608_v27 = vld [vmem:[#allocation20 + $0x428] ss:$100 sps:$4 sm:$0xff]  }
 0xa4d   :  { %4527 = vmatpush1.bf16.msra.mxu0 %v8524_v28  ;;  %v8611_v28 = vld [vmem:[#allocation20 + $0x430] ss:$100 sps:$4 sm:$0xff]  }
 0xa4e   :  { %4568 = vmatpush1.bf16.msra.mxu1 %v8527_v30  ;;  %4528 = vmatprep.subr.bf16.mxu0 %v8532_v32  ;;  %v8616_v30 = vld [vmem:[#allocation20 + $0x4f4] ss:$100 sps:$4 sm:$0xff]  }
 0xa4f   :  { %4569 = vmatprep.subr.bf16.mxu1 %v8535_v33 }
 0xa51   :  { %4529 = vmatpush1.bf16.msra.mxu0 %v8530_v34  ;;  %v8619_v34 = vld [vmem:[#allocation20 + $0x4fc] ss:$100 sps:$4 sm:$0xff]  }
 0xa52   :  { %4570 = vmatpush1.bf16.msra.mxu1 %v8533_v35  ;;  %4530 = vmatprep.subr.bf16.mxu0 %v8538_v36 }
 0xa53   :  { %4571 = vmatprep.subr.bf16.mxu1 %v8541_v37 }
 0xa55   :  { %4531 = vmatpush1.bf16.msra.mxu0 %v8536_v38 }
 0xa56   :  { %4572 = vmatpush1.bf16.msra.mxu1 %v8539_v39  ;;  %4532 = vmatprep.subr.bf16.mxu0 %v8544_v40  ;;  %v8614_v39 = vld [vmem:[#allocation20 + $0x4f0] ss:$100 sps:$4 sm:$0xff]  }
 0xa57   :  { %4573 = vmatprep.subr.bf16.mxu1 %v8547_v41 }
 0xa59   :  { %4533 = vmatpush1.bf16.msra.mxu0 %v8542_v42  ;;  %v8617_v42 = vld [vmem:[#allocation20 + $0x4f8] ss:$100 sps:$4 sm:$0xff]  }
 0xa5a   :  { %4574 = vmatpush1.bf16.msra.mxu1 %v8545_v43  ;;  %4534 = vmatprep.subr.bf16.mxu0 %v8550_v44  ;;  %v8622_v43 = vld [vmem:[#allocation20 + $0x5bc] ss:$100 sps:$4 sm:$0xff]   ;;  %v8625_v44 = vld [vmem:[#allocation20 + $0x5c4] ss:$100 sps:$4 sm:$0xff]  }
 0xa5b   :  { %4575 = vmatprep.subr.bf16.mxu1 %v8553_v46  ;;  %v8620_v46 = vld [vmem:[#allocation20 + $0x5b8] ss:$100 sps:$4 sm:$0xff]  }
 0xa5d   :  { %4535 = vmatpush1.bf16.msra.mxu0 %v8548_v47  ;;  %v8623_v47 = vld [vmem:[#allocation20 + $0x5c0] ss:$100 sps:$4 sm:$0xff]  }
 0xa5e   :  { %4576 = vmatpush1.bf16.msra.mxu1 %v8551_v49  ;;  %4536 = vmatprep.subr.bf16.mxu0 %v8556_v50  ;;  %v8628_v49 = vld [vmem:[#allocation20 + $0x684] ss:$100 sps:$4 sm:$0xff]   ;;  %v8631_v50 = vld [vmem:[#allocation20 + $0x68c] ss:$100 sps:$4 sm:$0xff]  }
 0xa5f   :  { %4577 = vmatprep.subr.bf16.mxu1 %v8559_v51  ;;  %v8626_v51 = vld [vmem:[#allocation20 + $0x680] ss:$100 sps:$4 sm:$0xff]  }
 0xa61   :  { %4537 = vmatpush1.bf16.msra.mxu0 %v8554_v52  ;;  %v8629_v52 = vld [vmem:[#allocation20 + $0x688] ss:$100 sps:$4 sm:$0xff]  }
 0xa62   :  { %4578 = vmatpush1.bf16.msra.mxu1 %v8557_v53  ;;  %4538 = vmatprep.subr.bf16.mxu0 %v8562_v54  ;;  %v8634_v53 = vld [vmem:[#allocation20 + $0x74c] ss:$100 sps:$4 sm:$0xff]   ;;  %v8637_v54 = vld [vmem:[#allocation20 + $0x754] ss:$100 sps:$4 sm:$0xff]  }
 0xa63   :  { %4579 = vmatprep.subr.bf16.mxu1 %v8565_v55  ;;  %v8632_v55 = vld [vmem:[#allocation20 + $0x748] ss:$100 sps:$4 sm:$0xff]  }
 0xa65   :  { %4539 = vmatpush1.bf16.msra.mxu0 %v8560_v56  ;;  %v8635_v56 = vld [vmem:[#allocation20 + $0x750] ss:$100 sps:$4 sm:$0xff]  }
 0xa66   :  { %4580 = vmatpush1.bf16.msra.mxu1 %v8563_v59  ;;  %4540 = vmatprep.subr.bf16.mxu0 %v8568_v60  ;;  %v8640_v59 = vld [vmem:[#allocation20 + $0x814] ss:$100 sps:$4 sm:$0xff]   ;;  %v8643_v60 = vld [vmem:[#allocation20 + $0x81c] ss:$100 sps:$4 sm:$0xff]  }
 0xa67   :  { %4581 = vmatprep.subr.bf16.mxu1 %v8571_v61  ;;  %v8638_v61 = vld [vmem:[#allocation20 + $0x810] ss:$100 sps:$4 sm:$0xff]  }
 0xa69   :  { %4541 = vmatpush1.bf16.msra.mxu0 %v8566_v62  ;;  %v8641_v62 = vld [vmem:[#allocation20 + $0x818] ss:$100 sps:$4 sm:$0xff]  }
 0xa6a   :  { %4582 = vmatpush1.bf16.msra.mxu1 %v8569_v63  ;;  %4542 = vmatprep.subr.bf16.mxu0 %v8574_v0  ;;  %v8646_v63 = vld [vmem:[#allocation20 + $0x8dc] ss:$100 sps:$4 sm:$0xff]   ;;  %v8649_v0 = vld [vmem:[#allocation20 + $0x8e4] ss:$100 sps:$4 sm:$0xff]  }
 0xa6b   :  { %4583 = vmatprep.subr.bf16.mxu1 %v8577_v1  ;;  %v8644_v1 = vld [vmem:[#allocation20 + $0x8d8] ss:$100 sps:$4 sm:$0xff]  }
 0xa6d   :  { %4543 = vmatpush1.bf16.msra.mxu0 %v8572_v2  ;;  %v8647_v2 = vld [vmem:[#allocation20 + $0x8e0] ss:$100 sps:$4 sm:$0xff]  }
 0xa6e   :  { %4584 = vmatpush1.bf16.msra.mxu1 %v8575_v3  ;;  %4594 = vmatprep.subr.bf16.mxu0 %v8580_v4  ;;  %v8652_v3 = vld [vmem:[#allocation20 + $0x9a4] ss:$100 sps:$4 sm:$0xff]   ;;  %v8655_v4 = vld [vmem:[#allocation20 + $0x9ac] ss:$100 sps:$4 sm:$0xff]  }
 0xa6f   :  { %4635 = vmatprep.subr.bf16.mxu1 %v8583_v5  ;;  %v8650_v5 = vld [vmem:[#allocation20 + $0x9a0] ss:$100 sps:$4 sm:$0xff]  }
 0xa70   :  { %4545 = vmatmul.mubr.bf16.vlgmr.msra.gmra.mrb[24].mxu0 %v10166_v48 }
 0xa71   :  { %4586 = vmatmul.mubr.bf16.vlgmr.msra.gmra.mrb[36].mxu1 %v10166_v48  ;;  %4595 = vmatpush1.bf16.msra.mxu0 %v8578_v7  ;;  %v8653_v7 = vld [vmem:[#allocation20 + $0x9a8] ss:$100 sps:$4 sm:$0xff]  }
 0xa72   :  { %4626 = vmatprep.mubr.bf16.mxu0 %v10164_v45  ;;  %4636 = vmatpush1.bf16.msra.mxu1 %v8581_v8  ;;  %v8658_v8 = vld [vmem:[#allocation20 + $0xa6c] ss:$100 sps:$4 sm:$0xff]  }
 0xa73   :  { %4667 = vmatprep.mubr.bf16.mxu1 %v10164_v45  ;;  %4596 = vmatprep.subr.bf16.mxu0 %v8586_v9  ;;  %v8661_v9 = vld [vmem:[#allocation20 + $0xa74] ss:$100 sps:$4 sm:$0xff]  }
 0xa74   :  { %4637 = vmatprep.subr.bf16.mxu1 %v8589_v10  ;;  %v8656_v10 = vld [vmem:[#allocation20 + $0xa68] ss:$100 sps:$4 sm:$0xff]  }
 0xa75   :  { %4597 = vmatpush1.bf16.msra.mxu0 %v8584_v11  ;;  %v8659_v11 = vld [vmem:[#allocation20 + $0xa70] ss:$100 sps:$4 sm:$0xff]  }
 0xa76   :  { %4638 = vmatpush1.bf16.msra.mxu1 %v8587_v12  ;;  %4598 = vmatprep.subr.bf16.mxu0 %v8592_v13  ;;  %v8664_v12 = vld [vmem:[#allocation20 + $0xb34] ss:$100 sps:$4 sm:$0xff]   ;;  %v8667_v13 = vld [vmem:[#allocation20 + $0xb3c] ss:$100 sps:$4 sm:$0xff]  }
 0xa77   :  { %4639 = vmatprep.subr.bf16.mxu1 %v8595_v14  ;;  %v8662_v14 = vld [vmem:[#allocation20 + $0xb30] ss:$100 sps:$4 sm:$0xff]  }
 0xa79   :  { %4599 = vmatpush1.bf16.msra.mxu0 %v8590_v15  ;;  %v8665_v15 = vld [vmem:[#allocation20 + $0xb38] ss:$100 sps:$4 sm:$0xff]  }
 0xa7a   :  { %4640 = vmatpush1.bf16.msra.mxu1 %v8593_v16  ;;  %4600 = vmatprep.subr.bf16.mxu0 %v8598_v17  ;;  %v8670_v16 = vld [vmem:[#allocation20 + $0xbfc] ss:$100 sps:$4 sm:$0xff]   ;;  %v8673_v17 = vld [vmem:[#allocation20 + $0xc04] ss:$100 sps:$4 sm:$0xff]  }
 0xa7b   :  { %4641 = vmatprep.subr.bf16.mxu1 %v8601_v18  ;;  %v8668_v18 = vld [vmem:[#allocation20 + $0xbf8] ss:$100 sps:$4 sm:$0xff]  }
 0xa7d   :  { %4601 = vmatpush1.bf16.msra.mxu0 %v8596_v23  ;;  %v8671_v23 = vld [vmem:[#allocation20 + $0xc00] ss:$100 sps:$4 sm:$0xff]  }
 0xa7e   :  { %4642 = vmatpush1.bf16.msra.mxu1 %v8599_v19  ;;  %4602 = vmatprep.subr.bf16.mxu0 %v8604_v20  ;;  %v8676_v19 = vld [vmem:[#allocation20 + $0x54] ss:$100 sps:$4 sm:$0xff]   ;;  %v8679_v20 = vld [vmem:[#allocation20 + $0x5c] ss:$100 sps:$4 sm:$0xff]  }
 0xa7f   :  { %4643 = vmatprep.subr.bf16.mxu1 %v8607_v21  ;;  %v8674_v21 = vld [vmem:[#allocation20 + $0x50] ss:$100 sps:$4 sm:$0xff]  }
 0xa81   :  { %4603 = vmatpush1.bf16.msra.mxu0 %v8602_v22  ;;  %v8677_v22 = vld [vmem:[#allocation20 + $0x58] ss:$100 sps:$4 sm:$0xff]  }
 0xa82   :  { %4644 = vmatpush1.bf16.msra.mxu1 %v8605_v24  ;;  %4604 = vmatprep.subr.bf16.mxu0 %v8610_v25  ;;  %v8682_v24 = vld [vmem:[#allocation20 + $0x11c] ss:$100 sps:$4 sm:$0xff]   ;;  %v8685_v25 = vld [vmem:[#allocation20 + $0x124] ss:$100 sps:$4 sm:$0xff]  }
 0xa83   :  { %v10186_v32 = vpop.f32.mrb[12].mxu0  ;;  %v10188_v33 = vpop.f32.mrb[24].mxu1  ;;  %4645 = vmatprep.subr.bf16.mxu1 %v8613_v26  ;;  %v8680_v26 = vld [vmem:[#allocation20 + $0x118] ss:$100 sps:$4 sm:$0xff]  }
 0xa84   :  { %v10190_v35 = vpop.f32.mrb[13].mxu0  ;;  %v10192_v36 = vpop.f32.mrb[25].mxu1 }
 0xa85   :  { %4605 = vmatpush1.bf16.msra.mxu0 %v8608_v27  ;;  %v4304_v37 = vpop.f32.mrb[14].mxu0  ;;  %v4345_v38 = vpop.f32.mrb[26].mxu1  ;;  %v8683_v27 = vld [vmem:[#allocation20 + $0x120] ss:$100 sps:$4 sm:$0xff]  }
 0xa86   :  { %4646 = vmatpush1.bf16.msra.mxu1 %v8611_v28  ;;  %v4305_v40 = vpop.f32.mrb[15].mxu0  ;;  %v4346_v41 = vpop.f32.mrb[27].mxu1  ;;  %4606 = vmatprep.subr.bf16.mxu0 %v8616_v30  ;;  %v8688_v28 = vld [vmem:[#allocation20 + $0x1e4] ss:$100 sps:$4 sm:$0xff]   ;;  %v8691_v30 = vld [vmem:[#allocation20 + $0x1ec] ss:$100 sps:$4 sm:$0xff]  }
 0xa87   :  { %4647 = vmatprep.subr.bf16.mxu1 %v8619_v34  ;;  %v8686_v34 = vld [vmem:[#allocation20 + $0x1e0] ss:$100 sps:$4 sm:$0xff]   ;;  %v8689_v37 = vld [vmem:[#allocation20 + $0x1e8] ss:$100 sps:$4 sm:$0xff]   ;;  %v8695_v41 = vld [vmem:[#allocation20 + $0x2b0] ss:$100 sps:$4 sm:$0xff]  }
 0xa88   :  { %v8694_v38 = vld [vmem:[#allocation20 + $0x2ac] ss:$100 sps:$4 sm:$0xff]  }
 0xa89   :  { %4607 = vmatpush1.bf16.msra.mxu0 %v8614_v39  ;;  %v8697_v39 = vld [vmem:[#allocation20 + $0x2b4] ss:$100 sps:$4 sm:$0xff]   ;;  %v8692_v40 = vld [vmem:[#allocation20 + $0x2a8] ss:$100 sps:$4 sm:$0xff]  }
 0xa8a   :  { %4648 = vmatpush1.bf16.msra.mxu1 %v8617_v42  ;;  %4608 = vmatprep.subr.bf16.mxu0 %v8622_v43  ;;  %v8700_v42 = vld [vmem:[#allocation20 + $0x374] ss:$100 sps:$4 sm:$0xff]   ;;  %v8703_v43 = vld [vmem:[#allocation20 + $0x37c] ss:$100 sps:$4 sm:$0xff]  }
 0xa8b   :  { %4649 = vmatprep.subr.bf16.mxu1 %v8625_v44  ;;  %v8698_v44 = vld [vmem:[#allocation20 + $0x370] ss:$100 sps:$4 sm:$0xff]  }
 0xa8d   :  { %4609 = vmatpush1.bf16.msra.mxu0 %v8620_v46  ;;  %v8701_v46 = vld [vmem:[#allocation20 + $0x378] ss:$100 sps:$4 sm:$0xff]  }
 0xa8e   :  { %4650 = vmatpush1.bf16.msra.mxu1 %v8623_v47  ;;  %4610 = vmatprep.subr.bf16.mxu0 %v8628_v49  ;;  %v8706_v47 = vld [vmem:[#allocation20 + $0x43c] ss:$100 sps:$4 sm:$0xff]   ;;  %v8709_v49 = vld [vmem:[#allocation20 + $0x444] ss:$100 sps:$4 sm:$0xff]  }
 0xa8f   :  { %4651 = vmatprep.subr.bf16.mxu1 %v8631_v50  ;;  %v8704_v50 = vld [vmem:[#allocation20 + $0x438] ss:$100 sps:$4 sm:$0xff]  }
 0xa91   :  { %4611 = vmatpush1.bf16.msra.mxu0 %v8626_v51  ;;  %v8707_v51 = vld [vmem:[#allocation20 + $0x440] ss:$100 sps:$4 sm:$0xff]  }
 0xa92   :  { %4652 = vmatpush1.bf16.msra.mxu1 %v8629_v52  ;;  %4612 = vmatprep.subr.bf16.mxu0 %v8634_v53  ;;  %v8712_v52 = vld [vmem:[#allocation20 + $0x504] ss:$100 sps:$4 sm:$0xff]  }
 0xa93   :  { %4653 = vmatprep.subr.bf16.mxu1 %v8637_v54 }
 0xa95   :  { %4613 = vmatpush1.bf16.msra.mxu0 %v8632_v55  ;;  %v8715_v55 = vld [vmem:[#allocation20 + $0x50c] ss:$100 sps:$4 sm:$0xff]  }
 0xa96   :  { %4654 = vmatpush1.bf16.msra.mxu1 %v8635_v56  ;;  %4614 = vmatprep.subr.bf16.mxu0 %v8640_v59 }
 0xa97   :  { %4655 = vmatprep.subr.bf16.mxu1 %v8643_v60 }
 0xa99   :  { %4615 = vmatpush1.bf16.msra.mxu0 %v8638_v61 }
 0xa9a   :  { %4656 = vmatpush1.bf16.msra.mxu1 %v8641_v62  ;;  %4616 = vmatprep.subr.bf16.mxu0 %v8646_v63  ;;  %v8710_v62 = vld [vmem:[#allocation20 + $0x500] ss:$100 sps:$4 sm:$0xff]  }
 0xa9b   :  { %4657 = vmatprep.subr.bf16.mxu1 %v8649_v0 }
 0xa9d   :  { %4617 = vmatpush1.bf16.msra.mxu0 %v8644_v1  ;;  %v8713_v1 = vld [vmem:[#allocation20 + $0x508] ss:$100 sps:$4 sm:$0xff]  }
 0xa9e   :  { %4658 = vmatpush1.bf16.msra.mxu1 %v8647_v2  ;;  %4618 = vmatprep.subr.bf16.mxu0 %v8652_v3  ;;  %v8718_v2 = vld [vmem:[#allocation20 + $0x5cc] ss:$100 sps:$4 sm:$0xff]   ;;  %v8721_v3 = vld [vmem:[#allocation20 + $0x5d4] ss:$100 sps:$4 sm:$0xff]  }
 0xa9f   :  { %4659 = vmatprep.subr.bf16.mxu1 %v8655_v4  ;;  %v8716_v4 = vld [vmem:[#allocation20 + $0x5c8] ss:$100 sps:$4 sm:$0xff]  }
 0xaa1   :  { %4619 = vmatpush1.bf16.msra.mxu0 %v8650_v5  ;;  %v8719_v5 = vld [vmem:[#allocation20 + $0x5d0] ss:$100 sps:$4 sm:$0xff]  }
 0xaa2   :  { %4660 = vmatpush1.bf16.msra.mxu1 %v8653_v7  ;;  %4620 = vmatprep.subr.bf16.mxu0 %v8658_v8  ;;  %v8724_v7 = vld [vmem:[#allocation20 + $0x694] ss:$100 sps:$4 sm:$0xff]   ;;  %v8727_v8 = vld [vmem:[#allocation20 + $0x69c] ss:$100 sps:$4 sm:$0xff]  }
 0xaa3   :  { %4661 = vmatprep.subr.bf16.mxu1 %v8661_v9  ;;  %v8722_v9 = vld [vmem:[#allocation20 + $0x690] ss:$100 sps:$4 sm:$0xff]  }
 0xaa5   :  { %4621 = vmatpush1.bf16.msra.mxu0 %v8656_v10  ;;  %v8725_v10 = vld [vmem:[#allocation20 + $0x698] ss:$100 sps:$4 sm:$0xff]  }
 0xaa6   :  { %4662 = vmatpush1.bf16.msra.mxu1 %v8659_v11  ;;  %4622 = vmatprep.subr.bf16.mxu0 %v8664_v12  ;;  %v8730_v11 = vld [vmem:[#allocation20 + $0x75c] ss:$100 sps:$4 sm:$0xff]   ;;  %v8733_v12 = vld [vmem:[#allocation20 + $0x764] ss:$100 sps:$4 sm:$0xff]  }
 0xaa7   :  { %4663 = vmatprep.subr.bf16.mxu1 %v8667_v13  ;;  %v8728_v13 = vld [vmem:[#allocation20 + $0x758] ss:$100 sps:$4 sm:$0xff]  }
 0xaa9   :  { %4623 = vmatpush1.bf16.msra.mxu0 %v8662_v14  ;;  %v8731_v14 = vld [vmem:[#allocation20 + $0x760] ss:$100 sps:$4 sm:$0xff]  }
 0xaaa   :  { %4664 = vmatpush1.bf16.msra.mxu1 %v8665_v15  ;;  %4624 = vmatprep.subr.bf16.mxu0 %v8670_v16  ;;  %v8736_v15 = vld [vmem:[#allocation20 + $0x824] ss:$100 sps:$4 sm:$0xff]   ;;  %v8739_v16 = vld [vmem:[#allocation20 + $0x82c] ss:$100 sps:$4 sm:$0xff]  }
 0xaab   :  { %4665 = vmatprep.subr.bf16.mxu1 %v8673_v17  ;;  %v8734_v17 = vld [vmem:[#allocation20 + $0x820] ss:$100 sps:$4 sm:$0xff]  }
 0xaad   :  { %4625 = vmatpush1.bf16.msra.mxu0 %v8668_v18  ;;  %v8737_v18 = vld [vmem:[#allocation20 + $0x828] ss:$100 sps:$4 sm:$0xff]  }
 0xaae   :  { %4666 = vmatpush1.bf16.msra.mxu1 %v8671_v23  ;;  %4676 = vmatprep.subr.bf16.mxu0 %v8676_v19  ;;  %v8742_v23 = vld [vmem:[#allocation20 + $0x8ec] ss:$100 sps:$4 sm:$0xff]   ;;  %v8745_v19 = vld [vmem:[#allocation20 + $0x8f4] ss:$100 sps:$4 sm:$0xff]  }
 0xaaf   :  { %4717 = vmatprep.subr.bf16.mxu1 %v8679_v20  ;;  %v8740_v20 = vld [vmem:[#allocation20 + $0x8e8] ss:$100 sps:$4 sm:$0xff]  }
 0xab0   :  { %4627 = vmatmul.mubr.bf16.vlgmr.msra.gmra.mrb[28].mxu0 %v10166_v48 }
 0xab1   :  { %4668 = vmatmul.mubr.bf16.vlgmr.msra.gmra.mrb[40].mxu1 %v10166_v48  ;;  %4677 = vmatpush1.bf16.msra.mxu0 %v8674_v21  ;;  %v8743_v21 = vld [vmem:[#allocation20 + $0x8f0] ss:$100 sps:$4 sm:$0xff]  }
 0xab2   :  { %4708 = vmatprep.mubr.bf16.mxu0 %v10164_v45  ;;  %4718 = vmatpush1.bf16.msra.mxu1 %v8677_v22  ;;  %v8748_v22 = vld [vmem:[#allocation20 + $0x9b4] ss:$100 sps:$4 sm:$0xff]  }
 0xab3   :  { %4749 = vmatprep.mubr.bf16.mxu1 %v10164_v45  ;;  %4678 = vmatprep.subr.bf16.mxu0 %v8682_v24  ;;  %v8751_v24 = vld [vmem:[#allocation20 + $0x9bc] ss:$100 sps:$4 sm:$0xff]  }
 0xab4   :  { %4719 = vmatprep.subr.bf16.mxu1 %v8685_v25  ;;  %v8746_v25 = vld [vmem:[#allocation20 + $0x9b0] ss:$100 sps:$4 sm:$0xff]  }
 0xab5   :  { %4679 = vmatpush1.bf16.msra.mxu0 %v8680_v26  ;;  %v8749_v26 = vld [vmem:[#allocation20 + $0x9b8] ss:$100 sps:$4 sm:$0xff]  }
 0xab6   :  { %4720 = vmatpush1.bf16.msra.mxu1 %v8683_v27  ;;  %4680 = vmatprep.subr.bf16.mxu0 %v8688_v28  ;;  %v8754_v27 = vld [vmem:[#allocation20 + $0xa7c] ss:$100 sps:$4 sm:$0xff]   ;;  %v8757_v28 = vld [vmem:[#allocation20 + $0xa84] ss:$100 sps:$4 sm:$0xff]  }
 0xab7   :  { %4721 = vmatprep.subr.bf16.mxu1 %v8691_v30  ;;  %v8752_v30 = vld [vmem:[#allocation20 + $0xa78] ss:$100 sps:$4 sm:$0xff]  }
 0xab9   :  { %4681 = vmatpush1.bf16.msra.mxu0 %v8686_v34  ;;  %v8755_v34 = vld [vmem:[#allocation20 + $0xa80] ss:$100 sps:$4 sm:$0xff]  }
 0xaba   :  { %4722 = vmatpush1.bf16.msra.mxu1 %v8689_v37  ;;  %4682 = vmatprep.subr.bf16.mxu0 %v8694_v38  ;;  %v8760_v37 = vld [vmem:[#allocation20 + $0xb44] ss:$100 sps:$4 sm:$0xff]   ;;  %v8763_v38 = vld [vmem:[#allocation20 + $0xb4c] ss:$100 sps:$4 sm:$0xff]  }
 0xabb   :  { %4723 = vmatprep.subr.bf16.mxu1 %v8697_v39  ;;  %v8758_v39 = vld [vmem:[#allocation20 + $0xb40] ss:$100 sps:$4 sm:$0xff]  }
 0xabd   :  { %4683 = vmatpush1.bf16.msra.mxu0 %v8692_v40  ;;  %v8761_v40 = vld [vmem:[#allocation20 + $0xb48] ss:$100 sps:$4 sm:$0xff]  }
 0xabe   :  { %4724 = vmatpush1.bf16.msra.mxu1 %v8695_v41  ;;  %4684 = vmatprep.subr.bf16.mxu0 %v8700_v42  ;;  %v8766_v41 = vld [vmem:[#allocation20 + $0xc0c] ss:$100 sps:$4 sm:$0xff]   ;;  %v8769_v42 = vld [vmem:[#allocation20 + $0xc14] ss:$100 sps:$4 sm:$0xff]  }
 0xabf   :  { %4725 = vmatprep.subr.bf16.mxu1 %v8703_v43  ;;  %v8764_v43 = vld [vmem:[#allocation20 + $0xc08] ss:$100 sps:$4 sm:$0xff]  }
 0xac1   :  { %4685 = vmatpush1.bf16.msra.mxu0 %v8698_v44  ;;  %v8767_v44 = vld [vmem:[#allocation20 + $0xc10] ss:$100 sps:$4 sm:$0xff]  }
 0xac2   :  { %4726 = vmatpush1.bf16.msra.mxu1 %v8701_v46  ;;  %4686 = vmatprep.subr.bf16.mxu0 %v8706_v47  ;;  %v8770_v46 = vld [vmem:[#allocation20 + $0x6a0] ss:$100 sps:$4 sm:$0xff]  }
 0xac3   :  { %v10198_v53 = vpop.f32.mrb[16].mxu0  ;;  %v10200_v54 = vpop.f32.mrb[28].mxu1  ;;  %4727 = vmatprep.subr.bf16.mxu1 %v8709_v49  ;;  %v8771_v47 = vld [vmem:[#allocation20 + $0x60] ss:$100 sps:$4 sm:$0xff]  }
 0xac4   :  { %v10202_v56 = vpop.f32.mrb[17].mxu0  ;;  %v10204_v59 = vpop.f32.mrb[29].mxu1  ;;  %v10206_v49 = vld [vmem:[#allocation23] sm:$0xff]  }
 0xac5   :  { %v4386_v60 = vpop.f32.mrb[18].mxu0  ;;  %v4427_v61 = vpop.f32.mrb[30].mxu1  ;;  %4687 = vmatpush1.bf16.msra.mxu0 %v8704_v50  ;;  %v8773_v50 = vld [vmem:[#allocation20 + $0x768] ss:$100 sps:$4 sm:$0xff]  }
 0xac6   :  { %4728 = vmatpush1.bf16.msra.mxu1 %v8707_v51  ;;  %v4387_v63 = vpop.f32.mrb[19].mxu0  ;;  %v4428_v0 = vpop.f32.mrb[31].mxu1  ;;  %4688 = vmatprep.subr.bf16.mxu0 %v8712_v52  ;;  %v8774_v51 = vld [vmem:[#allocation20 + $0x128] ss:$100 sps:$4 sm:$0xff]   ;;  %v8777_v60 = vld [vmem:[#allocation20 + $0x1f0] ss:$100 sps:$4 sm:$0xff]  }
 0xac7   :  { %4729 = vmatprep.subr.bf16.mxu1 %v8715_v55  ;;  %v10213_v52 = vld [vmem:[#allocation23 + $0x8] sm:$0xff]   ;;  %v8776_v55 = vld [vmem:[#allocation20 + $0x830] ss:$100 sps:$4 sm:$0xff]  }
 0xac8   :  { %v10219_v61 = vld [vmem:[#allocation23 + $0x10] sm:$0xff]   ;;  %v10223_v63 = vld [vmem:[#allocation23 + $0x18] sm:$0xff]   ;;  %v8782_v0 = vld [vmem:[#allocation20 + $0x9c0] ss:$100 sps:$4 sm:$0xff]  }
 0xac9   :  { %4689 = vmatpush1.bf16.msra.mxu0 %v8710_v62  ;;  %v8779_v62 = vld [vmem:[#allocation20 + $0x8f8] ss:$100 sps:$4 sm:$0xff]  }
 0xaca   :  { %4730 = vmatpush1.bf16.msra.mxu1 %v8713_v1  ;;  %4690 = vmatprep.subr.bf16.mxu0 %v8718_v2  ;;  %v8783_v1 = vld [vmem:[#allocation20 + $0x380] ss:$100 sps:$4 sm:$0xff]  }
 0xacb   :  { %4731 = vmatprep.subr.bf16.mxu1 %v8721_v3  ;;  %v10227_v2 = vld [vmem:[#allocation23 + $0x20] sm:$0xff]   ;;  %v8785_v3 = vld [vmem:[#allocation20 + $0xa88] ss:$100 sps:$4 sm:$0xff]  }
 0xacd   :  { %4691 = vmatpush1.bf16.msra.mxu0 %v8716_v4  ;;  %v10230_v4 = vld [vmem:[#allocation22] sm:$0xff] }
 0xace   :  { %4732 = vmatpush1.bf16.msra.mxu1 %v8719_v5  ;;  %4692 = vmatprep.subr.bf16.mxu0 %v8724_v7  ;;  %v8786_v5 = vld [vmem:[#allocation20 + $0x448] ss:$100 sps:$4 sm:$0xff]  }
 0xacf   :  { %4733 = vmatprep.subr.bf16.mxu1 %v8727_v8  ;;  %v10233_v7 = vld [vmem:[#allocation23 + $0x28] sm:$0xff]   ;;  %v8788_v8 = vld [vmem:[#allocation20 + $0xb50] ss:$100 sps:$4 sm:$0xff]  }
 0xad1   :  { %4693 = vmatpush1.bf16.msra.mxu0 %v8722_v9  ;;  %v2128_v9 = vrot.slane %v10230_v4, %v10122_v57 }
 0xad2   :  { %4734 = vmatpush1.bf16.msra.mxu1 %v8725_v10  ;;  %4694 = vmatprep.subr.bf16.mxu0 %v8730_v11 }
 0xad3   :  { %4735 = vmatprep.subr.bf16.mxu1 %v8733_v12 }
 0xad5   :  { %4695 = vmatpush1.bf16.msra.mxu0 %v8728_v13 }
 0xad6   :  { %4736 = vmatpush1.bf16.msra.mxu1 %v8731_v14  ;;  %4696 = vmatprep.subr.bf16.mxu0 %v8736_v15  ;;  %v8789_v15 = vld [vmem:[#allocation20 + $0x510] ss:$100 sps:$4 sm:$0xff]  }
 0xad7   :  { %4737 = vmatprep.subr.bf16.mxu1 %v8739_v16 }
 0xad9   :  { %4697 = vmatpush1.bf16.msra.mxu0 %v8734_v17 }
 0xada   :  { %4738 = vmatpush1.bf16.msra.mxu1 %v8737_v18  ;;  %4698 = vmatprep.subr.bf16.mxu0 %v8742_v23  ;;  %v10247_v18 = vld [vmem:[#allocation23 + $0x30] sm:$0xff]   ;;  %v8791_v23 = vld [vmem:[#allocation20 + $0xc18] ss:$100 sps:$4 sm:$0xff]  }
 0xadb   :  { %4739 = vmatprep.subr.bf16.mxu1 %v8745_v19  ;;  %v4301_v19 = vadd.f32 %v10186_v32, %v2128_v9  ;;  %v2132_v32 = vrot.slane %v10230_v4, %v10140_v31 }
 0xadd   :  { %4699 = vmatpush1.bf16.msra.mxu0 %v8740_v20 }
 0xade   :  { %4740 = vmatpush1.bf16.msra.mxu1 %v8743_v21  ;;  %4700 = vmatprep.subr.bf16.mxu0 %v8748_v22  ;;  %v8792_v21 = vld [vmem:[#allocation20 + $0x5d8] ss:$100 sps:$4 sm:$0xff]  }
 0xadf   :  { %4741 = vmatprep.subr.bf16.mxu1 %v8751_v24  ;;  %v10252_v22 = vld [vmem:[#allocation23 + $0x38] sm:$0xff]   ;;  %v4798_v24 = vmax.f32 %v4301_v19, 0.0 }
 0xae1   :  { %4701 = vmatpush1.bf16.msra.mxu0 %v8746_v25  ;;  %v4823_v25 = vpack.c.bf16 %v4798_v24, %v4798_v24 }
 0xae2   :  { %4742 = vmatpush1.bf16.msra.mxu1 %v8749_v26  ;;  %4702 = vmatprep.subr.bf16.mxu0 %v8754_v27  ;;  %v4303_v27 = vadd.f32 %v10190_v35, %v2132_v32 }
 0xae3   :  { %4743 = vmatprep.subr.bf16.mxu1 %v8757_v28 }
 0xae5   :  { %4703 = vmatpush1.bf16.msra.mxu0 %v8752_v30  ;;  %v4799_v30 = vmax.f32 %v4303_v27, 0.0 }
 0xae6   :  { %4744 = vmatpush1.bf16.msra.mxu1 %v8755_v34  ;;  %4704 = vmatprep.subr.bf16.mxu0 %v8760_v37  ;;  %v10322_v37 = vsub.s32 3, %v10064_v29 }
 0xae7   :  { %4745 = vmatprep.subr.bf16.mxu1 %v8763_v38  ;;  %v4824_v35 = vpack.c.bf16 %v4799_v30, %v4799_v30  ;;  %v10327_v38 = vsub.s32 4, %v10064_v29 }
 0xae9   :  { %4705 = vmatpush1.bf16.msra.mxu0 %v8758_v39  ;;  %v2140_v39 = vrot.slane %v10230_v4, %v10322_v37 }
 0xaea   :  { %4746 = vmatpush1.bf16.msra.mxu1 %v8761_v40  ;;  %4706 = vmatprep.subr.bf16.mxu0 %v8766_v41  ;;  %v2144_v40 = vrot.slane %v10230_v4, %v10327_v38 }
 0xaeb   :  { %4747 = vmatprep.subr.bf16.mxu1 %v8769_v42 }
 0xaed   :  { %4707 = vmatpush1.bf16.msra.mxu0 %v8764_v43 }
 0xaee   :  { %4748 = vmatpush1.bf16.msra.mxu1 %v8767_v44  ;;  %7158 = vmatprep.subr.bf16.mxu0 %v8770_v46 }
 0xaef   :  { %7480 = vmatprep.subr.bf16.mxu1 %v9647_v6 }
 0xaf0   :  { %4709 = vmatmul.mubr.bf16.vlgmr.msra.gmra.mrb[32].mxu0 %v10166_v48 }
 0xaf1   :  { %4750 = vmatmul.mubr.bf16.vlgmr.msra.gmra.mrb[44].mxu1 %v10166_v48  ;;  %7159 = vmatpush3.bf16.msra.mxu0 %v8771_v47  ;;  %v4344_v47 = vadd.f32 %v10192_v36, %v2140_v39 }
 0xaf2   :  { %4790 = vmatprep.mubr.bf16.mxu0 %v10164_v45  ;;  %7481 = vmatpush3.bf16.msra.mxu1 %v10206_v49  ;;  %v8780_v45 = vld [vmem:[#allocation20 + $0x2b8] ss:$100 sps:$4 sm:$0xff]  }
 0xaf3   :  { %7160 = vmatprep.subr.bf16.mxu0 %v8773_v50  ;;  %7482 = vmatprep.subr.bf16.mxu1 %v9647_v6 }
 0xaf4   :  { %7496 = vmatprep.mubr.msk.bf16.mxu1 %vm9648_vm0, %v9647_v6 }
 0xaf5   :  { %7161 = vmatpush3.bf16.msra.mxu0 %v8774_v51 }
 0xaf6   :  { %7483 = vmatpush3.bf16.msra.mxu1 %v10213_v52  ;;  %7162 = vmatprep.subr.bf16.mxu0 %v8776_v55  ;;  %v4383_v55 = vadd.f32 %v10198_v53, %v2144_v40 }
 0xaf7   :  { %7484 = vmatprep.subr.bf16.mxu1 %v9647_v6 }
 0xaf9   :  { %7163 = vmatpush3.bf16.msra.mxu0 %v8777_v60 }
 0xafa   :  { %7485 = vmatpush3.bf16.msra.mxu1 %v10219_v61  ;;  %7164 = vmatprep.subr.bf16.mxu0 %v8779_v62  ;;  %v4801_v62 = vmax.f32 %v4344_v47, 0.0 }
 0xafb   :  { %7486 = vmatprep.subr.bf16.mxu1 %v9647_v6 }
 0xafc   :  { %v4826_v36 = vpack.c.bf16 %v4801_v62, %v4801_v62 }
 0xafd   :  { %7165 = vmatpush3.bf16.msra.mxu0 %v8780_v45  ;;  %v4802_v45 = vmax.f32 %v4383_v55, 0.0 }
 0xafe   :  { %7487 = vmatpush3.bf16.msra.mxu1 %v10223_v63  ;;  %7166 = vmatprep.subr.bf16.mxu0 %v8782_v0  ;;  %v10378_v0 = vsub.s32 5, %v10064_v29 }
 0xaff   :  { %7488 = vmatprep.subr.bf16.mxu1 %v9647_v6  ;;  %v4827_v53 = vpack.c.bf16 %v4802_v45, %v4802_v45 }
 0xb01   :  { %7167 = vmatpush3.bf16.msra.mxu0 %v8783_v1  ;;  %v10383_v1 = vsub.s32 6, %v10064_v29 }
 0xb02   :  { %7489 = vmatpush3.bf16.msra.mxu1 %v10227_v2  ;;  %7168 = vmatprep.subr.bf16.mxu0 %v8785_v3  ;;  %v2148_v3 = vrot.slane %v10230_v4, %v10378_v0 }
 0xb03   :  { %v10237_v10 = vpop.f32.mrb[20].mxu0  ;;  %7490 = vmatprep.subr.bf16.mxu1 %v9647_v6 }
 0xb04   :  { %v10240_v11 = vpop.f32.mrb[32].mxu1  ;;  %v10242_v12 = vpop.f32.mrb[21].mxu0 }
 0xb05   :  { %v10244_v13 = vpop.f32.mrb[33].mxu1  ;;  %v4468_v14 = vpop.f32.mrb[22].mxu0  ;;  %7169 = vmatpush3.bf16.msra.mxu0 %v8786_v5  ;;  %v2152_v5 = vrot.slane %v10230_v4, %v10383_v1 }
 0xb06   :  { %v4509_v16 = vpop.f32.mrb[34].mxu1  ;;  %7491 = vmatpush3.bf16.msra.mxu1 %v10233_v7  ;;  %v4469_v17 = vpop.f32.mrb[23].mxu0  ;;  %7170 = vmatprep.subr.bf16.mxu0 %v8788_v8  ;;  %v4385_v8 = vadd.f32 %v10202_v56, %v2148_v3 }
 0xb07   :  { %v4510_v20 = vpop.f32.mrb[35].mxu1  ;;  %7492 = vmatprep.subr.bf16.mxu1 %v9647_v6  ;;  %v4424_v9 = vadd.f32 %v10200_v54, %v2152_v5  ;;  %v10426_v16 = vsub.s32 7, %v10064_v29  ;;  %v10431_v17 = vld [vmem:[#allocation22 + $0x8] sm:$0xff] }
 0xb08   :  { %v4803_v14 = vmax.f32 %v4385_v8, 0.0 }
 0xb09   :  { %7171 = vmatpush3.bf16.msra.mxu0 %v8789_v15  ;;  %v4804_v15 = vmax.f32 %v4424_v9, 0.0 }
 0xb0a   :  { %7493 = vmatpush3.bf16.msra.mxu1 %v10247_v18  ;;  %7172 = vmatprep.subr.bf16.mxu0 %v8791_v23  ;;  %v4828_v56 = vpack.c.bf16 %v4803_v14, %v4803_v14  ;;  %v2156_v23 = vrot.slane %v10230_v4, %v10426_v16 }
 0xb0b   :  { %7494 = vmatprep.subr.bf16.mxu1 %v9647_v6  ;;  %v4829_v54 = vpack.c.bf16 %v4804_v15, %v4804_v15 }
 0xb0d   :  { %7173 = vmatpush3.bf16.msra.mxu0 %v8792_v21 }
 0xb0e   :  { %7495 = vmatpush3.bf16.msra.mxu1 %v10252_v22  ;;  %7500 = vmatprep.subr.bf16.mxu0 %v9647_v6 }
 0xb0f   :  { %7520 = vmatprep.subr.bf16.mxu1 %v9647_v6 }
 0xb10   :  { %4791 = vmatmul.mubr.bf16.vlgmr.msra.gmra.mrb[36].mxu0 %v10166_v48  ;;  %v10279_v48 = vsub.s32 2, %v10064_v29  ;;  %v2160_v29 = vrot.slane %v10431_v17, %v10122_v57 }
 0xb11   :  { %7497 = vmatmul.mubr.bf16.vlgmr.msra.gmra.mrb[48].mxu1 %v4823_v25  ;;  %7501 = vmatpush3.bf16.msra.mxu0 %v10206_v49 }
 0xb12   :  { %7521 = vmatpush3.bf16.msra.mxu1 %v10206_v49  ;;  %7502 = vmatprep.subr.bf16.mxu0 %v9647_v6  ;;  %v2136_v26 = vrot.slane %v10230_v4, %v10279_v48  ;;  %v4426_v4 = vadd.f32 %v10204_v59, %v2156_v23  ;;  %v4465_v27 = vadd.f32 %v10237_v10, %v2160_v29 }
 0xb13   :  { %7522 = vmatprep.subr.bf16.mxu1 %v9647_v6  ;;  %7516 = vmatprep.mubr.msk.bf16.mxu0 %vm9648_vm0, %v9647_v6 }
 0xb14   :  { %7536 = vmatprep.mubr.msk.bf16.mxu1 %vm9648_vm0, %v9647_v6  ;;  %v4342_v28 = vadd.f32 %v10188_v33, %v2136_v26  ;;  %v4805_v30 = vmax.f32 %v4426_v4, 0.0 }
 0xb15   :  { %7503 = vmatpush3.bf16.msra.mxu0 %v10213_v52 }
 0xb16   :  { %7523 = vmatpush3.bf16.msra.mxu1 %v10213_v52  ;;  %7504 = vmatprep.subr.bf16.mxu0 %v9647_v6  ;;  %v4800_v34 = vmax.f32 %v4342_v28, 0.0  ;;  %v4830_v59 = vpack.c.bf16 %v4805_v30, %v4805_v30 }
 0xb17   :  { %7524 = vmatprep.subr.bf16.mxu1 %v9647_v6 }
 0xb18   :  { %v4825_v33 = vpack.c.bf16 %v4800_v34, %v4800_v34  ;;  %v4806_v34 = vmax.f32 %v4465_v27, 0.0 }
 0xb19   :  { %7505 = vmatpush3.bf16.msra.mxu0 %v10219_v61 }
 0xb1a   :  { %7525 = vmatpush3.bf16.msra.mxu1 %v10219_v61  ;;  %7506 = vmatprep.subr.bf16.mxu0 %v9647_v6  ;;  %v4831_v10 = vpack.c.bf16 %v4806_v34, %v4806_v34 }
 0xb1b   :  { %7526 = vmatprep.subr.bf16.mxu1 %v9647_v6 }
 0xb1d   :  { %7507 = vmatpush3.bf16.msra.mxu0 %v10223_v63 }
 0xb1e   :  { %7527 = vmatpush3.bf16.msra.mxu1 %v10223_v63  ;;  %7508 = vmatprep.subr.bf16.mxu0 %v9647_v6 }
 0xb1f   :  { %7528 = vmatprep.subr.bf16.mxu1 %v9647_v6 }
 0xb21   :  { %7509 = vmatpush3.bf16.msra.mxu0 %v10227_v2 }
 0xb22   :  { %7529 = vmatpush3.bf16.msra.mxu1 %v10227_v2  ;;  %7510 = vmatprep.subr.bf16.mxu0 %v9647_v6 }
 0xb23   :  { %7530 = vmatprep.subr.bf16.mxu1 %v9647_v6 }
 0xb25   :  { %7511 = vmatpush3.bf16.msra.mxu0 %v10233_v7 }
 0xb26   :  { %7531 = vmatpush3.bf16.msra.mxu1 %v10233_v7  ;;  %7512 = vmatprep.subr.bf16.mxu0 %v9647_v6 }
 0xb27   :  { %7532 = vmatprep.subr.bf16.mxu1 %v9647_v6 }
 0xb29   :  { %7513 = vmatpush3.bf16.msra.mxu0 %v10247_v18 }
 0xb2a   :  { %7533 = vmatpush3.bf16.msra.mxu1 %v10247_v18  ;;  %7514 = vmatprep.subr.bf16.mxu0 %v9647_v6 }
 0xb2b   :  { %7534 = vmatprep.subr.bf16.mxu1 %v9647_v6 }
 0xb2d   :  { %7515 = vmatpush3.bf16.msra.mxu0 %v10252_v22 }
 0xb2e   :  { %7535 = vmatpush3.bf16.msra.mxu1 %v10252_v22  ;;  %7540 = vmatprep.subr.bf16.mxu0 %v9647_v6 }
 0xb2f   :  { %7560 = vmatprep.subr.bf16.mxu1 %v9647_v6 }
 0xb30   :  { %7517 = vmatmul.mubr.bf16.vlgmr.msra.gmra.mrb[40].mxu0 %v4824_v35  ;;  %v2164_v35 = vrot.slane %v10431_v17, %v10140_v31 }
 0xb31   :  { %7537 = vmatmul.mubr.bf16.vlgmr.msra.gmra.mrb[52].mxu1 %v4825_v33  ;;  %7541 = vmatpush3.bf16.msra.mxu0 %v10206_v49  ;;  %v2168_v33 = vrot.slane %v10431_v17, %v10279_v48 }
 0xb32   :  { %7561 = vmatpush3.bf16.msra.mxu1 %v10206_v49  ;;  %7542 = vmatprep.subr.bf16.mxu0 %v9647_v6  ;;  %v4467_v39 = vadd.f32 %v10242_v12, %v2164_v35 }
 0xb33   :  { %7562 = vmatprep.subr.bf16.mxu1 %v9647_v6  ;;  %7556 = vmatprep.mubr.msk.bf16.mxu0 %vm9648_vm0, %v9647_v6  ;;  %v4506_v40 = vadd.f32 %v10240_v11, %v2168_v33  ;;  %v10620_v33 = vld [vmem:[#allocation22 + $0x10] sm:$0xff] }
 0xb34   :  { %7576 = vmatprep.mubr.msk.bf16.mxu1 %vm9648_vm0, %v9647_v6 }
 0xb35   :  { %7543 = vmatpush3.bf16.msra.mxu0 %v10213_v52  ;;  %v4808_v47 = vmax.f32 %v4506_v40, 0.0  ;;  %v2192_v40 = vrot.slane %v10620_v33, %v10122_v57 }
 0xb36   :  { %7563 = vmatpush3.bf16.msra.mxu1 %v10213_v52  ;;  %7544 = vmatprep.subr.bf16.mxu0 %v9647_v6 }
 0xb37   :  { %7564 = vmatprep.subr.bf16.mxu1 %v9647_v6  ;;  %v4833_v11 = vpack.c.bf16 %v4808_v47, %v4808_v47 }
 0xb39   :  { %7545 = vmatpush3.bf16.msra.mxu0 %v10219_v61 }
 0xb3a   :  { %7565 = vmatpush3.bf16.msra.mxu1 %v10219_v61  ;;  %7546 = vmatprep.subr.bf16.mxu0 %v9647_v6 }
 0xb3b   :  { %7566 = vmatprep.subr.bf16.mxu1 %v9647_v6 }
 0xb3d   :  { %7547 = vmatpush3.bf16.msra.mxu0 %v10223_v63 }
 0xb3e   :  { %7567 = vmatpush3.bf16.msra.mxu1 %v10223_v63  ;;  %7548 = vmatprep.subr.bf16.mxu0 %v9647_v6 }
 0xb3f   :  { %7568 = vmatprep.subr.bf16.mxu1 %v9647_v6 }
 0xb41   :  { %7549 = vmatpush3.bf16.msra.mxu0 %v10227_v2 }
 0xb42   :  { %7569 = vmatpush3.bf16.msra.mxu1 %v10227_v2  ;;  %7550 = vmatprep.subr.bf16.mxu0 %v9647_v6 }
 0xb43   :  { %v10337_v41 = vpop.f32.mrb[24].mxu0  ;;  %7570 = vmatprep.subr.bf16.mxu1 %v9647_v6 }
 0xb44   :  { %v10340_v42 = vpop.f32.mrb[36].mxu1  ;;  %v10342_v43 = vpop.f32.mrb[25].mxu0 }
 0xb45   :  { %v10344_v44 = vpop.f32.mrb[37].mxu1  ;;  %v4550_v46 = vpop.f32.mrb[26].mxu0  ;;  %7551 = vmatpush3.bf16.msra.mxu0 %v10233_v7 }
 0xb46   :  { %v4591_v50 = vpop.f32.mrb[38].mxu1  ;;  %7571 = vmatpush3.bf16.msra.mxu1 %v10233_v7  ;;  %v4551_v51 = vpop.f32.mrb[27].mxu0  ;;  %7552 = vmatprep.subr.bf16.mxu0 %v9647_v6  ;;  %v4807_v46 = vmax.f32 %v4467_v39, 0.0  ;;  %v2188_v39 = vrot.slane %v10431_v17, %v10426_v16 }
 0xb47   :  { %v4592_v60 = vpop.f32.mrb[39].mxu1  ;;  %7572 = vmatprep.subr.bf16.mxu1 %v9647_v6  ;;  %v2172_v50 = vrot.slane %v10431_v17, %v10322_v37  ;;  %v2176_v51 = vrot.slane %v10431_v17, %v10327_v38 }
 0xb48   :  { %v4832_v12 = vpack.c.bf16 %v4807_v46, %v4807_v46 }
 0xb49   :  { %7553 = vmatpush3.bf16.msra.mxu0 %v10247_v18  ;;  %v4547_v8 = vadd.f32 %v10337_v41, %v2176_v51 }
 0xb4a   :  { %7573 = vmatpush3.bf16.msra.mxu1 %v10247_v18  ;;  %7554 = vmatprep.subr.bf16.mxu0 %v9647_v6 }
 0xb4b   :  { %7574 = vmatprep.subr.bf16.mxu1 %v9647_v6  ;;  %v4810_v15 = vmax.f32 %v4547_v8, 0.0 }
 0xb4d   :  { %7555 = vmatpush3.bf16.msra.mxu0 %v10252_v22  ;;  %v4835_v41 = vpack.c.bf16 %v4810_v15, %v4810_v15 }
 0xb4e   :  { %7575 = vmatpush3.bf16.msra.mxu1 %v10252_v22  ;;  %7580 = vmatprep.subr.bf16.mxu0 %v9647_v6 }
 0xb4f   :  { %7600 = vmatprep.subr.bf16.mxu1 %v9647_v6 }
 0xb50   :  { %7557 = vmatmul.mubr.bf16.vlgmr.msra.gmra.mrb[44].mxu0 %v4826_v36 }
 0xb51   :  { %7577 = vmatmul.mubr.bf16.vlgmr.msra.gmra.mrb[56].mxu1 %v4827_v53  ;;  %7581 = vmatpush3.bf16.msra.mxu0 %v10206_v49  ;;  %v4508_v53 = vadd.f32 %v10244_v13, %v2172_v50 }
 0xb52   :  { %7601 = vmatpush3.bf16.msra.mxu1 %v10206_v49  ;;  %7582 = vmatprep.subr.bf16.mxu0 %v9647_v6 }
 0xb53   :  { %7602 = vmatprep.subr.bf16.mxu1 %v9647_v6  ;;  %7596 = vmatprep.mubr.msk.bf16.mxu0 %vm9648_vm0, %v9647_v6  ;;  %v4809_v14 = vmax.f32 %v4508_v53, 0.0 }
 0xb54   :  { %7616 = vmatprep.mubr.msk.bf16.mxu1 %vm9648_vm0, %v9647_v6 }
 0xb55   :  { %7583 = vmatpush3.bf16.msra.mxu0 %v10213_v52  ;;  %v4834_v13 = vpack.c.bf16 %v4809_v14, %v4809_v14 }
 0xb56   :  { %7603 = vmatpush3.bf16.msra.mxu1 %v10213_v52  ;;  %7584 = vmatprep.subr.bf16.mxu0 %v9647_v6 }
 0xb57   :  { %7604 = vmatprep.subr.bf16.mxu1 %v9647_v6 }
 0xb59   :  { %7585 = vmatpush3.bf16.msra.mxu0 %v10219_v61 }
 0xb5a   :  { %7605 = vmatpush3.bf16.msra.mxu1 %v10219_v61  ;;  %7586 = vmatprep.subr.bf16.mxu0 %v9647_v6 }
 0xb5b   :  { %7606 = vmatprep.subr.bf16.mxu1 %v9647_v6 }
 0xb5d   :  { %7587 = vmatpush3.bf16.msra.mxu0 %v10223_v63 }
 0xb5e   :  { %7607 = vmatpush3.bf16.msra.mxu1 %v10223_v63  ;;  %7588 = vmatprep.subr.bf16.mxu0 %v9647_v6 }
 0xb5f   :  { %7608 = vmatprep.subr.bf16.mxu1 %v9647_v6 }
 0xb61   :  { %7589 = vmatpush3.bf16.msra.mxu0 %v10227_v2 }
 0xb62   :  { %7609 = vmatpush3.bf16.msra.mxu1 %v10227_v2  ;;  %7590 = vmatprep.subr.bf16.mxu0 %v9647_v6 }
 0xb63   :  { %7610 = vmatprep.subr.bf16.mxu1 %v9647_v6 }
 0xb65   :  { %7591 = vmatpush3.bf16.msra.mxu0 %v10233_v7 }
 0xb66   :  { %7611 = vmatpush3.bf16.msra.mxu1 %v10233_v7  ;;  %7592 = vmatprep.subr.bf16.mxu0 %v9647_v6 }
 0xb67   :  { %7612 = vmatprep.subr.bf16.mxu1 %v9647_v6 }
 0xb69   :  { %7593 = vmatpush3.bf16.msra.mxu0 %v10247_v18 }
 0xb6a   :  { %7613 = vmatpush3.bf16.msra.mxu1 %v10247_v18  ;;  %7594 = vmatprep.subr.bf16.mxu0 %v9647_v6 }
 0xb6b   :  { %7614 = vmatprep.subr.bf16.mxu1 %v9647_v6 }
 0xb6d   :  { %7595 = vmatpush3.bf16.msra.mxu0 %v10252_v22 }
 0xb6e   :  { %7615 = vmatpush3.bf16.msra.mxu1 %v10252_v22  ;;  %7620 = vmatprep.subr.bf16.mxu0 %v9647_v6 }
 0xb6f   :  { %7640 = vmatprep.subr.bf16.mxu1 %v9647_v6 }
 0xb70   :  { %7597 = vmatmul.mubr.bf16.vlgmr.msra.gmra.mrb[48].mxu0 %v4828_v56  ;;  %v2180_v56 = vrot.slane %v10431_v17, %v10378_v0 }
 0xb71   :  { %7617 = vmatmul.mubr.bf16.vlgmr.msra.gmra.mrb[60].mxu1 %v4829_v54  ;;  %7621 = vmatpush3.bf16.msra.mxu0 %v10206_v49  ;;  %v2184_v54 = vrot.slane %v10431_v17, %v10383_v1  ;;  %v4590_v17 = vadd.f32 %v10344_v44, %v2188_v39  ;;  %v10744_v39 = vld [vmem:[#allocation23 + $0x38] sm:$0xff]  }
 0xb72   :  { %7641 = vmatpush3.bf16.msra.mxu1 %v10206_v49  ;;  %7622 = vmatprep.subr.bf16.mxu0 %v9647_v6  ;;  %v4549_v27 = vadd.f32 %v10342_v43, %v2180_v56 }
 0xb73   :  { %7642 = vmatprep.subr.bf16.mxu1 %v9647_v6  ;;  %7636 = vmatprep.mubr.msk.bf16.mxu0 %vm9648_vm0, %v9647_v6  ;;  %v4588_v34 = vadd.f32 %v10340_v42, %v2184_v54  ;;  %v10712_v54 = vld [vmem:[#allocation23 + $0x18] sm:$0xff]  }
 0xb74   :  { %7656 = vmatprep.mubr.msk.bf16.mxu1 %vm9648_vm0, %v9647_v6 }
 0xb75   :  { %7623 = vmatpush3.bf16.msra.mxu0 %v10213_v52  ;;  %v4812_v35 = vmax.f32 %v4588_v34, 0.0  ;;  %v10730_v34 = vld [vmem:[#allocation23 + $0x28] sm:$0xff]  }
 0xb76   :  { %7643 = vmatpush3.bf16.msra.mxu1 %v10213_v52  ;;  %7624 = vmatprep.subr.bf16.mxu0 %v9647_v6 }
 0xb77   :  { %7644 = vmatprep.subr.bf16.mxu1 %v9647_v6  ;;  %v4837_v42 = vpack.c.bf16 %v4812_v35, %v4812_v35 }
 0xb79   :  { %7625 = vmatpush3.bf16.msra.mxu0 %v10219_v61 }
 0xb7a   :  { %7645 = vmatpush3.bf16.msra.mxu1 %v10219_v61  ;;  %7626 = vmatprep.subr.bf16.mxu0 %v9647_v6 }
 0xb7b   :  { %7646 = vmatprep.subr.bf16.mxu1 %v9647_v6 }
 0xb7d   :  { %7627 = vmatpush3.bf16.msra.mxu0 %v10223_v63 }
 0xb7e   :  { %7647 = vmatpush3.bf16.msra.mxu1 %v10223_v63  ;;  %7628 = vmatprep.subr.bf16.mxu0 %v9647_v6 }
 0xb7f   :  { %7648 = vmatprep.subr.bf16.mxu1 %v9647_v6 }
 0xb81   :  { %7629 = vmatpush3.bf16.msra.mxu0 %v10227_v2 }
 0xb82   :  { %7649 = vmatpush3.bf16.msra.mxu1 %v10227_v2  ;;  %7630 = vmatprep.subr.bf16.mxu0 %v9647_v6 }
 0xb83   :  { %v10440_v19 = vpop.f32.mrb[28].mxu0  ;;  %7650 = vmatprep.subr.bf16.mxu1 %v9647_v6 }
 0xb84   :  { %v10443_v20 = vpop.f32.mrb[40].mxu1  ;;  %v10445_v21 = vpop.f32.mrb[29].mxu0  ;;  %v4629_v57 = vadd.f32 %v10440_v19, %v2192_v40 }
 0xb85   :  { %v10447_v24 = vpop.f32.mrb[41].mxu1  ;;  %v4632_v25 = vpop.f32.mrb[30].mxu0  ;;  %7631 = vmatpush3.bf16.msra.mxu0 %v10233_v7 }
 0xb86   :  { %v4673_v32 = vpop.f32.mrb[42].mxu1  ;;  %7651 = vmatpush3.bf16.msra.mxu1 %v10233_v7  ;;  %v4633_v26 = vpop.f32.mrb[31].mxu0  ;;  %7632 = vmatprep.subr.bf16.mxu0 %v9647_v6 }
 0xb87   :  { %v4674_v28 = vpop.f32.mrb[43].mxu1  ;;  %7652 = vmatprep.subr.bf16.mxu1 %v9647_v6 }
 0xb89   :  { %7633 = vmatpush3.bf16.msra.mxu0 %v10247_v18 }
 0xb8a   :  { %7653 = vmatpush3.bf16.msra.mxu1 %v10247_v18  ;;  %7634 = vmatprep.subr.bf16.mxu0 %v9647_v6 }
 0xb8b   :  { %7654 = vmatprep.subr.bf16.mxu1 %v9647_v6 }
 0xb8d   :  { %7635 = vmatpush3.bf16.msra.mxu0 %v10252_v22 }
 0xb8e   :  { %7655 = vmatpush3.bf16.msra.mxu1 %v10252_v22  ;;  %7660 = vmatprep.subr.bf16.mxu0 %v9647_v6 }
 0xb8f   :  { %7680 = vmatprep.subr.bf16.mxu1 %v9647_v6 }
 0xb90   :  { %7637 = vmatmul.mubr.bf16.vlgmr.msra.gmra.mrb[52].mxu0 %v4830_v59 }
 0xb91   :  { %7657 = vmatmul.mubr.bf16.vlgmr.msra.gmra.mrb[64].mxu1 %v4831_v10  ;;  %7661 = vmatpush3.bf16.msra.mxu0 %v10206_v49  ;;  %v4811_v10 = vmax.f32 %v4549_v27, 0.0 }
 0xb92   :  { %7681 = vmatpush3.bf16.msra.mxu1 %v10206_v49  ;;  %7662 = vmatprep.subr.bf16.mxu0 %v9647_v6 }
 0xb93   :  { %7682 = vmatprep.subr.bf16.mxu1 %v9647_v6  ;;  %7676 = vmatprep.mubr.msk.bf16.mxu0 %vm9648_vm0, %v9647_v6  ;;  %v4836_v43 = vpack.c.bf16 %v4811_v10, %v4811_v10 }
 0xb94   :  { %7696 = vmatprep.mubr.msk.bf16.mxu1 %vm9648_vm0, %v9647_v6 }
 0xb95   :  { %7663 = vmatpush3.bf16.msra.mxu0 %v10213_v52 }
 0xb96   :  { %7683 = vmatpush3.bf16.msra.mxu1 %v10213_v52  ;;  %7664 = vmatprep.subr.bf16.mxu0 %v9647_v6 }
 0xb97   :  { %7684 = vmatprep.subr.bf16.mxu1 %v9647_v6 }
 0xb99   :  { %7665 = vmatpush3.bf16.msra.mxu0 %v10219_v61 }
 0xb9a   :  { %7685 = vmatpush3.bf16.msra.mxu1 %v10219_v61  ;;  %7666 = vmatprep.subr.bf16.mxu0 %v9647_v6 }
 0xb9b   :  { %7686 = vmatprep.subr.bf16.mxu1 %v9647_v6 }
 0xb9d   :  { %7667 = vmatpush3.bf16.msra.mxu0 %v10223_v63 }
 0xb9e   :  { %7687 = vmatpush3.bf16.msra.mxu1 %v10223_v63  ;;  %7668 = vmatprep.subr.bf16.mxu0 %v9647_v6 }
 0xb9f   :  { %7688 = vmatprep.subr.bf16.mxu1 %v9647_v6 }
 0xba1   :  { %7669 = vmatpush3.bf16.msra.mxu0 %v10227_v2 }
 0xba2   :  { %7689 = vmatpush3.bf16.msra.mxu1 %v10227_v2  ;;  %7670 = vmatprep.subr.bf16.mxu0 %v9647_v6 }
 0xba3   :  { %7690 = vmatprep.subr.bf16.mxu1 %v9647_v6 }
 0xba5   :  { %7671 = vmatpush3.bf16.msra.mxu0 %v10233_v7 }
 0xba6   :  { %7691 = vmatpush3.bf16.msra.mxu1 %v10233_v7  ;;  %7672 = vmatprep.subr.bf16.mxu0 %v9647_v6 }
 0xba7   :  { %7692 = vmatprep.subr.bf16.mxu1 %v9647_v6 }
 0xba9   :  { %7673 = vmatpush3.bf16.msra.mxu0 %v10247_v18 }
 0xbaa   :  { %7693 = vmatpush3.bf16.msra.mxu1 %v10247_v18  ;;  %7674 = vmatprep.subr.bf16.mxu0 %v9647_v6 }
 0xbab   :  { %7694 = vmatprep.subr.bf16.mxu1 %v9647_v6 }
 0xbad   :  { %7675 = vmatpush3.bf16.msra.mxu0 %v10252_v22 }
 0xbae   :  { %7695 = vmatpush3.bf16.msra.mxu1 %v10252_v22  ;;  %7700 = vmatprep.subr.bf16.mxu0 %v9647_v6 }
 0xbaf   :  { %7720 = vmatprep.subr.bf16.mxu1 %v9647_v6 }
 0xbb0   :  { %7677 = vmatmul.mubr.bf16.vlgmr.msra.gmra.mrb[56].mxu0 %v4832_v12 }
 0xbb1   :  { %7697 = vmatmul.mubr.bf16.vlgmr.msra.gmra.mrb[68].mxu1 %v4833_v11  ;;  %7701 = vmatpush3.bf16.msra.mxu0 %v10206_v49 }
 0xbb2   :  { %7721 = vmatpush3.bf16.msra.mxu1 %v10206_v49  ;;  %7702 = vmatprep.subr.bf16.mxu0 %v9647_v6 }
 0xbb3   :  { %7722 = vmatprep.subr.bf16.mxu1 %v9647_v6  ;;  %7716 = vmatprep.mubr.msk.bf16.mxu0 %vm9648_vm0, %v9647_v6 }
 0xbb4   :  { %7736 = vmatprep.mubr.msk.bf16.mxu1 %vm9648_vm0, %v9647_v6 }
 0xbb5   :  { %7703 = vmatpush3.bf16.msra.mxu0 %v10213_v52 }
 0xbb6   :  { %7723 = vmatpush3.bf16.msra.mxu1 %v10213_v52  ;;  %7704 = vmatprep.subr.bf16.mxu0 %v9647_v6 }
 0xbb7   :  { %7724 = vmatprep.subr.bf16.mxu1 %v9647_v6 }
 0xbb9   :  { %7705 = vmatpush3.bf16.msra.mxu0 %v10219_v61 }
 0xbba   :  { %7725 = vmatpush3.bf16.msra.mxu1 %v10219_v61  ;;  %7706 = vmatprep.subr.bf16.mxu0 %v9647_v6 }
 0xbbb   :  { %7726 = vmatprep.subr.bf16.mxu1 %v9647_v6 }
 0xbbd   :  { %7707 = vmatpush3.bf16.msra.mxu0 %v10223_v63 }
 0xbbe   :  { %7727 = vmatpush3.bf16.msra.mxu1 %v10223_v63  ;;  %7708 = vmatprep.subr.bf16.mxu0 %v9647_v6 }
 0xbbf   :  { %7728 = vmatprep.subr.bf16.mxu1 %v9647_v6 }
 0xbc1   :  { %7709 = vmatpush3.bf16.msra.mxu0 %v10227_v2 }
 0xbc2   :  { %7729 = vmatpush3.bf16.msra.mxu1 %v10227_v2  ;;  %7710 = vmatprep.subr.bf16.mxu0 %v9647_v6 }
 0xbc3   :  { %v10532_v55 = vpop.f32.mrb[32].mxu0  ;;  %7730 = vmatprep.subr.bf16.mxu1 %v9647_v6 }
 0xbc4   :  { %v10535_v60 = vpop.f32.mrb[44].mxu1  ;;  %v10537_v62 = vpop.f32.mrb[33].mxu0 }
 0xbc5   :  { %v10539_v45 = vpop.f32.mrb[45].mxu1  ;;  %v4714_v36 = vpop.f32.mrb[34].mxu0  ;;  %7711 = vmatpush3.bf16.msra.mxu0 %v10233_v7 }
 0xbc6   :  { %v4755_v3 = vpop.f32.mrb[46].mxu1  ;;  %7731 = vmatpush3.bf16.msra.mxu1 %v10233_v7  ;;  %v4715_v5 = vpop.f32.mrb[35].mxu0  ;;  %7712 = vmatprep.subr.bf16.mxu0 %v9647_v6 }
 0xbc7   :  { %v4756_v9 = vpop.f32.mrb[47].mxu1  ;;  %7732 = vmatprep.subr.bf16.mxu1 %v9647_v6  ;;  %v4813_v3 = vmax.f32 %v4590_v17, 0.0  ;;  %v4814_v5 = vmax.f32 %v4629_v57, 0.0 }
 0xbc9   :  { %7713 = vmatpush3.bf16.msra.mxu0 %v10247_v18  ;;  %v4838_v44 = vpack.c.bf16 %v4813_v3, %v4813_v3  ;;  %v4839_v19 = vpack.c.bf16 %v4814_v5, %v4814_v5 }
 0xbca   :  { %7733 = vmatpush3.bf16.msra.mxu1 %v10247_v18  ;;  %7714 = vmatprep.subr.bf16.mxu0 %v9647_v6 }
 0xbcb   :  { %7734 = vmatprep.subr.bf16.mxu1 %v9647_v6 }
 0xbcd   :  { %7715 = vmatpush3.bf16.msra.mxu0 %v10252_v22 }
 0xbce   :  { %7735 = vmatpush3.bf16.msra.mxu1 %v10252_v22  ;;  %7740 = vmatprep.subr.bf16.mxu0 %v9647_v6 }
 0xbcf   :  { %7760 = vmatprep.subr.bf16.mxu1 %v9647_v6 }
 0xbd0   :  { %7717 = vmatmul.mubr.bf16.vlgmr.msra.gmra.mrb[60].mxu0 %v4834_v13 }
 0xbd1   :  { %7737 = vmatmul.mubr.bf16.vlgmr.msra.gmra.mrb[72].mxu1 %v4835_v41  ;;  %7741 = vmatpush3.bf16.msra.mxu0 %v10206_v49 }
 0xbd2   :  { %7761 = vmatpush3.bf16.msra.mxu1 %v10206_v49  ;;  %7742 = vmatprep.subr.bf16.mxu0 %v9647_v6 }
 0xbd3   :  { %7762 = vmatprep.subr.bf16.mxu1 %v9647_v6  ;;  %7756 = vmatprep.mubr.msk.bf16.mxu0 %vm9648_vm0, %v9647_v6 }
 0xbd4   :  { %7776 = vmatprep.mubr.msk.bf16.mxu1 %vm9648_vm0, %v9647_v6 }
 0xbd5   :  { %7743 = vmatpush3.bf16.msra.mxu0 %v10213_v52 }
 0xbd6   :  { %7763 = vmatpush3.bf16.msra.mxu1 %v10213_v52  ;;  %7744 = vmatprep.subr.bf16.mxu0 %v9647_v6 }
 0xbd7   :  { %7764 = vmatprep.subr.bf16.mxu1 %v9647_v6 }
 0xbd9   :  { %7745 = vmatpush3.bf16.msra.mxu0 %v10219_v61 }
 0xbda   :  { %7765 = vmatpush3.bf16.msra.mxu1 %v10219_v61  ;;  %7746 = vmatprep.subr.bf16.mxu0 %v9647_v6 }
 0xbdb   :  { %7766 = vmatprep.subr.bf16.mxu1 %v9647_v6 }
 0xbdd   :  { %7747 = vmatpush3.bf16.msra.mxu0 %v10223_v63 }
 0xbde   :  { %7767 = vmatpush3.bf16.msra.mxu1 %v10223_v63  ;;  %7748 = vmatprep.subr.bf16.mxu0 %v9647_v6 }
 0xbdf   :  { %7768 = vmatprep.subr.bf16.mxu1 %v9647_v6 }
 0xbe1   :  { %7749 = vmatpush3.bf16.msra.mxu0 %v10227_v2 }
 0xbe2   :  { %7769 = vmatpush3.bf16.msra.mxu1 %v10227_v2  ;;  %7750 = vmatprep.subr.bf16.mxu0 %v9647_v6 }
 0xbe3   :  { %v7174_v23 = vpop.f32.mrb[36].mxu0  ;;  %7770 = vmatprep.subr.bf16.mxu1 %v9647_v6 }
 0xbe4   :  { %v4946_v29 = vpop.f32.mrb[48].mxu1  ;;  %v7175_v25 = vpop.f32.mrb[37].mxu0 }
 0xbe5   :  { %4952 = vst [vmem:[%s9861_s9] sm:$0x3] %v4946_v29  ;;  %v10584_v4 = vadd.f32 %v7175_v25, %v7174_v23  ;;  %v7498_v32 = vpop.f32.mrb[49].mxu1  ;;  %v7177_v26 = vpop.f32.mrb[38].mxu0  ;;  %7751 = vmatpush3.bf16.msra.mxu0 %v10233_v7  ;;  %v10718_v23 = vld [vmem:[#allocation23 + $0x20] sm:$0xff]   ;;  %v2204_v29 = vrot.slane %v10620_v33, %v10322_v37  ;;  %v2208_v25 = vrot.slane %v10620_v33, %v10327_v38 }
 0xbe6   :  { %v4949_v28 = vpop.f32.mrb[50].mxu1  ;;  %7771 = vmatpush3.bf16.msra.mxu1 %v10233_v7  ;;  %v7178_v30 = vpop.f32.mrb[39].mxu0  ;;  %7752 = vmatprep.subr.bf16.mxu0 %v9647_v6 }
 0xbe7   :  { %v7499_v59 = vpop.f32.mrb[51].mxu1  ;;  %7772 = vmatprep.subr.bf16.mxu1 %v9647_v6  ;;  %v4672_v37 = vadd.f32 %v10447_v24, %v2204_v29  ;;  %v4711_v38 = vadd.f32 %v10532_v55, %v2208_v25 }
 0xbe9   :  { %7753 = vmatpush3.bf16.msra.mxu0 %v10247_v18  ;;  %v4818_v24 = vmax.f32 %v4711_v38, 0.0 }
 0xbea   :  { %7773 = vmatpush3.bf16.msra.mxu1 %v10247_v18  ;;  %7754 = vmatprep.subr.bf16.mxu0 %v9647_v6 }
 0xbeb   :  { %7774 = vmatprep.subr.bf16.mxu1 %v9647_v6  ;;  %v4843_v40 = vpack.c.bf16 %v4818_v24, %v4818_v24 }
 0xbed   :  { %7755 = vmatpush3.bf16.msra.mxu0 %v10252_v22 }
 0xbee   :  { %7775 = vmatpush3.bf16.msra.mxu1 %v10252_v22  ;;  %7780 = vmatprep.subr.bf16.mxu0 %v9647_v6 }
 0xbef   :  { %7800 = vmatprep.subr.bf16.mxu1 %v9647_v6 }
 0xbf0   :  { %7757 = vmatmul.mubr.bf16.vlgmr.msra.gmra.mrb[64].mxu0 %v4836_v43  ;;  %v10738_v43 = vld [vmem:[#allocation23 + $0x30] sm:$0xff]  }
 0xbf1   :  { %7777 = vmatmul.mubr.bf16.vlgmr.msra.gmra.mrb[76].mxu1 %v4837_v42  ;;  %7781 = vmatpush3.bf16.msra.mxu0 %v10206_v49  ;;  %v4817_v42 = vmax.f32 %v4672_v37, 0.0 }
 0xbf2   :  { %7801 = vmatpush3.bf16.msra.mxu1 %v10206_v49  ;;  %7782 = vmatprep.subr.bf16.mxu0 %v9647_v6 }
 0xbf3   :  { %7802 = vmatprep.subr.bf16.mxu1 %v9647_v6  ;;  %7796 = vmatprep.mubr.msk.bf16.mxu0 %vm9648_vm0, %v9647_v6  ;;  %v4842_v55 = vpack.c.bf16 %v4817_v42, %v4817_v42 }
 0xbf4   :  { %7816 = vmatprep.mubr.msk.bf16.mxu1 %vm9648_vm0, %v9647_v6 }
 0xbf5   :  { %7783 = vmatpush3.bf16.msra.mxu0 %v10213_v52 }
 0xbf6   :  { %7803 = vmatpush3.bf16.msra.mxu1 %v10213_v52  ;;  %7784 = vmatprep.subr.bf16.mxu0 %v9647_v6 }
 0xbf7   :  { %7804 = vmatprep.subr.bf16.mxu1 %v9647_v6 }
 0xbf9   :  { %7785 = vmatpush3.bf16.msra.mxu0 %v10219_v61 }
 0xbfa   :  { %7805 = vmatpush3.bf16.msra.mxu1 %v10219_v61  ;;  %7786 = vmatprep.subr.bf16.mxu0 %v9647_v6 }
 0xbfb   :  { %7806 = vmatprep.subr.bf16.mxu1 %v9647_v6 }
 0xbfd   :  { %7787 = vmatpush3.bf16.msra.mxu0 %v10223_v63 }
 0xbfe   :  { %7807 = vmatpush3.bf16.msra.mxu1 %v10223_v63  ;;  %7788 = vmatprep.subr.bf16.mxu0 %v9647_v6 }
 0xbff   :  { %7808 = vmatprep.subr.bf16.mxu1 %v9647_v6 }
 0xc01   :  { %7789 = vmatpush3.bf16.msra.mxu0 %v10227_v2 }
 0xc02   :  { %7809 = vmatpush3.bf16.msra.mxu1 %v10227_v2  ;;  %7790 = vmatprep.subr.bf16.mxu0 %v9647_v6 }
 0xc03   :  { %v4987_v46 = vpop.f32.mrb[40].mxu0  ;;  %7810 = vmatprep.subr.bf16.mxu1 %v9647_v6 }
 0xc04   :  { %4993 = vst [vmem:[%s9861_s9 + $0x2] sm:$0x3] %v4987_v46  ;;  %v5028_v47 = vpop.f32.mrb[52].mxu1  ;;  %v7518_v12 = vpop.f32.mrb[41].mxu0  ;;  %v2212_v46 = vrot.slane %v10620_v33, %v10378_v0 }
 0xc05   :  { %5034 = vst [vmem:[%s9861_s9 + $0x4] sm:$0x3] %v5028_v47  ;;  %v7538_v11 = vpop.f32.mrb[53].mxu1  ;;  %v4990_v50 = vpop.f32.mrb[42].mxu0  ;;  %7791 = vmatpush3.bf16.msra.mxu0 %v10233_v7  ;;  %v2216_v47 = vrot.slane %v10620_v33, %v10383_v1 }
 0xc06   :  { %v5031_v51 = vpop.f32.mrb[54].mxu1  ;;  %7811 = vmatpush3.bf16.msra.mxu1 %v10233_v7  ;;  %v7519_v36 = vpop.f32.mrb[43].mxu0  ;;  %7792 = vmatprep.subr.bf16.mxu0 %v9647_v6  ;;  %v4713_v0 = vadd.f32 %v10537_v62, %v2212_v46 }
 0xc07   :  { %v7539_v53 = vpop.f32.mrb[55].mxu1  ;;  %7812 = vmatprep.subr.bf16.mxu1 %v9647_v6  ;;  %v4752_v1 = vadd.f32 %v10535_v60, %v2216_v47 }
 0xc08   :  { %v4819_v3 = vmax.f32 %v4713_v0, 0.0 }
 0xc09   :  { %7793 = vmatpush3.bf16.msra.mxu0 %v10247_v18  ;;  %v4820_v5 = vmax.f32 %v4752_v1, 0.0 }
 0xc0a   :  { %7813 = vmatpush3.bf16.msra.mxu1 %v10247_v18  ;;  %7794 = vmatprep.subr.bf16.mxu0 %v9647_v6  ;;  %v4844_v62 = vpack.c.bf16 %v4819_v3, %v4819_v3 }
 0xc0b   :  { %7814 = vmatprep.subr.bf16.mxu1 %v9647_v6  ;;  %v4845_v60 = vpack.c.bf16 %v4820_v5, %v4820_v5 }
 0xc0d   :  { %7795 = vmatpush3.bf16.msra.mxu0 %v10252_v22 }
 0xc0e   :  { %7815 = vmatpush3.bf16.msra.mxu1 %v10252_v22  ;;  %7820 = vmatprep.subr.bf16.mxu0 %v9647_v6 }
 0xc0f   :  { %7840 = vmatprep.subr.bf16.mxu1 %v9647_v6 }
 0xc10   :  { %7797 = vmatmul.mubr.bf16.vlgmr.msra.gmra.mrb[68].mxu0 %v4838_v44  ;;  %v2220_v44 = vrot.slane %v10620_v33, %v10426_v16 }
 0xc11   :  { %7817 = vmatmul.mubr.bf16.vlgmr.msra.gmra.mrb[80].mxu1 %v4839_v19  ;;  %7821 = vmatpush3.bf16.msra.mxu0 %v10206_v49 }
 0xc12   :  { %7841 = vmatpush3.bf16.msra.mxu1 %v10206_v49  ;;  %7822 = vmatprep.subr.bf16.mxu0 %v9647_v6  ;;  %v2196_v49 = vrot.slane %v10620_v33, %v10140_v31 }
 0xc13   :  { %7842 = vmatprep.subr.bf16.mxu1 %v9647_v6  ;;  %7836 = vmatprep.mubr.msk.bf16.mxu0 %vm9648_vm0, %v9647_v6 }
 0xc14   :  { %7856 = vmatprep.mubr.msk.bf16.mxu1 %vm9648_vm0, %v9647_v6  ;;  %v4631_v31 = vadd.f32 %v10445_v21, %v2196_v49  ;;  %v10690_v21 = vld [vmem:[#allocation23] sm:$0xff]   ;;  %v6629_v49 = vld [vmem:[#allocation22 + $0x18] ss:$0 sm:$0xff] }
 0xc15   :  { %7823 = vmatpush3.bf16.msra.mxu0 %v10213_v52 }
 0xc16   :  { %7843 = vmatpush3.bf16.msra.mxu1 %v10213_v52  ;;  %7824 = vmatprep.subr.bf16.mxu0 %v9647_v6  ;;  %v2200_v52 = vrot.slane %v10620_v33, %v10279_v48  ;;  %v4815_v41 = vmax.f32 %v4631_v31, 0.0  ;;  %v4793_v33 = vadd.f32 %v10584_v4, %v6629_v49 }
 0xc17   :  { %7844 = vmatprep.subr.bf16.mxu1 %v9647_v6 }
 0xc18   :  { %v4670_v48 = vadd.f32 %v10443_v20, %v2200_v52 }
 0xc19   :  { %7825 = vmatpush3.bf16.msra.mxu0 %v10219_v61 }
 0xc1a   :  { %7845 = vmatpush3.bf16.msra.mxu1 %v10219_v61  ;;  %7826 = vmatprep.subr.bf16.mxu0 %v9647_v6  ;;  %v4816_v56 = vmax.f32 %v4670_v48, 0.0 }
 0xc1b   :  { %7846 = vmatprep.subr.bf16.mxu1 %v9647_v6 }
 0xc1c   :  { %v4841_v20 = vpack.c.bf16 %v4816_v56, %v4816_v56 }
 0xc1d   :  { %7827 = vmatpush3.bf16.msra.mxu0 %v10223_v63 }
 0xc1e   :  { %7847 = vmatpush3.bf16.msra.mxu1 %v10223_v63  ;;  %7828 = vmatprep.subr.bf16.mxu0 %v9647_v6 }
 0xc1f   :  { %7848 = vmatprep.subr.bf16.mxu1 %v9647_v6 }
 0xc21   :  { %7829 = vmatpush3.bf16.msra.mxu0 %v10227_v2 }
 0xc22   :  { %7849 = vmatpush3.bf16.msra.mxu1 %v10227_v2  ;;  %7830 = vmatprep.subr.bf16.mxu0 %v9647_v6 }
 0xc23   :  { %v5069_v61 = vpop.f32.mrb[44].mxu0  ;;  %7850 = vmatprep.subr.bf16.mxu1 %v9647_v6 }
 0xc24   :  { %5075 = vst [vmem:[%s9861_s9 + $0x6] sm:$0x3] %v5069_v61  ;;  %v5110_v63 = vpop.f32.mrb[56].mxu1  ;;  %v7558_v8 = vpop.f32.mrb[45].mxu0 }
 0xc25   :  { %5116 = vst [vmem:[%s9861_s9 + $0x8] sm:$0x3] %v5110_v63  ;;  %v7578_v9 = vpop.f32.mrb[57].mxu1  ;;  %v5072_v14 = vpop.f32.mrb[46].mxu0  ;;  %7831 = vmatpush3.bf16.msra.mxu0 %v10233_v7 }
 0xc26   :  { %v5113_v15 = vpop.f32.mrb[58].mxu1  ;;  %7851 = vmatpush3.bf16.msra.mxu1 %v10233_v7  ;;  %v7559_v2 = vpop.f32.mrb[47].mxu0  ;;  %7832 = vmatprep.subr.bf16.mxu0 %v9647_v6  ;;  %v4840_v7 = vpack.c.bf16 %v4815_v41, %v4815_v41  ;;  %v4754_v9 = vadd.f32 %v10539_v45, %v2220_v44  ;;  %v8794_v45 = vld [vmem:[#allocation25] sm:$0xff]  }
 0xc27   :  { %v7579_v13 = vpop.f32.mrb[59].mxu1  ;;  %7852 = vmatprep.subr.bf16.mxu1 %v9647_v6  ;;  %v4822_v2 = vmax.f32 %v4793_v33, 0.0  ;;  %v7038_v33 = vld [vmem:[#allocation26] ss:$0 sm:$0xff] }
 0xc28   :  { %v4821_v15 = vmax.f32 %v4754_v9, 0.0 }
 0xc29   :  { %7833 = vmatpush3.bf16.msra.mxu0 %v10247_v18  ;;  %v4847_v4 = vpack.c.bf16 %v4822_v2, %v4822_v2 }
 0xc2a   :  { %7853 = vmatpush3.bf16.msra.mxu1 %v10247_v18  ;;  %7834 = vmatprep.subr.bf16.mxu0 %v9647_v6  ;;  %v10700_v18 = vld [vmem:[#allocation23 + $0x8] sm:$0xff]   ;;  %v4846_v48 = vpack.c.bf16 %v4821_v15, %v4821_v15 }
 0xc2b   :  { %7854 = vmatprep.subr.bf16.mxu1 %v9647_v6  ;;  %v7041_v15 = vld [vmem:[#allocation28] ss:$0 sm:$0xff] }
 0xc2d   :  { %7835 = vmatpush3.bf16.msra.mxu0 %v10252_v22 }
 0xc2e   :  { %7855 = vmatpush3.bf16.msra.mxu1 %v10252_v22  ;;  %7860 = vmatprep.subr.bf16.mxu0 %v9647_v6  ;;  %v10706_v22 = vld [vmem:[#allocation23 + $0x10] sm:$0xff]  }
 0xc2f   :  { %7880 = vmatprep.subr.bf16.mxu1 %v9647_v6 }
 0xc30   :  { %7837 = vmatmul.mubr.bf16.vlgmr.msra.gmra.mrb[72].mxu0 %v4840_v7 }
 0xc31   :  { %7857 = vmatmul.mubr.bf16.vlgmr.msra.gmra.mrb[84].mxu1 %v4841_v20  ;;  %7861 = vmatpush3.bf16.msra.mxu0 %v10690_v21 }
 0xc32   :  { %7881 = vmatpush3.bf16.msra.mxu1 %v10690_v21  ;;  %7862 = vmatprep.subr.bf16.mxu0 %v9647_v6 }
 0xc33   :  { %7882 = vmatprep.subr.bf16.mxu1 %v9647_v6  ;;  %7876 = vmatprep.mubr.msk.bf16.mxu0 %vm9648_vm0, %v9647_v6 }
 0xc34   :  { %7896 = vmatprep.mubr.msk.bf16.mxu1 %vm9648_vm0, %v9647_v6 }
 0xc35   :  { %7863 = vmatpush3.bf16.msra.mxu0 %v10700_v18 }
 0xc36   :  { %7883 = vmatpush3.bf16.msra.mxu1 %v10700_v18  ;;  %7864 = vmatprep.subr.bf16.mxu0 %v9647_v6 }
 0xc37   :  { %7884 = vmatprep.subr.bf16.mxu1 %v9647_v6 }
 0xc39   :  { %7865 = vmatpush3.bf16.msra.mxu0 %v10706_v22 }
 0xc3a   :  { %7885 = vmatpush3.bf16.msra.mxu1 %v10706_v22  ;;  %7866 = vmatprep.subr.bf16.mxu0 %v9647_v6 }
 0xc3b   :  { %7886 = vmatprep.subr.bf16.mxu1 %v9647_v6 }
 0xc3d   :  { %7867 = vmatpush3.bf16.msra.mxu0 %v10712_v54 }
 0xc3e   :  { %7887 = vmatpush3.bf16.msra.mxu1 %v10712_v54  ;;  %7868 = vmatprep.subr.bf16.mxu0 %v9647_v6 }
 0xc3f   :  { %7888 = vmatprep.subr.bf16.mxu1 %v9647_v6 }
 0xc41   :  { %7869 = vmatpush3.bf16.msra.mxu0 %v10718_v23 }
 0xc42   :  { %7889 = vmatpush3.bf16.msra.mxu1 %v10718_v23  ;;  %7870 = vmatprep.subr.bf16.mxu0 %v9647_v6 }
 0xc43   :  { %v5151_v32 = vpop.f32.mrb[48].mxu0  ;;  %7890 = vmatprep.subr.bf16.mxu1 %v9647_v6 }
 0xc44   :  { %5157 = vst [vmem:[%s9861_s9 + $0xa] sm:$0x3] %v5151_v32  ;;  %v5192_v26 = vpop.f32.mrb[60].mxu1  ;;  %v7598_v27 = vpop.f32.mrb[49].mxu0 }
 0xc45   :  { %5198 = vst [vmem:[%s9861_s9 + $0xc] sm:$0x3] %v5192_v26  ;;  %v7618_v28 = vpop.f32.mrb[61].mxu1  ;;  %v5154_v30 = vpop.f32.mrb[50].mxu0  ;;  %7871 = vmatpush3.bf16.msra.mxu0 %v10730_v34 }
 0xc46   :  { %v5195_v59 = vpop.f32.mrb[62].mxu1  ;;  %7891 = vmatpush3.bf16.msra.mxu1 %v10730_v34  ;;  %v7599_v10 = vpop.f32.mrb[51].mxu0  ;;  %7872 = vmatprep.subr.bf16.mxu0 %v9647_v6 }
 0xc47   :  { %v7619_v35 = vpop.f32.mrb[63].mxu1  ;;  %7892 = vmatprep.subr.bf16.mxu1 %v9647_v6 }
 0xc49   :  { %7873 = vmatpush3.bf16.msra.mxu0 %v10738_v43 }
 0xc4a   :  { %7893 = vmatpush3.bf16.msra.mxu1 %v10738_v43  ;;  %7874 = vmatprep.subr.bf16.mxu0 %v9647_v6 }
 0xc4b   :  { %7894 = vmatprep.subr.bf16.mxu1 %v9647_v6 }
 0xc4d   :  { %7875 = vmatpush3.bf16.msra.mxu0 %v10744_v39 }
 0xc4e   :  { %7895 = vmatpush3.bf16.msra.mxu1 %v10744_v39  ;;  %7900 = vmatprep.subr.bf16.mxu0 %v9647_v6 }
 0xc4f   :  { %7920 = vmatprep.subr.bf16.mxu1 %v9647_v6 }
 0xc50   :  { %7877 = vmatmul.mubr.bf16.vlgmr.msra.gmra.mrb[76].mxu0 %v4842_v55 }
 0xc51   :  { %7897 = vmatmul.mubr.bf16.vlgmr.msra.gmra.mrb[88].mxu1 %v4843_v40  ;;  %7901 = vmatpush3.bf16.msra.mxu0 %v10690_v21 }
 0xc52   :  { %7921 = vmatpush3.bf16.msra.mxu1 %v10690_v21  ;;  %7902 = vmatprep.subr.bf16.mxu0 %v9647_v6 }
 0xc53   :  { %7922 = vmatprep.subr.bf16.mxu1 %v9647_v6  ;;  %7916 = vmatprep.mubr.msk.bf16.mxu0 %vm9648_vm0, %v9647_v6 }
 0xc54   :  { %7936 = vmatprep.mubr.msk.bf16.mxu1 %vm9648_vm0, %v9647_v6 }
 0xc55   :  { %7903 = vmatpush3.bf16.msra.mxu0 %v10700_v18 }
 0xc56   :  { %7923 = vmatpush3.bf16.msra.mxu1 %v10700_v18  ;;  %7904 = vmatprep.subr.bf16.mxu0 %v9647_v6 }
 0xc57   :  { %7924 = vmatprep.subr.bf16.mxu1 %v9647_v6 }
 0xc59   :  { %7905 = vmatpush3.bf16.msra.mxu0 %v10706_v22 }
 0xc5a   :  { %7925 = vmatpush3.bf16.msra.mxu1 %v10706_v22  ;;  %7906 = vmatprep.subr.bf16.mxu0 %v9647_v6 }
 0xc5b   :  { %7926 = vmatprep.subr.bf16.mxu1 %v9647_v6 }
 0xc5d   :  { %7907 = vmatpush3.bf16.msra.mxu0 %v10712_v54 }
 0xc5e   :  { %7927 = vmatpush3.bf16.msra.mxu1 %v10712_v54  ;;  %7908 = vmatprep.subr.bf16.mxu0 %v9647_v6 }
 0xc5f   :  { %7928 = vmatprep.subr.bf16.mxu1 %v9647_v6 }
 0xc61   :  { %7909 = vmatpush3.bf16.msra.mxu0 %v10718_v23 }
 0xc62   :  { %7929 = vmatpush3.bf16.msra.mxu1 %v10718_v23  ;;  %7910 = vmatprep.subr.bf16.mxu0 %v9647_v6 }
 0xc63   :  { %v5233_v12 = vpop.f32.mrb[52].mxu0  ;;  %7930 = vmatprep.subr.bf16.mxu1 %v9647_v6 }
 0xc64   :  { %5239 = vst [vmem:[%s9861_s9 + $0xe] sm:$0x3] %v5233_v12  ;;  %v5274_v11 = vpop.f32.mrb[64].mxu1  ;;  %v7638_v50 = vpop.f32.mrb[53].mxu0 }
 0xc65   :  { %5280 = vst [vmem:[%s9861_s9 + $0x10] sm:$0x3] %v5274_v11  ;;  %v7658_v17 = vpop.f32.mrb[65].mxu1  ;;  %v5236_v51 = vpop.f32.mrb[54].mxu0  ;;  %7911 = vmatpush3.bf16.msra.mxu0 %v10730_v34 }
 0xc66   :  { %v5277_v36 = vpop.f32.mrb[66].mxu1  ;;  %7931 = vmatpush3.bf16.msra.mxu1 %v10730_v34  ;;  %v7639_v57 = vpop.f32.mrb[55].mxu0  ;;  %7912 = vmatprep.subr.bf16.mxu0 %v9647_v6 }
 0xc67   :  { %v7659_v53 = vpop.f32.mrb[67].mxu1  ;;  %7932 = vmatprep.subr.bf16.mxu1 %v9647_v6 }
 0xc69   :  { %7913 = vmatpush3.bf16.msra.mxu0 %v10738_v43 }
 0xc6a   :  { %7933 = vmatpush3.bf16.msra.mxu1 %v10738_v43  ;;  %7914 = vmatprep.subr.bf16.mxu0 %v9647_v6 }
 0xc6b   :  { %7934 = vmatprep.subr.bf16.mxu1 %v9647_v6 }
 0xc6d   :  { %7915 = vmatpush3.bf16.msra.mxu0 %v10744_v39 }
 0xc6e   :  { %7935 = vmatpush3.bf16.msra.mxu1 %v10744_v39  ;;  %7940 = vmatprep.subr.bf16.mxu0 %v9647_v6 }
 0xc6f   :  { %7960 = vmatprep.subr.bf16.mxu1 %v9647_v6 }
 0xc70   :  { %7917 = vmatmul.mubr.bf16.vlgmr.msra.gmra.mrb[80].mxu0 %v4844_v62 }
 0xc71   :  { %7937 = vmatmul.mubr.bf16.vlgmr.msra.gmra.mrb[92].mxu1 %v4845_v60  ;;  %7941 = vmatpush3.bf16.msra.mxu0 %v10690_v21 }
 0xc72   :  { %7961 = vmatpush3.bf16.msra.mxu1 %v10690_v21  ;;  %7942 = vmatprep.subr.bf16.mxu0 %v9647_v6 }
 0xc73   :  { %7962 = vmatprep.subr.bf16.mxu1 %v9647_v6  ;;  %7956 = vmatprep.mubr.msk.bf16.mxu0 %vm9648_vm0, %v9647_v6 }
 0xc74   :  { %7976 = vmatprep.mubr.msk.bf16.mxu1 %vm9648_vm0, %v9647_v6 }
 0xc75   :  { %7943 = vmatpush3.bf16.msra.mxu0 %v10700_v18 }
 0xc76   :  { %7963 = vmatpush3.bf16.msra.mxu1 %v10700_v18  ;;  %7944 = vmatprep.subr.bf16.mxu0 %v9647_v6 }
 0xc77   :  { %7964 = vmatprep.subr.bf16.mxu1 %v9647_v6 }
 0xc79   :  { %7945 = vmatpush3.bf16.msra.mxu0 %v10706_v22 }
 0xc7a   :  { %7965 = vmatpush3.bf16.msra.mxu1 %v10706_v22  ;;  %7946 = vmatprep.subr.bf16.mxu0 %v9647_v6 }
 0xc7b   :  { %7966 = vmatprep.subr.bf16.mxu1 %v9647_v6 }
 0xc7d   :  { %7947 = vmatpush3.bf16.msra.mxu0 %v10712_v54 }
 0xc7e   :  { %7967 = vmatpush3.bf16.msra.mxu1 %v10712_v54  ;;  %7948 = vmatprep.subr.bf16.mxu0 %v9647_v6 }
 0xc7f   :  { %7968 = vmatprep.subr.bf16.mxu1 %v9647_v6 }
 0xc81   :  { %7949 = vmatpush3.bf16.msra.mxu0 %v10718_v23 }
 0xc82   :  { %7969 = vmatpush3.bf16.msra.mxu1 %v10718_v23  ;;  %7950 = vmatprep.subr.bf16.mxu0 %v9647_v6 }
 0xc83   :  { %v5315_v19 = vpop.f32.mrb[56].mxu0  ;;  %7970 = vmatprep.subr.bf16.mxu1 %v9647_v6 }
 0xc84   :  { %5321 = vst [vmem:[%s9861_s9 + $0x12] sm:$0x3] %v5315_v19  ;;  %v5356_v52 = vpop.f32.mrb[68].mxu1  ;;  %v7678_v61 = vpop.f32.mrb[57].mxu0 }
 0xc85   :  { %5362 = vst [vmem:[%s9861_s9 + $0x14] sm:$0x3] %v5356_v52  ;;  %v7698_v63 = vpop.f32.mrb[69].mxu1  ;;  %v5318_v8 = vpop.f32.mrb[58].mxu0  ;;  %7951 = vmatpush3.bf16.msra.mxu0 %v10730_v34 }
 0xc86   :  { %v5359_v14 = vpop.f32.mrb[70].mxu1  ;;  %7971 = vmatpush3.bf16.msra.mxu1 %v10730_v34  ;;  %v7679_v16 = vpop.f32.mrb[59].mxu0  ;;  %7952 = vmatprep.subr.bf16.mxu0 %v9647_v6 }
 0xc87   :  { %v7699_v31 = vpop.f32.mrb[71].mxu1  ;;  %7972 = vmatprep.subr.bf16.mxu1 %v9647_v6 }
 0xc89   :  { %7953 = vmatpush3.bf16.msra.mxu0 %v10738_v43 }
 0xc8a   :  { %7973 = vmatpush3.bf16.msra.mxu1 %v10738_v43  ;;  %7954 = vmatprep.subr.bf16.mxu0 %v9647_v6 }
 0xc8b   :  { %7974 = vmatprep.subr.bf16.mxu1 %v9647_v6 }
 0xc8d   :  { %7955 = vmatpush3.bf16.msra.mxu0 %v10744_v39 }
 0xc8e   :  { %7975 = vmatpush3.bf16.msra.mxu1 %v10744_v39  ;;  %7980 = vmatprep.subr.bf16.mxu0 %v9647_v6 }
 0xc8f   :  { %7986 = vmatprep.subr.bf16.mxu1 %v9647_v6 }
 0xc90   :  { %7957 = vmatmul.mubr.bf16.vlgmr.msra.gmra.mrb[84].mxu0 %v4846_v48 }
 0xc91   :  { %7977 = vmatmul.mubr.bf16.vlgmr.msra.gmra.mrb[96].mxu1 %v4847_v4  ;;  %7981 = vmatpush3.bf16.msra.mxu0 %v8794_v45 }
 0xc92   :  { %7982 = vmatprep.mubr.msk.bf16.mxu0 %vm9648_vm0, %v9647_v6  ;;  %7990 = vmatprep.mubr.msk.bf16.mxu1 %vm9648_vm0, %v9647_v6 }
 0xc93   :  { %7994 = vmatprep.subr.bf16.mxu0 %v9647_v6 }
 0xc98   :  { %7983 = vmatmul.mubr.msk.bf16.vlgmr.msra.gmra.mrb[88].mxu0 %vm1652_vm8, %v10158_v58 }
 0xc99   :  { %7998 = vmatprep.mubr.msk.bf16.mxu0 %vm9648_vm0, %v9647_v6 }
 0xca3   :  { %v5397_v13 = vpop.f32.mrb[60].mxu0 }
 0xca4   :  { %5403 = vst [vmem:[%s9861_s9 + $0x16] sm:$0x3] %v5397_v13  ;;  %v5438_v41 = vpop.f32.mrb[72].mxu1  ;;  %v7718_v56 = vpop.f32.mrb[61].mxu0 }
 0xca5   :  { %5444 = vst [vmem:[%s9861_s9 + $0x18] sm:$0x3] %v5438_v41  ;;  %v7738_v7 = vpop.f32.mrb[73].mxu1  ;;  %v5400_v20 = vpop.f32.mrb[62].mxu0 }
 0xca6   :  { %v5441_v21 = vpop.f32.mrb[74].mxu1  ;;  %v7719_v18 = vpop.f32.mrb[63].mxu0 }
 0xca7   :  { %v7739_v22 = vpop.f32.mrb[75].mxu1 }
 0xca8   :  { %v8795_v22 = vld [vmem:[#allocation32] sm:$0xff]  }
 0xca9   :  { %7987 = vmatpush3.bf16.msra.mxu1 %v8795_v22 }
 0xcaa   :  { %7988 = vmatprep.subr.bf16.mxu1 %v9647_v6 }
 0xcc3   :  { %v5479_v54 = vpop.f32.mrb[64].mxu0 }
 0xcc4   :  { %5485 = vst [vmem:[%s9861_s9 + $0x1a] sm:$0x3] %v5479_v54  ;;  %v5520_v23 = vpop.f32.mrb[76].mxu1  ;;  %v7758_v58 = vpop.f32.mrb[65].mxu0  ;;  %v8796_v54 = vld [vmem:[#allocation32 + $0x8] sm:$0xff]  }
 0xcc5   :  { %5526 = vst [vmem:[%s9861_s9 + $0x1c] sm:$0x3] %v5520_v23  ;;  %v7778_v29 = vpop.f32.mrb[77].mxu1  ;;  %v5482_v25 = vpop.f32.mrb[66].mxu0  ;;  %7989 = vmatpush3.bf16.msra.mxu1 %v8796_v54  ;;  %v8797_v23 = vld [vmem:[#allocation35] sm:$0xff]  }
 0xcc6   :  { %v5523_v32 = vpop.f32.mrb[78].mxu1  ;;  %v7759_v26 = vpop.f32.mrb[67].mxu0  ;;  %8002 = vmatprep.subr.bf16.mxu1 %v9647_v6  ;;  %7995 = vmatpush3.bf16.msra.mxu0 %v8797_v23 }
 0xcc7   :  { %v7779_v27 = vpop.f32.mrb[79].mxu1  ;;  %7996 = vmatprep.subr.bf16.mxu0 %v9647_v6  ;;  %v7042_v26 = vld [vmem:[#allocation29] ss:$0 sm:$0xff] }
 0xce3   :  { %v5561_v28 = vpop.f32.mrb[68].mxu0 }
 0xce4   :  { %5567 = vst [vmem:[%s9861_s9 + $0x1e] sm:$0x3] %v5561_v28  ;;  %v5602_v30 = vpop.f32.mrb[80].mxu1  ;;  %v7798_v34 = vpop.f32.mrb[69].mxu0  ;;  %v7043_v28 = vld [vmem:[#allocation31] ss:$0 sm:$0xff] }
 0xce5   :  { %5608 = vst [vmem:[%s9861_s9 + $0x20] sm:$0x3] %v5602_v30  ;;  %v7818_v37 = vpop.f32.mrb[81].mxu1  ;;  %v5564_v59 = vpop.f32.mrb[70].mxu0 }
 0xce6   :  { %v5605_v10 = vpop.f32.mrb[82].mxu1  ;;  %v7799_v38 = vpop.f32.mrb[71].mxu0  ;;  %v8798_v59 = vld [vmem:[#allocation35 + $0x8] sm:$0xff]  }
 0xce7   :  { %v7819_v35 = vpop.f32.mrb[83].mxu1  ;;  %7997 = vmatpush3.bf16.msra.mxu0 %v8798_v59  ;;  %v7044_v10 = vld [vmem:[#allocation34] ss:$0 sm:$0xff] }
 0xce8   :  { %8010 = vmatprep.subr.bf16.mxu0 %v9647_v6 }
 0xd03   :  { %v5643_v43 = vpop.f32.mrb[72].mxu0 }
 0xd04   :  { %5649 = vst [vmem:[%s9861_s9 + $0x22] sm:$0x3] %v5643_v43  ;;  %v5684_v42 = vpop.f32.mrb[84].mxu1  ;;  %v7838_v24 = vpop.f32.mrb[73].mxu0 }
 0xd05   :  { %5690 = vst [vmem:[%s9861_s9 + $0x24] sm:$0x3] %v5684_v42  ;;  %v7858_v39 = vpop.f32.mrb[85].mxu1  ;;  %v5646_v55 = vpop.f32.mrb[74].mxu0 }
 0xd06   :  { %v5687_v40 = vpop.f32.mrb[86].mxu1  ;;  %v7839_v46 = vpop.f32.mrb[75].mxu0  ;;  %v7048_v55 = vld [vmem:[#allocation37] ss:$0 sm:$0xff] }
 0xd07   :  { %v7859_v47 = vpop.f32.mrb[87].mxu1 }
 0xd23   :  { %v5725_v12 = vpop.f32.mrb[76].mxu0 }
 0xd24   :  { %5731 = vst [vmem:[%s9861_s9 + $0x26] sm:$0x3] %v5725_v12  ;;  %v5766_v11 = vpop.f32.mrb[88].mxu1  ;;  %v7878_v50 = vpop.f32.mrb[77].mxu0 }
 0xd25   :  { %5772 = vst [vmem:[%s9861_s9 + $0x28] sm:$0x3] %v5766_v11  ;;  %v7898_v17 = vpop.f32.mrb[89].mxu1  ;;  %v5728_v51 = vpop.f32.mrb[78].mxu0 }
 0xd26   :  { %v5769_v0 = vpop.f32.mrb[90].mxu1  ;;  %v7879_v36 = vpop.f32.mrb[79].mxu0 }
 0xd27   :  { %v7899_v57 = vpop.f32.mrb[91].mxu1 }
 0xd43   :  { %v5807_v1 = vpop.f32.mrb[80].mxu0 }
 0xd44   :  { %5813 = vst [vmem:[%s9861_s9 + $0x2a] sm:$0x3] %v5807_v1  ;;  %v5848_v53 = vpop.f32.mrb[92].mxu1  ;;  %v7918_v3 = vpop.f32.mrb[81].mxu0 }
 0xd45   :  { %5854 = vst [vmem:[%s9861_s9 + $0x2c] sm:$0x3] %v5848_v53  ;;  %v7938_v5 = vpop.f32.mrb[93].mxu1  ;;  %v5810_v62 = vpop.f32.mrb[82].mxu0  ;;  %v8799_v53 = vld [vmem:[#allocation41] sm:$0xff]   ;;  %v8800_v3 = vld [vmem:[#allocation41 + $0x8] sm:$0xff]  }
 0xd46   :  { %v5851_v60 = vpop.f32.mrb[94].mxu1  ;;  %v7919_v44 = vpop.f32.mrb[83].mxu0 }
 0xd47   :  { %v7939_v19 = vpop.f32.mrb[95].mxu1 }
 0xd63   :  { %v5889_v49 = vpop.f32.mrb[84].mxu0 }
 0xd64   :  { %5895 = vst [vmem:[%s9861_s9 + $0x2e] sm:$0x3] %v5889_v49  ;;  %v5930_v52 = vpop.f32.mrb[96].mxu1  ;;  %v7958_v61 = vpop.f32.mrb[85].mxu0  ;;  %v7052_v49 = vld [vmem:[#allocation38] ss:$0 sm:$0xff] }
 0xd65   :  { %5936 = vst [vmem:[%s9861_s9 + $0x30] sm:$0x3] %v5930_v52  ;;  %v7978_v63 = vpop.f32.mrb[97].mxu1  ;;  %v5892_v8 = vpop.f32.mrb[86].mxu0  ;;  %s10974_s9 = sld [smem:[#allocation88_spill]] }
 0xd66   :  { %v5933_v9 = vpop.f32.mrb[98].mxu1  ;;  %v7959_v14 = vpop.f32.mrb[87].mxu0  ;;  %v7053_v61 = vld [vmem:[#allocation40] ss:$0 sm:$0xff] }
 0xd67   :  { %v7979_v16 = vpop.f32.mrb[99].mxu1 }
 0xd6b   :  { %v5986_v31 = vpop.f32.mrb[88].mxu0  ;;  %v8801_v5 = vld [vmem:[%s10974_s9] sm:$0xff]   ;;  %v8802_v14 = vld [vmem:[%s10974_s9 + $0x8] sm:$0xff]   ;;  %v8803_v16 = vld [vmem:[%s10974_s9 + $0x10] sm:$0xff]  }
 0xd6c   :  { %v5987_v2 = vadd.f32 %v7038_v33, %v5986_v31  ;;  %v7984_v45 = vpop.f32.mrb[89].mxu0  ;;  %v8804_v33 = vld [vmem:[%s10974_s9 + $0x18] sm:$0xff]   ;;  %v8805_v31 = vld [vmem:[%s10974_s9 + $0x20] sm:$0xff]  }
 0xd6d   :  { %v5989_v48 = vpop.f32.mrb[90].mxu0  ;;  %v8808_v45 = vld [vmem:[%s10974_s9 + $0x38] sm:$0xff]  }
 0xd6e   :  { %v5999_v4 = vadd.f32 %v7041_v15, %v5987_v2  ;;  %v7985_v13 = vpop.f32.mrb[91].mxu0  ;;  %v8806_v15 = vld [vmem:[%s10974_s9 + $0x28] sm:$0xff]   ;;  %v8807_v2 = vld [vmem:[%s10974_s9 + $0x30] sm:$0xff]   ;;  %v7054_v48 = vld [vmem:[#allocation43] ss:$0 sm:$0xff] }
 0xd70   :  { %v6003_v41 = vsel %vm6002_vm9, %v5999_v4, 0.0 }
 0xd71   :  { %6004 = vadd.xlane.f32.xlu1 %v6003_v41 }
 0xdfe   :  { %v6005_v56 = vpop.xlane.xlu1 %6004 }
 0xdff   :  { %v6007_v7 = vmul.f32 0.03125, %v6005_v56 }
 0xe01   :  { %v6008_v20 = vsub.f32 %v5999_v4, %v6007_v7 }
 0xe03   :  { %v6009_v21 = vmul.f32 %v6008_v20, %v6008_v20 }
 0xe05   :  { %v6010_v18 = vsel %vm6002_vm9, %v6009_v21, 0.0 }
 0xe06   :  { %6011 = vadd.xlane.f32.xlu0 %v6010_v18 }
 0xe93   :  { %v6012_v58 = vpop.xlane.xlu0 %6011 }
 0xe94   :  { %v6013_v29 = vmul.f32 0.03125, %v6012_v58 }
 0xe96   :  { %v6014_v25 = vadd.f32 1e-05, %v6013_v29 }
 0xe98   :  { %8815 = vrsqrt.f32 %v6014_v25 }
 0xea2   :  { %v8816_v32 = vpop.eup %8815 }
 0xea3   :  { %v6016_v27 = vmul.f32 %v8816_v32, %v6008_v20 }
 0xea5   :  { %v6023_v30 = vmul.f32 %v7042_v26, %v6016_v27  ;;  %v7066_v27 = vld [vmem:[#allocation44] ss:$0 sm:$0xff] }
 0xea7   :  { %v6030_v34 = vadd.f32 %v7043_v28, %v6023_v30 }
 0xea9   :  { %v6031_v37 = vpack.c.bf16 %v6030_v34, %v6030_v34 }
 0xeab   :  { %7991 = vmatmul.mubr.msk.bf16.vlgmr.msra.gmra.mrb[100].mxu1 %vm1212_vm3, %v6031_v37 }
 0xeac   :  { %8006 = vmatprep.mubr.msk.bf16.mxu1 %vm9648_vm0, %v9647_v6  ;;  %8003 = vmatpush3.bf16.msra.mxu1 %v8799_v53 }
 0xead   :  { %8004 = vmatprep.subr.bf16.mxu1 %v9647_v6 }
 0xeb0   :  { %8005 = vmatpush3.bf16.msra.mxu1 %v8800_v3 }
 0xeb1   :  { %8030 = vmatprep.subr.bf16.mxu1 %v9647_v6 }
 0xf7e   :  { %v6092_v38 = vpop.f32.mrb[100].mxu1 }
 0xf7f   :  { %v6093_v35 = vadd.f32 %v7044_v10, %v6092_v38  ;;  %v7992_v43 = vpop.f32.mrb[101].mxu1 }
 0xf80   :  { %v6095_v42 = vpop.f32.mrb[102].mxu1 }
 0xf81   :  { %v6098_v24 = vpack.c.bf16 %v6093_v35, %v6093_v35  ;;  %v7993_v39 = vpop.f32.mrb[103].mxu1 }
 0xf82   :  { %v8809_v39 = vld [vmem:[#allocation49] sm:$0xff]  }
 0xf83   :  { %7999 = vmatmul.mubr.msk.bf16.vlgmr.msra.gmra.mrb[92].mxu0 %vm1212_vm3, %v6098_v24 }
 0xf84   :  { %8026 = vmatprep.mubr.msk.bf16.mxu0 %vm9648_vm0, %v9647_v6  ;;  %8011 = vmatpush3.bf16.msra.mxu0 %v8801_v5 }
 0xf85   :  { %8012 = vmatprep.subr.bf16.mxu0 %v9647_v6 }
 0xf88   :  { %8013 = vmatpush3.bf16.msra.mxu0 %v8802_v14 }
 0xf89   :  { %8014 = vmatprep.subr.bf16.mxu0 %v9647_v6 }
 0xf8c   :  { %8015 = vmatpush3.bf16.msra.mxu0 %v8803_v16 }
 0xf8d   :  { %8016 = vmatprep.subr.bf16.mxu0 %v9647_v6 }
 0xf90   :  { %8017 = vmatpush3.bf16.msra.mxu0 %v8804_v33 }
 0xf91   :  { %8018 = vmatprep.subr.bf16.mxu0 %v9647_v6 }
 0xf94   :  { %8019 = vmatpush3.bf16.msra.mxu0 %v8805_v31 }
 0xf95   :  { %8020 = vmatprep.subr.bf16.mxu0 %v9647_v6 }
 0xf98   :  { %8021 = vmatpush3.bf16.msra.mxu0 %v8806_v15 }
 0xf99   :  { %8022 = vmatprep.subr.bf16.mxu0 %v9647_v6 }
 0xf9c   :  { %8023 = vmatpush3.bf16.msra.mxu0 %v8807_v2 }
 0xf9d   :  { %8024 = vmatprep.subr.bf16.mxu0 %v9647_v6 }
 0xfa0   :  { %8025 = vmatpush3.bf16.msra.mxu0 %v8808_v45 }
0x1056   :  { %v6159_v40 = vpop.f32.mrb[92].mxu0 }
0x1057   :  { %v6160_v46 = vadd.f32 %v7048_v55, %v6159_v40  ;;  %v8000_v47 = vpop.f32.mrb[93].mxu0  ;;  %v8810_v55 = vld [vmem:[#allocation49 + $0x8] sm:$0xff]  }
0x1058   :  { %v6162_v12 = vpop.f32.mrb[94].mxu0 }
0x1059   :  { %v10871_v11 = vadd.f32 %v6160_v46, %v5999_v4  ;;  %v8001_v50 = vpop.f32.mrb[95].mxu0 }
0x105b   :  { %v6168_v17 = vsel %vm6002_vm9, %v10871_v11, 0.0 }
0x105c   :  { %6169 = vadd.xlane.f32.xlu0 %v6168_v17  ;;  %v7068_v17 = vld [vmem:[#allocation47] ss:$0 sm:$0xff] }
0x10e9   :  { %v6170_v51 = vpop.xlane.xlu0 %6169 }
0x10ea   :  { %v6171_v0 = vmul.f32 0.03125, %v6170_v51 }
0x10ec   :  { %v6172_v36 = vsub.f32 %v10871_v11, %v6171_v0 }
0x10ee   :  { %v6173_v57 = vmul.f32 %v6172_v36, %v6172_v36 }
0x10f0   :  { %v6174_v1 = vsel %vm6002_vm9, %v6173_v57, 0.0 }
0x10f1   :  { %6175 = vadd.xlane.f32.xlu1 %v6174_v1 }
0x117e   :  { %v6176_v62 = vpop.xlane.xlu1 %6175 }
0x117f   :  { %v6177_v60 = vmul.f32 0.03125, %v6176_v62 }
0x1181   :  { %v6178_v44 = vadd.f32 1e-05, %v6177_v60 }
0x1183   :  { %8817 = vrsqrt.f32 %v6178_v44 }
0x118d   :  { %v8818_v19 = vpop.eup %8817 }
0x118e   :  { %v6180_v52 = vmul.f32 %v8818_v19, %v6172_v36 }
0x1190   :  { %v6187_v63 = vmul.f32 %v7052_v49, %v6180_v52 }
0x1192   :  { %v6194_v8 = vadd.f32 %v7053_v61, %v6187_v63 }
0x1194   :  { %v6195_v9 = vpack.c.bf16 %v6194_v8, %v6194_v8 }
0x1196   :  { %8007 = vmatmul.mubr.msk.bf16.vlgmr.msra.gmra.mrb[104].mxu1 %vm1212_vm3, %v6195_v9 }
0x1197   :  { %8034 = vmatprep.mubr.msk.bf16.mxu1 %vm9648_vm0, %v9647_v6  ;;  %8031 = vmatpush3.bf16.msra.mxu1 %v8809_v39 }
0x1198   :  { %8032 = vmatprep.subr.bf16.mxu1 %v9647_v6 }
0x119b   :  { %8033 = vmatpush3.bf16.msra.mxu1 %v8810_v55 }
0x1269   :  { %v6256_v4 = vpop.f32.mrb[104].mxu1 }
0x126a   :  { %v6257_v13 = vadd.f32 %v7054_v48, %v6256_v4  ;;  %v8008_v41 = vpop.f32.mrb[105].mxu1 }
0x126b   :  { %v6259_v56 = vpop.f32.mrb[106].mxu1 }
0x126c   :  { %v6263_v7 = vmul.f32 %v6257_v13, %v6257_v13  ;;  %v8009_v20 = vpop.f32.mrb[107].mxu1  ;;  %v6262_v58 = vmul.f32 0.5, %v6257_v13 }
0x126e   :  { %v6264_v21 = vmul.f32 %v6263_v7, %v6257_v13 }
0x1270   :  { %v6265_v18 = vmul.f32 0.044715, %v6264_v21 }
0x1272   :  { %v6266_v22 = vadd.f32 %v6265_v18, %v6257_v13 }
0x1274   :  { %v6267_v54 = vmul.f32 0.7978846, %v6266_v22 }
0x1276   :  { %8819 = vtanh.f32 %v6267_v54 }
0x1280   :  { %v8820_v23 = vpop.eup %8819 }
0x1281   :  { %v6269_v29 = vadd.f32 1.0, %v8820_v23 }
0x1283   :  { %v6270_v25 = vmul.f32 %v6269_v29, %v6262_v58 }
0x1285   :  { %v6271_v32 = vpack.c.bf16 %v6270_v25, %v6270_v25 }
0x1287   :  { %8027 = vmatmul.mubr.bf16.vlgmr.msra.gmra.mrb[96].mxu0 %v6271_v32 }
0x135a   :  { %v6370_v26 = vpop.f32.mrb[96].mxu0 }
0x135b   :  { %v6376_v28 = vadd.f32 %v6370_v26, %v10871_v11  ;;  %v8028_v30 = vpop.f32.mrb[97].mxu0  ;;  %v7067_v11 = vld [vmem:[#allocation46] ss:$0 sm:$0xff] }
0x135c   :  { %v6373_v34 = vpop.f32.mrb[98].mxu0 }
0x135d   :  { %v8029_v37 = vpop.f32.mrb[99].mxu0  ;;  %v6384_v59 = vadd.f32 %v7066_v27, %v6376_v28 }
0x135f   :  { %v6387_v10 = vsel %vm6002_vm9, %v6384_v59, 0.0 }
0x1360   :  { %6388 = vadd.xlane.f32.xlu0 %v6387_v10 }
0x13ed   :  { %v6389_v38 = vpop.xlane.xlu0 %6388 }
0x13ee   :  { %v6390_v35 = vmul.f32 0.03125, %v6389_v38 }
0x13f0   :  { %v6391_v43 = vsub.f32 %v6384_v59, %v6390_v35 }
0x13f2   :  { %v6392_v42 = vmul.f32 %v6391_v43, %v6391_v43 }
0x13f4   :  { %v6393_v24 = vsel %vm6002_vm9, %v6392_v42, 0.0 }
0x13f5   :  { %6394 = vadd.xlane.f32.xlu1 %v6393_v24 }
0x1482   :  { %v6395_v40 = vpop.xlane.xlu1 %6394 }
0x1483   :  { %v6396_v46 = vmul.f32 0.03125, %v6395_v40 }
0x1485   :  { %v6397_v47 = vadd.f32 1e-05, %v6396_v46 }
0x1487   :  { %8821 = vrsqrt.f32 %v6397_v47 }
0x1491   :  { %v8822_v12 = vpop.eup %8821 }
0x1492   :  { %v6399_v50 = vmul.f32 %v8822_v12, %v6391_v43 }
0x1494   :  { %v6406_v51 = vmul.f32 %v7067_v11, %v6399_v50 }
0x1496   :  { %v6413_v0 = vadd.f32 %v7068_v17, %v6406_v51 }
0x1498   :  { %v6414_v36 = vpack.c.bf16 %v6413_v0, %v6413_v0 }
0x149a   :  { %8035 = vmatmul.mubr.msk.bf16.vlgmr.msra.gmra.mrb[108].mxu1 %vm1212_vm3, %v6414_v36 }
0x156d   :  { %v6468_v57 = vpop.f32.mrb[108].mxu1 }
0x156e   :  { %6474 = vst [vmem:[#allocation50] sm:$0x3] %v6468_v57  ;;  %v8036_v6 = vpop.f32.mrb[109].mxu1 }
0x156f   :  { %v6471_v1 = vpop.f32.mrb[110].mxu1 }
0x1570   :  { %9524 = shalt.err (!%p9521_p0)
}
0x1571   :  { %s9525_s23 = scalar_lea.hbm %s9856_s3, 32 }
0x1572   :  { %p9526_p1 = scmp.ne.s32.totalorder %s9856_s3, %s9525_s23  ;;  %p9529_p2 = scmp.lt.u32.totalorder %s9525_s23, %s9856_s3 }
0x1574   :  { %p9531_p3 = pnand %p9529_p2, %p9526_p1 }
0x1576   :  { %9534 = shalt.err (!%p9531_p3)
}
0x1577   :  { %6486 = dma.vmem_to_hbm [thread:$0]  %s6484_s30, 32, %s9856_s3, [#allocation4]   ;;  %v8037_v53 = vpop.f32.mrb[111].mxu1 }
0x1578   :  { %9567 = dma.done.wait [#allocation4], 32  }
0x1579   :  { %9568 = vsyncadd [#allocation4], 4294967264 }
0x157a   :  { %6496 = vsyncpa [#allocation3], 1 }
0x157b   :  { %6497 = vsyncpa [#allocation6], 1 }
0x157c   :  { %6498 = vsyncpa [#allocation9], 1 }
0x157d   :  { %6499 = vsyncpa [#allocation12], 1 }
0x157e   :  { %6500 = vsyncpa [#allocation15], 1 }
0x157f   :  { %6501 = vsyncpa [#allocation18], 1 }
0x1580   :  { %6502 = vsyncpa [#allocation21], 1 }
0x1581   :  { %6503 = vsyncpa [#allocation24], 1 }
0x1582   :  { %6504 = vsyncpa [#allocation27], 1 }
0x1583   :  { %6505 = vsyncpa [#allocation30], 1 }
0x1584   :  { %6506 = vsyncpa [#allocation33], 1 }
0x1585   :  { %6507 = vsyncpa [#allocation36], 1 }
0x1586   :  { %6508 = vsyncpa [#allocation39], 1 }
0x1587   :  { %6509 = vsyncpa [#allocation42], 1 }
0x1588   :  { %6510 = vsyncpa [#allocation45], 1 }
0x1589   :  { %6511 = vsyncpa [#allocation48], 1 }
0x158a   :  { %6512 = vsyncpa [#allocation4], 1 }

</bundles_post_ra>
